<compile_context>
chip_gen: v7x
topology: tpu7x:2x2x1
jax: 0.10.0
libtpu: 0.0.40
codegen_flags: <defaults>
</compile_context>

<pallas_src>
import functools

import jax
import jax.numpy as jnp
from jax import lax
from jax.experimental import pallas as pl
from jax.experimental.pallas import tpu as pltpu

_EPS = 1e-5


def _lanes(c):
    return ((c + 127) // 128) * 128


def _round_up(x, m):
    return ((x + m - 1) // m) * m


@functools.lru_cache(maxsize=None)
def _vmem_capacity_bytes():
    try:
        return int(pltpu.get_tpu_info().vmem_capacity_bytes)
    except Exception:
        return 128 * 1024 * 1024


def _row_budget():
    # Per-pallas_call working-set budget for revolving row tiles; scales with
    # the generation's physical VMEM (~16 MiB on 128 MiB parts, 8 MiB on v7x).
    return max(4 * 1024 * 1024, _vmem_capacity_bytes() // 8)


def _vmem_limit():
    return min(_vmem_capacity_bytes() * 3 // 4, 100 * 1024 * 1024)


@functools.lru_cache(maxsize=None)
def _buffered_supported():
    """Probe whether BlockSpec(pipeline_mode=pl.Buffered(1)) lowers on TPU."""
    try:
        def k(x_ref, o_ref):
            o_ref[...] = x_ref[...] + 1.0

        spec = pl.BlockSpec((8, 128), lambda i: (0, 0),
                            pipeline_mode=pl.Buffered(buffer_count=1))
        out = pl.pallas_call(
            k,
            out_shape=jax.ShapeDtypeStruct((8, 128), jnp.float32),
            grid=(1,),
            in_specs=[spec],
            out_specs=pl.BlockSpec((8, 128), lambda i: (0, 0)),
        )(jnp.zeros((8, 128), jnp.float32))
        jax.block_until_ready(out)
        return True
    except Exception:
        return False


def _const_spec(shape, index_map):
    """BlockSpec for a block that never changes across the grid.

    Single-buffered when supported: halves the VMEM footprint of resident
    weights (the 9-tap conv weight dominates on v7x's 64 MiB VMEM)."""
    if _buffered_supported():
        return pl.BlockSpec(shape, index_map,
                            pipeline_mode=pl.Buffered(buffer_count=1))
    return pl.BlockSpec(shape, index_map)


def _pick_row_tile(m, row_bytes):
    """Largest multiple-of-8 divisor of m whose double-buffered working set
    fits the per-generation row budget (m is a multiple of 8 by construction)."""
    cap = (_row_budget() // (2 * max(row_bytes, 1))) // 8 * 8
    cap = max(8, min(1024, cap))
    for tm in range(cap, 7, -8):
        if m % tm == 0:
            return tm
    return 8


def _row_tiling(m, row_bytes):
    """Like _pick_row_tile but pads m when it has no friendly divisor."""
    cap = (_row_budget() // (2 * max(row_bytes, 1))) // 8 * 8
    cap = max(8, min(1024, cap))
    for tm in (1024, 512, 256, 128, 64, 32, 16, 8):
        if tm <= cap and m % tm == 0:
            return tm, m
    tm = min(128, cap)
    return tm, _round_up(m, tm)


# ----------------------------------------------------------------------------
# Stage A kernel: shared-LHS dual 1x1 conv.
#   prologue: folded BN_2a + ReLU on the x tile
#   branch1 : t @ W1                       (bf16 out)
#   branch2a: relu(BN_2b1(t @ W2a))        (bf16 out, W-halo columns zeroed)
#   optional: t itself (f32) for get_x_bn_relu
# ----------------------------------------------------------------------------
def _stage_a_kernel(x_ref, s0_ref, b0_ref, w1_ref, w2_ref, s1_ref, b1_ref,
                    br1_ref, a_ref, *t_ref, tm, ws, col_lo, col_hi):
    t = jnp.maximum(x_ref[...] * s0_ref[...] + b0_ref[...], 0.0)
    tb = t.astype(jnp.bfloat16)
    br1_ref[...] = jnp.dot(
        tb, w1_ref[...], preferred_element_type=jnp.float32).astype(br1_ref.dtype)
    a = jnp.dot(tb, w2_ref[...], preferred_element_type=jnp.float32)
    a = jnp.maximum(a * s1_ref[...] + b1_ref[...], 0.0)
    # zero the W-halo columns so the downstream 3x3 conv sees exact zeros
    col = (jax.lax.broadcasted_iota(jnp.int32, (tm, 1), 0)
           + pl.program_id(0) * tm) % ws
    keep = jnp.logical_and(col >= col_lo, col < col_hi)
    a_ref[...] = jnp.where(keep, a, 0.0).astype(a_ref.dtype)
    if t_ref:                      # optional x_bn_relu output (exact f32)
        t_ref[0][...] = t


def dual_conv1x1(x2d, s0, b0, w1, w2, s1, b1, *, ws, col_lo, col_hi, emit_t):
    M, K = x2d.shape
    N1, N2 = w1.shape[1], w2.shape[1]
    assert M % 8 == 0
    row_bytes = 4 * K + 2 * N1 + 2 * N2 + (4 * K if emit_t else 0)
    tm = _pick_row_tile(M, row_bytes)
    kern = functools.partial(_stage_a_kernel, tm=tm, ws=ws,
                             col_lo=col_lo, col_hi=col_hi)
    out_shape = [jax.ShapeDtypeStruct((M, N1), jnp.bfloat16),
                 jax.ShapeDtypeStruct((M, N2), jnp.bfloat16)]
    out_specs = [pl.BlockSpec((tm, N1), lambda i: (i, 0)),
                 pl.BlockSpec((tm, N2), lambda i: (i, 0))]
    if emit_t:
        out_shape.append(jax.ShapeDtypeStruct((M, K), jnp.float32))
        out_specs.append(pl.BlockSpec((tm, K), lambda i: (i, 0)))
    return pl.pallas_call(
        kern,
        out_shape=tuple(out_shape),
        grid=(M // tm,),
        in_specs=[
            pl.BlockSpec((tm, K), lambda i: (i, 0)),
            _const_spec((1, K), lambda i: (0, 0)),
            _const_spec((1, K), lambda i: (0, 0)),
            _const_spec((K, N1), lambda i: (0, 0)),
            _const_spec((K, N2), lambda i: (0, 0)),
            _const_spec((1, N2), lambda i: (0, 0)),
            _const_spec((1, N2), lambda i: (0, 0)),
        ],
        out_specs=tuple(out_specs),
        compiler_params=pltpu.CompilerParams(
            dimension_semantics=("parallel",),
            vmem_limit_bytes=_vmem_limit()),
    )(x2d, s0, b0, w1, w2, s1, b1)


# ----------------------------------------------------------------------------
# Stage B kernel: 3x3 dilated conv + BN_2b2 + ReLU + final 1x1 conv + residual.
# The padded activation stays in HBM (pl.ANY); (th + 2*dil)-row strips are
# manually double-buffered into VMEM, so the per-step working set is a strip,
# not the whole image (critical for v7x's 64 MiB VMEM at production widths).
# ----------------------------------------------------------------------------
def _conv3x3_residual_kernel(apad_ref, w_ref, s_ref, b_ref, wout_ref, br1_ref,
                             o_ref, buf, sem, *, th, wo, dil):
    n = pl.program_id(0)
    r = pl.program_id(1)
    n_r = pl.num_programs(1)
    n_n = pl.num_programs(0)
    step = n * n_r + r
    slot = step % 2
    n_rows = th + 2 * dil

    def strip_copy(img, row_tile, slot_idx):
        return pltpu.make_async_copy(
            apad_ref.at[img, pl.ds(row_tile * th, n_rows)],
            buf.at[slot_idx], sem.at[slot_idx])

    # prime the pipeline on the very first grid step
    @pl.when(step == 0)
    def _():
        strip_copy(0, 0, 0).start()

    # wait for this step's strip (issued by the previous step / the prime)
    strip_copy(0, 0, slot).wait()

    # prefetch the next step's strip into the other slot
    @pl.when(step + 1 < n_n * n_r)
    def _():
        wrap = r + 1 == n_r
        nxt_n = jnp.where(wrap, n + 1, n)
        nxt_r = jnp.where(wrap, 0, r + 1)
        strip_copy(nxt_n, nxt_r, 1 - slot).start()

    strip = buf[slot]                                    # (n_rows, Ws, C4p) bf16
    acc = None                                           # init from first dot
    for ky in range(3):
        rows_ky = strip[ky * dil:ky * dil + th]          # (th, Ws, C4p)
        for kx in range(3):
            win = rows_ky[:, kx * dil:kx * dil + wo, :]  # (th, wo, C4p)
            part = jnp.dot(win.reshape(th * wo, win.shape[-1]),
                           w_ref[ky * 3 + kx],
                           preferred_element_type=jnp.float32)
            acc = part if acc is None else acc + part
    b2 = jnp.maximum(acc * s_ref[...] + b_ref[...], 0.0).astype(jnp.bfloat16)

    # fused final 1x1 conv + residual add of branch1 (b2 never touches HBM)
    res = br1_ref[...][0, :, dil:dil + wo, :]
    res = res.reshape(th * wo, br1_ref.shape[-1]).astype(jnp.float32)
    y = jnp.dot(b2, wout_ref[...], preferred_element_type=jnp.float32) + res
    o_ref[...] = y.reshape(1, th, wo, y.shape[-1]).astype(o_ref.dtype)


def conv3x3_residual(apad, w_taps, scale, shift, w_out, br1, *, dil, ho, wo):
    n_im, hp, ws, c4p = apad.shape
    c8p = w_taps.shape[-1]
    coutp = w_out.shape[1]
    budget = _row_budget()
    weight_bytes = (9 * c4p * c8p + c8p * coutp) * 2
    if not _buffered_supported():
        weight_bytes *= 2                       # weights get double-buffered
    th = 1
    for cand in range(min(ho, 128), 0, -1):
        if ho % cand:
            continue
        step_bytes = (2 * (cand + 2 * dil) * ws * c4p * 2   # manual strip bufs
                      + 2 * cand * ws * coutp * 2           # branch1 blocks
                      + 2 * cand * wo * coutp * 4           # output blocks
                      + cand * wo * (c4p + c8p) * 4)        # in-kernel temps
        if weight_bytes + step_bytes <= budget:
            th = cand
            break
    kern = functools.partial(_conv3x3_residual_kernel, th=th, wo=wo, dil=dil)
    # TODO(synk): with the manual double-buffer the row axis must stay
    # "arbitrary"; a megacore-parallel variant would prime per core instead.
    return pl.pallas_call(
        kern,
        out_shape=jax.ShapeDtypeStruct((n_im, ho, wo, coutp), jnp.float32),
        grid=(n_im, ho // th),
        in_specs=[
            pl.BlockSpec(memory_space=pl.ANY),              # padded act. (HBM)
            _const_spec((9, c4p, c8p), lambda n, r: (0, 0, 0)),
            _const_spec((1, c8p), lambda n, r: (0, 0)),
            _const_spec((1, c8p), lambda n, r: (0, 0)),
            _const_spec((c8p, coutp), lambda n, r: (0, 0)),
            pl.BlockSpec((1, th, ws, coutp), lambda n, r: (n, r, 0, 0)),
        ],
        out_specs=pl.BlockSpec((1, th, wo, coutp), lambda n, r: (n, r, 0, 0)),
        scratch_shapes=[
            pltpu.VMEM((2, th + 2 * dil, ws, c4p), jnp.bfloat16),
            pltpu.SemaphoreType.DMA((2,)),
        ],
        compiler_params=pltpu.CompilerParams(
            dimension_semantics=("arbitrary", "arbitrary"),
            vmem_limit_bytes=_vmem_limit()),
    )(apad, w_taps, scale, shift, w_out, br1)


# ----------------------------------------------------------------------------
# Standalone folded-BN + ReLU (only for get_x_bn_relu=True with stride > 1,
# where x_bn_relu is full resolution and cannot be reused from Stage A).
# ----------------------------------------------------------------------------
def _bn_relu_kernel(x_ref, s_ref, b_ref, o_ref):
    o_ref[...] = jnp.maximum(x_ref[...] * s_ref[...] + b_ref[...], 0.0)


def bn_relu(x2d, scale, shift):
    M, C = x2d.shape
    tm, Mp = _row_tiling(M, C * 8)
    xp = x2d if Mp == M else jnp.pad(x2d, ((0, Mp - M), (0, 0)))
    out = pl.pallas_call(
        _bn_relu_kernel,
        out_shape=jax.ShapeDtypeStruct((Mp, C), jnp.float32),
        grid=(Mp // tm,),
        in_specs=[
            pl.BlockSpec((tm, C), lambda i: (i, 0)),
            _const_spec((1, C), lambda i: (0, 0)),
            _const_spec((1, C), lambda i: (0, 0)),
        ],
        out_specs=pl.BlockSpec((tm, C), lambda i: (i, 0)),
        compiler_params=pltpu.CompilerParams(
            dimension_semantics=("parallel",),
            vmem_limit_bytes=_vmem_limit()),
    )(xp, scale, shift)
    return out[:M] if Mp != M else out


# ----------------------------------------------------------------------------
# Parameter init (deterministic, synthetic) — PyTorch conventions:
# conv weights OIHW, BN has (gamma, beta, running_mean, running_var).
# ----------------------------------------------------------------------------
def init_params(key, in_ch, out_ch):
    c4, c8 = out_ch // 4, out_ch // 2
    ks = jax.random.split(key, 8)

    def bn_init(k, c):
        k1, k2, k3, k4 = jax.random.split(k, 4)
        gamma = 1.0 + 0.1 * jax.random.normal(k1, (c,), jnp.float32)
        beta = 0.1 * jax.random.normal(k2, (c,), jnp.float32)
        mean = 0.1 * jax.random.normal(k3, (c,), jnp.float32)
        var = jnp.abs(1.0 + 0.1 * jax.random.normal(k4, (c,), jnp.float32))
        return gamma, beta, mean, var

    return {
        "bn2a": bn_init(ks[0], in_ch),
        "w2a": 0.1 * jax.random.normal(ks[1], (c4, in_ch, 1, 1), jnp.float32),
        "bn2b1": bn_init(ks[2], c4),
        "w2b1": 0.1 * jax.random.normal(ks[3], (c8, c4, 3, 3), jnp.float32),
        "bn2b2": bn_init(ks[4], c8),
        "w2b2": 0.1 * jax.random.normal(ks[5], (out_ch, c8, 1, 1), jnp.float32),
        "w1": 0.1 * jax.random.normal(ks[6], (out_ch, in_ch, 1, 1), jnp.float32),
    }


def _fold_bn(gamma, beta, mean, var, cp):
    scale = gamma / jnp.sqrt(var + _EPS)
    shift = beta - mean * scale
    c = gamma.shape[0]
    scale = jnp.pad(scale, (0, cp - c)).reshape(1, cp).astype(jnp.float32)
    shift = jnp.pad(shift, (0, cp - c)).reshape(1, cp).astype(jnp.float32)
    return scale, shift


def _pad2(w, rp, cp):
    return jnp.pad(w, ((0, rp - w.shape[0]), (0, cp - w.shape[1])))


# ----------------------------------------------------------------------------
# Forward pass (Pallas path).  Input/output are NCHW like PyTorch.
# ----------------------------------------------------------------------------
def resblock_bot_forward(x_nchw, params, *, stride=1, dilation=1,
                         get_x_bn_relu=False):
    x = jnp.transpose(x_nchw, (0, 2, 3, 1)).astype(jnp.float32)   # NHWC
    N, H, W, Cin = x.shape
    Cout = params["w1"].shape[0]
    c4, c8 = Cout // 4, Cout // 2
    d = dilation
    Cinp, C4p, C8p, Coutp = _lanes(Cin), _lanes(c4), _lanes(c8), _lanes(Cout)

    # folded BN parameters (f32), zero-padded to lane-dense widths
    s2a, b2a = _fold_bn(*params["bn2a"], Cinp)
    s2b1, b2b1 = _fold_bn(*params["bn2b1"], C4p)
    s2b2, b2b2 = _fold_bn(*params["bn2b2"], C8p)

    # lane-dense bf16 weights
    w1 = _pad2(params["w1"][:, :, 0, 0].T, Cinp, Coutp).astype(jnp.bfloat16)
    w2a = _pad2(params["w2a"][:, :, 0, 0].T, Cinp, C4p).astype(jnp.bfloat16)
    w2b1 = jnp.transpose(params["w2b1"], (2, 3, 1, 0)).reshape(9, c4, c8)
    w2b1 = jnp.pad(w2b1, ((0, 0), (0, C4p - c4), (0, C8p - c8))).astype(jnp.bfloat16)
    w2b2 = _pad2(params["w2b2"][:, :, 0, 0].T, C8p, Coutp).astype(jnp.bfloat16)

    # stride + channel pad + conv-halo W pad folded into one XLA layout pass.
    # TODO(synk): fold the stride into the Stage-A index_map instead.
    xs = x[:, ::stride, ::stride, :]
    _, Ho, Wo, _ = xs.shape
    Wo_p = _round_up(Wo, 8)             # lane/sublane-friendly output width
    Ws = _round_up(Wo_p + 2 * d, 8)     # stored width (multiple of 8)
    xsp = jnp.pad(xs, ((0, 0), (0, 0), (d, Ws - Wo - d), (0, Cinp - Cin)))
    M = N * Ho * Ws
    x2d = xsp.reshape(M, Cinp)

    # Stage A: BN_2a+ReLU prologue -> shared-LHS dual 1x1 conv -> BN_2b1+ReLU.
    emit_t = bool(get_x_bn_relu) and stride == 1
    stage_a = dual_conv1x1(x2d, s2a, b2a, w1, w2a, s2b1, b2b1,
                           ws=Ws, col_lo=d, col_hi=d + Wo, emit_t=emit_t)
    branch1, a = stage_a[0], stage_a[1]

    # H-halo pad only (bf16, the W halo is already in the layout).
    # TODO(synk): have Stage A alias a pre-zeroed (N, Hp, Ws, C4p) buffer to
    # drop this last XLA pad pass as well.
    apad = jnp.pad(a.reshape(N, Ho, Ws, C4p), ((0, 0), (d, d), (0, 0), (0, 0)))
    br1_4d = branch1.reshape(N, Ho, Ws, Coutp)

    # Stage B: strip-pipelined 3x3 dilated conv + BN_2b2 + ReLU + final 1x1
    # conv + residual add, fused in one kernel.
    out4 = conv3x3_residual(apad, w2b1, s2b2, b2b2, w2b2, br1_4d,
                            dil=d, ho=Ho, wo=Wo_p)

    out = jnp.transpose(out4[:, :, :Wo, :Cout], (0, 3, 1, 2))
    # TODO(synk): keep NHWC output when the downstream block is channels-last.

    if get_x_bn_relu:
        if emit_t:
            t4 = stage_a[2].reshape(N, Ho, Ws, Cinp)
            x_bn_relu = jnp.transpose(t4[:, :, d:d + Wo, :Cin], (0, 3, 1, 2))
        else:
            # stride > 1: x_bn_relu is full resolution, recompute BN+ReLU on x
            x2d_full = jnp.pad(x.reshape(N * H * W, Cin),
                               ((0, 0), (0, Cinp - Cin)))
            t2d = bn_relu(x2d_full, s2a, b2a)
            x_bn_relu = jnp.transpose(
                t2d[:, :Cin].reshape(N, H, W, Cin), (0, 3, 1, 2))
        return out, x_bn_relu
    return out


# ----------------------------------------------------------------------------
# Pure-JAX (lax) reference mirroring the PyTorch forward, for validation.
# ----------------------------------------------------------------------------
def ref_forward(x, params, *, stride=1, dilation=1):
    def bn(y, g, b, m, v):
        return (g[None, :, None, None] * (y - m[None, :, None, None])
                / jnp.sqrt(v[None, :, None, None] + _EPS)
                + b[None, :, None, None])

    dn = ("NCHW", "OIHW", "NCHW")
    d = dilation
    t = jax.nn.relu(bn(x, *params["bn2a"]))
    b1 = lax.conv_general_dilated(t, params["w1"], (stride, stride), "VALID",
                                  dimension_numbers=dn)
    a = lax.conv_general_dilated(t, params["w2a"], (stride, stride), "VALID",
                                 dimension_numbers=dn)
    a = jax.nn.relu(bn(a, *params["bn2b1"]))
    b2 = lax.conv_general_dilated(a, params["w2b1"], (1, 1),
                                  [(d, d), (d, d)], rhs_dilation=(d, d),
                                  dimension_numbers=dn)
    b2 = jax.nn.relu(bn(b2, *params["bn2b2"]))
    b2 = lax.conv_general_dilated(b2, params["w2b2"], (1, 1), "VALID",
                                  dimension_numbers=dn)
    return b1 + b2, t


if __name__ == "__main__":
    key = jax.random.PRNGKey(0)

    configs = [
        # (N, Cin, H, W, Cout, stride, dilation)
        (2, 8, 16, 16, 16, 1, 1),
        (2, 12, 12, 12, 32, 1, 2),
        (2, 8, 16, 16, 16, 2, 1),
    ]
    for (N, Cin, H, W, Cout, stride, dilation) in configs:
        key, k_x, k_p = jax.random.split(key, 3)
        x = jax.random.normal(k_x, (N, Cin, H, W), jnp.float32)
        params = init_params(k_p, Cin, Cout)

        out, x_bn_relu = resblock_bot_forward(
            x, params, stride=stride, dilation=dilation, get_x_bn_relu=True)
        out = jax.block_until_ready(out)
        x_bn_relu = jax.block_until_ready(x_bn_relu)

        ref_out, ref_t = ref_forward(x, params, stride=stride, dilation=dilation)
        assert out.shape == ref_out.shape, (out.shape, ref_out.shape)
        assert x_bn_relu.shape == ref_t.shape == (N, Cin, H, W)

        # bf16 MXU path (and bf16 residual) -> looser tolerance than pure f32.
        err = float(jnp.max(jnp.abs(out - ref_out)))
        terr = float(jnp.max(jnp.abs(x_bn_relu - ref_t)))
        assert err < 5e-2, (
            f"output mismatch (stride={stride}, dil={dilation}): {err}")
        assert terr < 1e-4, (
            f"x_bn_relu mismatch (stride={stride}, dil={dilation}): {terr}")

    print("KERNEL_OK")
</pallas_src>

<mosaic_0001>
module attributes {stable_mosaic.version = 11 : i64} {
  func.func @k(%arg0: i32, %arg1: memref<8x128xf32, #tpu.memory_space<vmem>>, %arg2: memref<8x128xf32, #tpu.memory_space<vmem>>) attributes {dimension_semantics = [#tpu.dimension_semantics<arbitrary>], iteration_bounds = array<i64: 1>, scalar_prefetch = 0 : i64, scratch_operands = 0 : i64, tpu.core_type = #tpu.core_type<tc>, window_params = [{pipeline_mode = #tpu.pipeline_mode<synchronous>, transform_indices = @transform_0, window_bounds = array<i64: 8, 128>}, {pipeline_mode = #tpu.pipeline_mode<synchronous>, transform_indices = @transform_1, window_bounds = array<i64: 8, 128>}]} {
    %c0 = arith.constant 0 : index
    %c0_0 = arith.constant 0 : index
    %0 = vector.load %arg1[%c0, %c0_0] : memref<8x128xf32, #tpu.memory_space<vmem>>, vector<8x128xf32>
    %cst = arith.constant 1.000000e+00 : f32
    %1 = vector.broadcast %cst : f32 to vector<8x128xf32>
    %2 = arith.addf %0, %1 : vector<8x128xf32>
    %c0_1 = arith.constant 0 : index
    %c0_2 = arith.constant 0 : index
    %3 = vector.load %arg2[%c0_1, %c0_2] : memref<8x128xf32, #tpu.memory_space<vmem>>, vector<8x128xf32>
    tpu.vector_store %arg2[%c0_1, %c0_2], %2 {strides = array<i32>} : memref<8x128xf32, #tpu.memory_space<vmem>>, vector<8x128xf32>,
    return
  }
  func.func @transform_0(%arg0: i32) -> (i32, i32) {
    %c0_i32 = arith.constant 0 : i32
    %c0_i32_0 = arith.constant 0 : i32
    %c0_i32_1 = arith.constant 0 : i32
    return %c0_i32, %c0_i32_0 : i32, i32
  }
  func.func @transform_1(%arg0: i32) -> (i32, i32) {
    %c0_i32 = arith.constant 0 : i32
    %c0_i32_0 = arith.constant 0 : i32
    %c0_i32_1 = arith.constant 0 : i32
    return %c0_i32, %c0_i32_0 : i32, i32
  }
}

module attributes {stable_mosaic.version = 11 : i64} {
  func.func @_stage_a_kernel(%arg0: i32, %arg1: memref<768x128xf32, #tpu.memory_space<vmem>>, %arg2: memref<1x128xf32, #tpu.memory_space<vmem>>, %arg3: memref<1x128xf32, #tpu.memory_space<vmem>>, %arg4: memref<128x128xbf16, #tpu.memory_space<vmem>>, %arg5: memref<128x128xbf16, #tpu.memory_space<vmem>>, %arg6: memref<1x128xf32, #tpu.memory_space<vmem>>, %arg7: memref<1x128xf32, #tpu.memory_space<vmem>>, %arg8: memref<768x128xbf16, #tpu.memory_space<vmem>>, %arg9: memref<768x128xbf16, #tpu.memory_space<vmem>>, %arg10: memref<768x128xf32, #tpu.memory_space<vmem>>) attributes {dimension_semantics = [#tpu.dimension_semantics<parallel>], iteration_bounds = array<i64: 1>, scalar_prefetch = 0 : i64, scratch_operands = 0 : i64, tpu.core_type = #tpu.core_type<tc>, window_params = [{transform_indices = @transform_0, window_bounds = array<i64: 768, 128>}, {pipeline_mode = #tpu.pipeline_mode<synchronous>, transform_indices = @transform_1, window_bounds = array<i64: 1, 128>}, {pipeline_mode = #tpu.pipeline_mode<synchronous>, transform_indices = @transform_2, window_bounds = array<i64: 1, 128>}, {pipeline_mode = #tpu.pipeline_mode<synchronous>, transform_indices = @transform_3, window_bounds = array<i64: 128, 128>}, {pipeline_mode = #tpu.pipeline_mode<synchronous>, transform_indices = @transform_4, window_bounds = array<i64: 128, 128>}, {pipeline_mode = #tpu.pipeline_mode<synchronous>, transform_indices = @transform_5, window_bounds = array<i64: 1, 128>}, {pipeline_mode = #tpu.pipeline_mode<synchronous>, transform_indices = @transform_6, window_bounds = array<i64: 1, 128>}, {transform_indices = @transform_7, window_bounds = array<i64: 768, 128>}, {transform_indices = @transform_8, window_bounds = array<i64: 768, 128>}, {transform_indices = @transform_9, window_bounds = array<i64: 768, 128>}]} {
    %c0 = arith.constant 0 : index
    %c0_0 = arith.constant 0 : index
    %0 = vector.load %arg1[%c0, %c0_0] : memref<768x128xf32, #tpu.memory_space<vmem>>, vector<768x128xf32>
    %c0_1 = arith.constant 0 : index
    %c0_2 = arith.constant 0 : index
    %1 = vector.load %arg2[%c0_1, %c0_2] : memref<1x128xf32, #tpu.memory_space<vmem>>, vector<1x128xf32>
    %2 = vector.broadcast %1 : vector<1x128xf32> to vector<768x128xf32>
    %3 = arith.mulf %0, %2 : vector<768x128xf32>
    %c0_3 = arith.constant 0 : index
    %c0_4 = arith.constant 0 : index
    %4 = vector.load %arg3[%c0_3, %c0_4] : memref<1x128xf32, #tpu.memory_space<vmem>>, vector<1x128xf32>
    %5 = vector.broadcast %4 : vector<1x128xf32> to vector<768x128xf32>
    %6 = arith.addf %3, %5 : vector<768x128xf32>
    %cst = arith.constant 0.000000e+00 : f32
    %7 = vector.broadcast %cst : f32 to vector<768x128xf32>
    %8 = arith.maximumf %6, %7 : vector<768x128xf32>
    %9 = arith.truncf %8 : vector<768x128xf32> to vector<768x128xbf16>
    %c0_5 = arith.constant 0 : index
    %c0_6 = arith.constant 0 : index
    %10 = vector.load %arg4[%c0_5, %c0_6] : memref<128x128xbf16, #tpu.memory_space<vmem>>, vector<128x128xbf16>
    %cst_7 = arith.constant dense<0.000000e+00> : vector<768x128xf32>
    %11 = tpu.matmul %9, %10, %cst_7 {dimension_numbers = #tpu.dot_dimension_numbers<[1], [0], [0], [1], [0, 0, 1, 1], [], []>} : vector<768x128xbf16>, vector<128x128xbf16>, vector<768x128xf32> -> vector<768x128xf32>
    %12 = arith.truncf %11 : vector<768x128xf32> to vector<768x128xbf16>
    %c0_8 = arith.constant 0 : index
    %c0_9 = arith.constant 0 : index
    %13 = vector.load %arg8[%c0_8, %c0_9] : memref<768x128xbf16, #tpu.memory_space<vmem>>, vector<768x128xbf16>
    tpu.vector_store %arg8[%c0_8, %c0_9], %12 {strides = array<i32>} : memref<768x128xbf16, #tpu.memory_space<vmem>>, vector<768x128xbf16>,
    %c0_10 = arith.constant 0 : index
    %c0_11 = arith.constant 0 : index
    %14 = vector.load %arg5[%c0_10, %c0_11] : memref<128x128xbf16, #tpu.memory_space<vmem>>, vector<128x128xbf16>
    %cst_12 = arith.constant dense<0.000000e+00> : vector<768x128xf32>
    %15 = tpu.matmul %9, %14, %cst_12 {dimension_numbers = #tpu.dot_dimension_numbers<[1], [0], [0], [1], [0, 0, 1, 1], [], []>} : vector<768x128xbf16>, vector<128x128xbf16>, vector<768x128xf32> -> vector<768x128xf32>
    %c0_13 = arith.constant 0 : index
    %c0_14 = arith.constant 0 : index
    %16 = vector.load %arg6[%c0_13, %c0_14] : memref<1x128xf32, #tpu.memory_space<vmem>>, vector<1x128xf32>
    %17 = vector.broadcast %16 : vector<1x128xf32> to vector<768x128xf32>
    %18 = arith.mulf %15, %17 : vector<768x128xf32>
    %c0_15 = arith.constant 0 : index
    %c0_16 = arith.constant 0 : index
    %19 = vector.load %arg7[%c0_15, %c0_16] : memref<1x128xf32, #tpu.memory_space<vmem>>, vector<1x128xf32>
    %20 = vector.broadcast %19 : vector<1x128xf32> to vector<768x128xf32>
    %21 = arith.addf %18, %20 : vector<768x128xf32>
    %cst_17 = arith.constant 0.000000e+00 : f32
    %22 = vector.broadcast %cst_17 : f32 to vector<768x128xf32>
    %23 = arith.maximumf %21, %22 : vector<768x128xf32>
    %24 = tpu.iota {dimensions = array<i32: 0>} : vector<768x1xi32>
    %c768_i32 = arith.constant 768 : i32
    %25 = arith.muli %arg0, %c768_i32 : i32
    %26 = vector.broadcast %25 : i32 to vector<768x1xi32>
    %27 = arith.addi %24, %26 : vector<768x1xi32>
    %c24_i32 = arith.constant 24 : i32
    %c0_i32 = arith.constant 0 : i32
    %28 = arith.cmpi eq, %c24_i32, %c0_i32 : i32
    %c1_i32 = arith.constant 1 : i32
    %29 = arith.select %28, %c1_i32, %c24_i32 : i32
    %30 = vector.broadcast %29 : i32 to vector<768x1xi32>
    %31 = arith.remsi %27, %30 : vector<768x1xi32>
    %c0_i32_18 = arith.constant 0 : i32
    %32 = vector.broadcast %c0_i32_18 : i32 to vector<768x1xi32>
    %33 = arith.cmpi ne, %31, %32 : vector<768x1xi32>
    %c0_i32_19 = arith.constant 0 : i32
    %34 = vector.broadcast %c0_i32_19 : i32 to vector<768x1xi32>
    %35 = arith.cmpi slt, %31, %34 : vector<768x1xi32>
    %c0_i32_20 = arith.constant 0 : i32
    %36 = arith.cmpi slt, %29, %c0_i32_20 : i32
    %37 = vector.broadcast %36 : i1 to vector<768x1xi1>
    %38 = vector.broadcast %37 : vector<768x1xi1> to vector<768x1xi1>
    %39 = arith.xori %35, %38 : vector<768x1xi1>
    %40 = arith.andi %39, %33 : vector<768x1xi1>
    %41 = vector.broadcast %29 : i32 to vector<768x1xi32>
    %42 = arith.addi %31, %41 : vector<768x1xi32>
    %43 = arith.select %40, %42, %31 : vector<768x1xi1>, vector<768x1xi32>
    %c1_i32_21 = arith.constant 1 : i32
    %44 = vector.broadcast %c1_i32_21 : i32 to vector<768x1xi32>
    %45 = arith.cmpi sge, %43, %44 : vector<768x1xi32>
    %c17_i32 = arith.constant 17 : i32
    %46 = vector.broadcast %c17_i32 : i32 to vector<768x1xi32>
    %47 = arith.cmpi slt, %43, %46 : vector<768x1xi32>
    %48 = arith.andi %45, %47 : vector<768x1xi1>
    %cst_22 = arith.constant 0.000000e+00 : f32
    %49 = vector.shape_cast %48 : vector<768x1xi1> to vector<768x1xi1>
    %50 = vector.broadcast %49 : vector<768x1xi1> to vector<768x128xi1>
    %51 = vector.broadcast %cst_22 : f32 to vector<768x128xf32>
    %52 = arith.select %50, %23, %51 : vector<768x128xi1>, vector<768x128xf32>
    %53 = arith.truncf %52 : vector<768x128xf32> to vector<768x128xbf16>
    %c0_23 = arith.constant 0 : index
    %c0_24 = arith.constant 0 : index
    %54 = vector.load %arg9[%c0_23, %c0_24] : memref<768x128xbf16, #tpu.memory_space<vmem>>, vector<768x128xbf16>
    tpu.vector_store %arg9[%c0_23, %c0_24], %53 {strides = array<i32>} : memref<768x128xbf16, #tpu.memory_space<vmem>>, vector<768x128xbf16>,
    %c0_25 = arith.constant 0 : index
    %c0_26 = arith.constant 0 : index
    %55 = vector.load %arg10[%c0_25, %c0_26] : memref<768x128xf32, #tpu.memory_space<vmem>>, vector<768x128xf32>
    tpu.vector_store %arg10[%c0_25, %c0_26], %8 {strides = array<i32>} : memref<768x128xf32, #tpu.memory_space<vmem>>, vector<768x128xf32>,
    return
  }
  func.func @transform_0(%arg0: i32) -> (i32, i32) {
    %c0_i32 = arith.constant 0 : i32
    %c0_i32_0 = arith.constant 0 : i32
    return %arg0, %c0_i32 : i32, i32
  }
  func.func @transform_1(%arg0: i32) -> (i32, i32) {
    %c0_i32 = arith.constant 0 : i32
    %c0_i32_0 = arith.constant 0 : i32
    %c0_i32_1 = arith.constant 0 : i32
    return %c0_i32, %c0_i32_0 : i32, i32
  }
  func.func @transform_2(%arg0: i32) -> (i32, i32) {
    %c0_i32 = arith.constant 0 : i32
    %c0_i32_0 = arith.constant 0 : i32
    %c0_i32_1 = arith.constant 0 : i32
    return %c0_i32, %c0_i32_0 : i32, i32
  }
  func.func @transform_3(%arg0: i32) -> (i32, i32) {
    %c0_i32 = arith.constant 0 : i32
    %c0_i32_0 = arith.constant 0 : i32
    %c0_i32_1 = arith.constant 0 : i32
    return %c0_i32, %c0_i32_0 : i32, i32
  }
  func.func @transform_4(%arg0: i32) -> (i32, i32) {
    %c0_i32 = arith.constant 0 : i32
    %c0_i32_0 = arith.constant 0 : i32
    %c0_i32_1 = arith.constant 0 : i32
    return %c0_i32, %c0_i32_0 : i32, i32
  }
  func.func @transform_5(%arg0: i32) -> (i32, i32) {
    %c0_i32 = arith.constant 0 : i32
    %c0_i32_0 = arith.constant 0 : i32
    %c0_i32_1 = arith.constant 0 : i32
    return %c0_i32, %c0_i32_0 : i32, i32
  }
  func.func @transform_6(%arg0: i32) -> (i32, i32) {
    %c0_i32 = arith.constant 0 : i32
    %c0_i32_0 = arith.constant 0 : i32
    %c0_i32_1 = arith.constant 0 : i32
    return %c0_i32, %c0_i32_0 : i32, i32
  }
  func.func @transform_7(%arg0: i32) -> (i32, i32) {
    %c0_i32 = arith.constant 0 : i32
    %c0_i32_0 = arith.constant 0 : i32
    return %arg0, %c0_i32 : i32, i32
  }
  func.func @transform_8(%arg0: i32) -> (i32, i32) {
    %c0_i32 = arith.constant 0 : i32
    %c0_i32_0 = arith.constant 0 : i32
    return %arg0, %c0_i32 : i32, i32
  }
  func.func @transform_9(%arg0: i32) -> (i32, i32) {
    %c0_i32 = arith.constant 0 : i32
    %c0_i32_0 = arith.constant 0 : i32
    return %arg0, %c0_i32 : i32, i32
  }
}

</mosaic_0001>

<bundles_post_ra>
// kernel: tpu_custom_call.1
= control target key start
LH: loop header
LB: loop body
LE: loop exit
PB: predicated region body
PF: predicated region fallthrough
CT: control target
= control target key end

     0   :  { %6 = vsyncpa [#allocation3], 0  ;;  %s125_s0 = inlined_call_operand.hbm [shape: f32[8,128], index: 0, kind: input, shape index: {}]   ;;  %s126_s1 = inlined_call_operand.hbm [shape: f32[8,128], index: 1, kind: output, shape index: {}]  }
   0x1   :  { %7 = vsyncpa [#allocation4], 0  ;;  %s89_s6 = smov [#allocation2]   ;;  %s41_s10 = scalar_lea.hbm %s125_s0, 128 }
   0x2   :  { %s14_s7 = sshll.u32 %s89_s6, 4  ;;  %p42_p0 = scmp.ne.s32.totalorder %s125_s0, %s41_s10  ;;  %s15_s7 = int_to_ptr.vmem [resolvable:$true] %s14_s7 }
   0x3   :  { %p45_p1 = scmp.lt.u32.totalorder %s41_s10, %s125_s0 }
   0x5   :  { %p47_p2 = pnand %p45_p1, %p42_p0 }
   0x7   :  { %50 = shalt.err (!%p47_p2)
}
   0x8   :  { %s51_s15 = scalar_lea.vmem %s15_s7, 128  ;;  %p56_p4 = scmp.lt.s32.totalorder %s15_s7, %s15_s7 }
   0x9   :  { %p52_p3 = scmp.ne.s32.totalorder %s15_s7, %s51_s15  ;;  %p57_p5 = scmp.lt.s32.totalorder %s51_s15, %s51_s15 }
   0xb   :  { %p58_p6 = por %p57_p5, %p56_p4 }
   0xd   :  { %p59_p7 = pnand %p58_p6, %p52_p3 }
   0xf   :  { %62 = shalt.err (!%p59_p7)
}
  0x10   :  { %17 = dma.hbm_to_vmem [thread:$0]  %s125_s0, 128, %s15_s7, [#allocation3]  }
  0x11   :  { %85 = dma.done.wait [#allocation3], 128  }
  0x12   :  { %86 = vsyncadd [#allocation3], 4294967168  ;;  %s90_s18 = smov [#allocation5]   ;;  %v21_v0 = vld [vmem:[#allocation2] sm:$0xff] }
  0x13   :  { %s30_s19 = sshll.u32 %s90_s18, 4  ;;  %v22_v1 = vadd.f32 1.0, %v21_v0  ;;  %s31_s19 = int_to_ptr.vmem [resolvable:$true] %s30_s19 }
  0x14   :  { %s63_s20 = scalar_lea.vmem %s31_s19, 128  ;;  %p68_p9 = scmp.lt.s32.totalorder %s31_s19, %s31_s19 }
  0x15   :  { %23 = vst [vmem:[#allocation5] sm:$0xff] %v22_v1  ;;  %p64_p8 = scmp.ne.s32.totalorder %s31_s19, %s63_s20  ;;  %p69_p10 = scmp.lt.s32.totalorder %s63_s20, %s63_s20 }
  0x17   :  { %p70_p11 = por %p69_p10, %p68_p9 }
  0x19   :  { %p71_p12 = pnand %p70_p11, %p64_p8 }
  0x1b   :  { %74 = shalt.err (!%p71_p12)
}
  0x1c   :  { %s75_s23 = scalar_lea.hbm %s126_s1, 128 }
  0x1d   :  { %p76_p13 = scmp.ne.s32.totalorder %s126_s1, %s75_s23  ;;  %p79_p0 = scmp.lt.u32.totalorder %s75_s23, %s126_s1 }
  0x1f   :  { %p81_p1 = pnand %p79_p0, %p76_p13 }
  0x21   :  { %84 = shalt.err (!%p81_p1)
}
  0x22   :  { %33 = dma.vmem_to_hbm [thread:$0]  %s31_s19, 128, %s126_s1, [#allocation4]  }
  0x23   :  { %87 = dma.done.wait [#allocation4], 128  }
  0x24   :  { %88 = vsyncadd [#allocation4], 4294967168 }
  0x25   :  { %37 = vsyncpa [#allocation3], 1 }
  0x26   :  { %38 = vsyncpa [#allocation4], 1 }

// kernel: tpu_custom_call.1
= control target key start
LH: loop header
LB: loop body
LE: loop exit
PB: predicated region body
PF: predicated region fallthrough
CT: control target
= control target key end

     0   :  { %15 = vsyncpa [#allocation3], 0  ;;  %s10687_s0 = inlined_call_operand.hbm [shape: f32[768,128], index: 0, kind: input, shape index: {}]   ;;  %s10688_s1 = inlined_call_operand.hbm [shape: f32[1,128], index: 1, kind: input, shape index: {}]   ;;  %s10689_s2 = inlined_call_operand.hbm [shape: f32[1,128], index: 2, kind: input, shape index: {}]   ;;  %s10690_s3 = inlined_call_operand.hbm [shape: bf16[128,128], index: 3, kind: input, shape index: {}]   ;;  %s10691_s4 = inlined_call_operand.hbm [shape: bf16[128,128], index: 4, kind: input, shape index: {}]   ;;  %s10692_s5 = inlined_call_operand.hbm [shape: f32[1,128], index: 5, kind: input, shape index: {}]   ;;  %s10693_s6 = inlined_call_operand.hbm [shape: f32[1,128], index: 6, kind: input, shape index: {}]   ;;  %s10694_s7 = inlined_call_operand.hbm [shape: bf16[768,128], index: 7, kind: output, shape index: {0}]   ;;  %s10695_s8 = inlined_call_operand.hbm [shape: bf16[768,128], index: 8, kind: output, shape index: {1}]   ;;  %s10696_s9 = inlined_call_operand.hbm [shape: f32[768,128], index: 9, kind: output, shape index: {2}]  }
   0x1   :  { %16 = vsyncpa [#allocation6], 0 }
   0x2   :  { %17 = vsyncpa [#allocation9], 0 }
   0x3   :  { %18 = vsyncpa [#allocation12], 0 }
   0x4   :  { %19 = vsyncpa [#allocation4], 0 }
   0x5   :  { %20 = vsyncpa [#allocation16], 0  ;;  %s7019_s30 = smov [#allocation5]   ;;  %s7020_s11 = smov [#allocation8]  }
   0x6   :  { %s39_s10 = sshll.u32 %s7019_s30, 4  ;;  %s58_s12 = sshll.u32 %s7020_s11, 4  ;;  %s40_s10 = int_to_ptr.vmem [resolvable:$true] %s39_s10  ;;  %s7083_s12 = int_to_ptr.vmem [resolvable:$true] %s58_s12 }
   0x7   :  { %s6787_s15 = scalar_lea.hbm %s10688_s1, 16 }
   0x8   :  { %p6788_p0 = scmp.ne.s32.totalorder %s10688_s1, %s6787_s15  ;;  %p6791_p1 = scmp.lt.u32.totalorder %s6787_s15, %s10688_s1 }
   0xa   :  { %p6793_p2 = pnand %p6791_p1, %p6788_p0 }
   0xc   :  { %6796 = shalt.err (!%p6793_p2)
}
   0xd   :  { %s6797_s20 = scalar_lea.vmem %s40_s10, 16  ;;  %s6801_s21 = scalar_lea.vmem %s40_s10, 32 }
   0xe   :  { %p6798_p3 = scmp.ne.s32.totalorder %s40_s10, %s6797_s20  ;;  %p6802_p4 = scmp.lt.s32.totalorder %s40_s10, %s40_s10 }
   0xf   :  { %p6803_p5 = scmp.lt.s32.totalorder %s6801_s21, %s6797_s20 }
  0x11   :  { %p6804_p6 = por %p6803_p5, %p6802_p4 }
  0x13   :  { %p6805_p7 = pnand %p6804_p6, %p6798_p3 }
  0x15   :  { %6808 = shalt.err (!%p6805_p7)
}
  0x16   :  { %42 = dma.hbm_to_vmem [thread:$0]  %s10688_s1, 16, %s40_s10, [#allocation6]  }
  0x17   :  { %s6809_s26 = scalar_lea.hbm %s10690_s3, 1024 }
  0x18   :  { %p6810_p8 = scmp.ne.s32.totalorder %s10690_s3, %s6809_s26  ;;  %p6813_p9 = scmp.lt.u32.totalorder %s6809_s26, %s10690_s3 }
  0x1a   :  { %p6815_p10 = pnand %p6813_p9, %p6810_p8 }
  0x1c   :  { %6818 = shalt.err (!%p6815_p10)
}
  0x1d   :  { %s6819_s11 = scalar_lea.vmem %s7083_s12, 1024  ;;  %p6824_p12 = scmp.lt.s32.totalorder %s7083_s12, %s7083_s12 }
  0x1e   :  { %p6820_p11 = scmp.ne.s32.totalorder %s7083_s12, %s6819_s11  ;;  %p6825_p13 = scmp.lt.s32.totalorder %s6819_s11, %s6819_s11 }
  0x20   :  { %p6826_p0 = por %p6825_p13, %p6824_p12 }
  0x22   :  { %p6827_p1 = pnand %p6826_p0, %p6820_p11 }
  0x24   :  { %6830 = shalt.err (!%p6827_p1)
}
  0x25   :  { %s7021_s1 = smov 64   ;;  %s7022_s10 = smov 4  }
  0x26   :  { %64 = dma.hbm_to_vmem [thread:$0]  %s10690_s3, 1024, %s7083_s12, [#allocation9], %s7021_s1, %s7021_s1, %s7022_s10  }
  0x27   :  { %s7023_s15 = smov [#allocation11]   ;;  %s7024_s17 = smov [#allocation2]  }
  0x28   :  { %s83_s16 = sshll.u32 %s7023_s15, 4  ;;  %s26_s18 = sshll.u32 %s7024_s17, 4  ;;  %s84_s16 = int_to_ptr.vmem [resolvable:$true] %s83_s16  ;;  %s7117_s18 = int_to_ptr.vmem [resolvable:$true] %s26_s18 }
  0x29   :  { %s6831_s21 = scalar_lea.hbm %s10692_s5, 16 }
  0x2a   :  { %p6832_p2 = scmp.ne.s32.totalorder %s10692_s5, %s6831_s21  ;;  %p6835_p3 = scmp.lt.u32.totalorder %s6831_s21, %s10692_s5 }
  0x2c   :  { %p6837_p4 = pnand %p6835_p3, %p6832_p2 }
  0x2e   :  { %6840 = shalt.err (!%p6837_p4)
}
  0x2f   :  { %s6841_s3 = scalar_lea.vmem %s84_s16, 16  ;;  %s6845_s12 = scalar_lea.vmem %s84_s16, 32 }
  0x30   :  { %p6842_p5 = scmp.ne.s32.totalorder %s84_s16, %s6841_s3  ;;  %p6846_p6 = scmp.lt.s32.totalorder %s84_s16, %s84_s16 }
  0x31   :  { %p6847_p7 = scmp.lt.s32.totalorder %s6845_s12, %s6841_s3 }
  0x33   :  { %p6848_p8 = por %p6847_p7, %p6846_p6 }
  0x35   :  { %p6849_p9 = pnand %p6848_p8, %p6842_p5 }
  0x37   :  { %6852 = shalt.err (!%p6849_p9)
}
  0x38   :  { %86 = dma.hbm_to_vmem [thread:$0]  %s10692_s5, 16, %s84_s16, [#allocation12]  }
  0x39   :  { %s6853_s30 = scalar_lea.hbm %s10687_s0, 12288 }
  0x3a   :  { %p6854_p10 = scmp.ne.s32.totalorder %s10687_s0, %s6853_s30  ;;  %p6857_p11 = scmp.lt.u32.totalorder %s6853_s30, %s10687_s0 }
  0x3c   :  { %p6859_p12 = pnand %p6857_p11, %p6854_p10 }
  0x3e   :  { %6862 = shalt.err (!%p6859_p12)
}
  0x3f   :  { %s6863_s17 = scalar_lea.vmem %s7117_s18, 12288  ;;  %p6868_p0 = scmp.lt.s32.totalorder %s7117_s18, %s7117_s18 }
  0x40   :  { %p6864_p13 = scmp.ne.s32.totalorder %s7117_s18, %s6863_s17  ;;  %p6869_p1 = scmp.lt.s32.totalorder %s6863_s17, %s6863_s17 }
  0x42   :  { %p6870_p2 = por %p6869_p1, %p6868_p0 }
  0x44   :  { %p6871_p3 = pnand %p6870_p2, %p6864_p13 }
  0x46   :  { %6874 = shalt.err (!%p6871_p3)
}
  0x47   :  { %s7025_s5 = smov 128   ;;  %s7026_s16 = smov 8  }
  0x48   :  { %32 = dma.hbm_to_vmem [thread:$0]  %s10687_s0, 12288, %s7117_s18, [#allocation3], %s7025_s5, %s7025_s5, %s7026_s16  }
  0x49   :  { %s7027_s21 = smov [#allocation7]   ;;  %s7028_s23 = smov [#allocation10]  }
  0x4a   :  { %s49_s22 = sshll.u32 %s7027_s21, 4  ;;  %s70_s24 = sshll.u32 %s7028_s23, 4  ;;  %s50_s22 = int_to_ptr.vmem [resolvable:$true] %s49_s22  ;;  %s7151_s24 = int_to_ptr.vmem [resolvable:$true] %s70_s24 }
  0x4b   :  { %s6875_s12 = scalar_lea.hbm %s10689_s2, 16 }
  0x4c   :  { %p6876_p4 = scmp.ne.s32.totalorder %s10689_s2, %s6875_s12  ;;  %p6879_p5 = scmp.lt.u32.totalorder %s6875_s12, %s10689_s2 }
  0x4e   :  { %p6881_p6 = pnand %p6879_p5, %p6876_p4 }
  0x50   :  { %6884 = shalt.err (!%p6881_p6)
}
  0x51   :  { %s6885_s0 = scalar_lea.vmem %s50_s22, 16  ;;  %s6889_s18 = scalar_lea.vmem %s50_s22, 32 }
  0x52   :  { %p6886_p7 = scmp.ne.s32.totalorder %s50_s22, %s6885_s0  ;;  %p6890_p8 = scmp.lt.s32.totalorder %s50_s22, %s50_s22 }
  0x53   :  { %p6891_p9 = scmp.lt.s32.totalorder %s6889_s18, %s6885_s0 }
  0x55   :  { %p6892_p10 = por %p6891_p9, %p6890_p8 }
  0x57   :  { %p6893_p11 = pnand %p6892_p10, %p6886_p7 }
  0x59   :  { %6896 = shalt.err (!%p6893_p11)
}
  0x5a   :  { %52 = dma.hbm_to_vmem [thread:$0]  %s10689_s2, 16, %s50_s22, [#allocation6]  }
  0x5b   :  { %s6897_s15 = scalar_lea.hbm %s10691_s4, 1024 }
  0x5c   :  { %p6898_p12 = scmp.ne.s32.totalorder %s10691_s4, %s6897_s15  ;;  %p6901_p13 = scmp.lt.u32.totalorder %s6897_s15, %s10691_s4 }
  0x5e   :  { %p6903_p0 = pnand %p6901_p13, %p6898_p12 }
  0x60   :  { %6906 = shalt.err (!%p6903_p0)
}
  0x61   :  { %s6907_s23 = scalar_lea.vmem %s7151_s24, 1024  ;;  %p6912_p2 = scmp.lt.s32.totalorder %s7151_s24, %s7151_s24 }
  0x62   :  { %p6908_p1 = scmp.ne.s32.totalorder %s7151_s24, %s6907_s23  ;;  %p6913_p3 = scmp.lt.s32.totalorder %s6907_s23, %s6907_s23 }
  0x64   :  { %p6914_p4 = por %p6913_p3, %p6912_p2 }
  0x66   :  { %p6915_p5 = pnand %p6914_p4, %p6908_p1 }
  0x68   :  { %6918 = shalt.err (!%p6915_p5)
}
  0x69   :  { %76 = dma.hbm_to_vmem [thread:$0]  %s10691_s4, 1024, %s7151_s24, [#allocation9], %s7021_s1, %s7021_s1, %s7022_s10  }
  0x6a   :  { %s7029_s25 = smov [#allocation13]   ;;  %s6919_s27 = scalar_lea.hbm %s10693_s6, 16 }
  0x6b   :  { %s93_s3 = sshll.u32 %s7029_s25, 4  ;;  %p6920_p6 = scmp.ne.s32.totalorder %s10693_s6, %s6919_s27  ;;  %s94_s3 = int_to_ptr.vmem [resolvable:$true] %s93_s3 }
  0x6c   :  { %p6923_p7 = scmp.lt.u32.totalorder %s6919_s27, %s10693_s6 }
  0x6e   :  { %p6925_p8 = pnand %p6923_p7, %p6920_p6 }
  0x70   :  { %6928 = shalt.err (!%p6925_p8)
}
  0x71   :  { %s6929_s30 = scalar_lea.vmem %s94_s3, 16  ;;  %s6933_s4 = scalar_lea.vmem %s94_s3, 32 }
  0x72   :  { %p6930_p9 = scmp.ne.s32.totalorder %s94_s3, %s6929_s30  ;;  %p6934_p10 = scmp.lt.s32.totalorder %s94_s3, %s94_s3 }
  0x73   :  { %p6935_p11 = scmp.lt.s32.totalorder %s6933_s4, %s6929_s30 }
  0x75   :  { %p6936_p12 = por %p6935_p11, %p6934_p10 }
  0x77   :  { %p6937_p13 = pnand %p6936_p12, %p6930_p9 }
  0x79   :  { %6940 = shalt.err (!%p6937_p13)
}
  0x7a   :  { %96 = dma.hbm_to_vmem [thread:$0]  %s10693_s6, 16, %s94_s3, [#allocation12]  }
  0x7b   :  { %7007 = dma.done.wait [#allocation3], 12288  }
  0x7c   :  { %7008 = vsyncadd [#allocation3], 4294955008 }
  0x7d   :  { %7009 = dma.done.wait [#allocation6], 32  }
  0x7e   :  { %7010 = vsyncadd [#allocation6], 4294967264 }
  0x7f   :  { %7011 = dma.done.wait [#allocation9], 2048  }
  0x80   :  { %7012 = vsyncadd [#allocation9], 4294965248 }
  0x81   :  { %7013 = dma.done.wait [#allocation12], 32  }
  0x82   :  { %7014 = vsyncadd [#allocation12], 4294967264  ;;  %v6763_v0 = vld [vmem:[#allocation10] sm:$0xff]   ;;  %v6764_v1 = vld [vmem:[#allocation10 + $0x8] sm:$0xff]   ;;  %s7030_s6 = smov [#allocation14]  }
  0x83   :  { %6445 = vmatprep.subr.bf16.mxu1 %v6763_v0  ;;  %v6765_v2 = vld [vmem:[#allocation8] sm:$0xff]   ;;  %v6766_v3 = vld [vmem:[#allocation10 + $0x10] sm:$0xff]   ;;  %v6767_v4 = vld [vmem:[#allocation8 + $0x8] sm:$0xff]   ;;  %s5197_s13 = sshll.u32 %s7030_s6, 4  ;;  %s10605_s13 = int_to_ptr.vmem [resolvable:$true] %s5197_s13 }
  0x84   :  { %6446 = vmatpush3.bf16.msra.mxu1 %v6763_v0  ;;  %6333 = vmatprep.subr.bf16.mxu0 %v6765_v2  ;;  %v6769_v5 = vld [vmem:[#allocation8 + $0x10] sm:$0xff]   ;;  %v6768_v6 = vld [vmem:[#allocation10 + $0x18] sm:$0xff]   ;;  %v6770_v8 = vld [vmem:[#allocation10 + $0x20] sm:$0xff]   ;;  %s6941_s14 = scalar_lea.vmem %s10605_s13, 6144  ;;  %p6946_p1 = scmp.lt.s32.totalorder %s10605_s13, %s10605_s13 }
  0x85   :  { %6447 = vmatprep.subr.bf16.mxu1 %v6764_v1  ;;  %6334 = vmatpush3.bf16.msra.mxu0 %v6765_v2  ;;  %v6771_v7 = vld [vmem:[#allocation8 + $0x18] sm:$0xff]   ;;  %v6772_v9 = vld [vmem:[#allocation10 + $0x28] sm:$0xff]   ;;  %v6773_v10 = vld [vmem:[#allocation8 + $0x20] sm:$0xff]   ;;  %p6942_p0 = scmp.ne.s32.totalorder %s10605_s13, %s6941_s14  ;;  %p6947_p2 = scmp.lt.s32.totalorder %s6941_s14, %s6941_s14 }
  0x86   :  { %6335 = vmatprep.subr.bf16.mxu0 %v6767_v4  ;;  %v119_v11 = vld [vmem:[#allocation2] sm:$0xff]  ;;  %v120_v12 = vld [vmem:[#allocation2 + $0x8] sm:$0xff]  ;;  %v121_v17 = vld [vmem:[#allocation2 + $0x10] sm:$0xff] }
  0x87   :  { %v7197_v13 = vld [vmem:[#allocation5] ss:$0 sm:$0xff]  ;;  %v7201_v16 = vld [vmem:[#allocation7] ss:$0 sm:$0xff]  ;;  %v122_v18 = vld [vmem:[#allocation2 + $0x18] sm:$0xff]  ;;  %p6948_p3 = por %p6947_p2, %p6946_p1 }
  0x88   :  { %6448 = vmatpush3.bf16.msra.mxu1 %v6764_v1  ;;  %v222_v14 = vmul.f32 %v7197_v13, %v119_v11  ;;  %v223_v15 = vmul.f32 %v7197_v13, %v120_v12  ;;  %v6775_v19 = vld [vmem:[#allocation8 + $0x28] sm:$0xff]   ;;  %v224_v20 = vmul.f32 %v7197_v13, %v121_v17  ;;  %v225_v21 = vmul.f32 %v7197_v13, %v122_v18  ;;  %v123_v24 = vld [vmem:[#allocation2 + $0x20] sm:$0xff]  ;;  %v126_v31 = vld [vmem:[#allocation2 + $0x38] sm:$0xff] }
  0x89   :  { %6449 = vmatprep.subr.bf16.mxu1 %v6766_v3  ;;  %6336 = vmatpush3.bf16.msra.mxu0 %v6767_v4  ;;  %v124_v25 = vld [vmem:[#allocation2 + $0x28] sm:$0xff]  ;;  %v125_v26 = vld [vmem:[#allocation2 + $0x30] sm:$0xff]  ;;  %v226_v29 = vmul.f32 %v7197_v13, %v123_v24  ;;  %v127_v32 = vld [vmem:[#allocation2 + $0x40] sm:$0xff]  ;;  %v229_v37 = vmul.f32 %v7197_v13, %v126_v31  ;;  %p6949_p4 = pnand %p6948_p3, %p6942_p0 }
  0x8a   :  { %6337 = vmatprep.subr.bf16.mxu0 %v6769_v5  ;;  %v325_v22 = vadd.f32 %v7201_v16, %v222_v14  ;;  %v326_v23 = vadd.f32 %v7201_v16, %v223_v15  ;;  %v7208_v27 = vadd.f32 %v7201_v16, %v224_v20  ;;  %v7211_v28 = vadd.f32 %v7201_v16, %v225_v21  ;;  %v6774_v33 = vld [vmem:[#allocation10 + $0x30] sm:$0xff]   ;;  %v128_v38 = vld [vmem:[#allocation2 + $0x48] sm:$0xff]  ;;  %v131_v53 = vld [vmem:[#allocation2 + $0x60] sm:$0xff] }
  0x8b   :  { %v227_v30 = vmul.f32 %v7197_v13, %v124_v25  ;;  %v228_v36 = vmul.f32 %v7197_v13, %v125_v26  ;;  %v7220_v41 = vadd.f32 %v7201_v16, %v226_v29  ;;  %v129_v43 = vld [vmem:[#allocation2 + $0x50] sm:$0xff]  ;;  %v7229_v47 = vadd.f32 %v7201_v16, %v229_v37  ;;  %v130_v49 = vld [vmem:[#allocation2 + $0x58] sm:$0xff]  ;;  %v132_v59 = vld [vmem:[#allocation2 + $0x68] sm:$0xff] }
  0x8c   :  { %6450 = vmatpush3.bf16.msra.mxu1 %v6766_v3  ;;  %v421_v34 = vmax.f32 %v325_v22, 0.0  ;;  %v422_v35 = vmax.f32 %v326_v23, 0.0  ;;  %v423_v39 = vmax.f32 %v7208_v27, 0.0  ;;  %v424_v40 = vmax.f32 %v7211_v28, 0.0  ;;  %v6777_v44 = vld [vmem:[#allocation8 + $0x30] sm:$0xff]   ;;  %v6776_v54 = vld [vmem:[#allocation10 + $0x38] sm:$0xff]  }
  0x8d   :  { %6451 = vmatprep.subr.bf16.mxu1 %v6768_v6  ;;  %6338 = vmatpush3.bf16.msra.mxu0 %v6769_v5  ;;  %v7223_v42 = vadd.f32 %v7201_v16, %v227_v30  ;;  %v7226_v46 = vadd.f32 %v7201_v16, %v228_v36  ;;  %v230_v48 = vmul.f32 %v7197_v13, %v127_v32  ;;  %v425_v50 = vmax.f32 %v7220_v41, 0.0  ;;  %v133_v60 = vld [vmem:[#allocation2 + $0x70] sm:$0xff]  ;;  %v134_v63 = vld [vmem:[#allocation2 + $0x78] sm:$0xff]  ;;  %v135_v0 = vld [vmem:[#allocation2 + $0x80] sm:$0xff] }
  0x8e   :  { %6339 = vmatprep.subr.bf16.mxu0 %v6771_v7  ;;  %v517_v45 = vpack.c.bf16 %v422_v35, %v421_v34  ;;  %5096 = vst [vmem:[#allocation17] sm:$0xff] %v421_v34  ;;  %5097 = vst [vmem:[#allocation17 + $0x8] sm:$0xff] %v422_v35  ;;  %v231_v52 = vmul.f32 %v7197_v13, %v128_v38  ;;  %v428_v56 = vmax.f32 %v7229_v47, 0.0  ;;  %v6778_v1 = vld [vmem:[#allocation8 + $0x38] sm:$0xff]   ;;  %v137_v15 = vld [vmem:[#allocation2 + $0x90] sm:$0xff] }
  0x8f   :  { %5098 = vst [vmem:[#allocation17 + $0x10] sm:$0xff] %v423_v39  ;;  %5099 = vst [vmem:[#allocation17 + $0x18] sm:$0xff] %v424_v40  ;;  %v426_v51 = vmax.f32 %v7223_v42, 0.0  ;;  %v427_v55 = vmax.f32 %v7226_v46, 0.0  ;;  %v7238_v57 = vadd.f32 %v7201_v16, %v230_v48  ;;  %v232_v58 = vmul.f32 %v7197_v13, %v129_v43  ;;  %v138_v21 = vld [vmem:[#allocation2 + $0x98] sm:$0xff]  ;;  %v139_v26 = vld [vmem:[#allocation2 + $0xa0] sm:$0xff] }
  0x90   :  { %6452 = vmatpush3.bf16.msra.mxu1 %v6768_v6  ;;  %6461 = vmatprep.mubr.bf16.mxu1 %v517_v45  ;;  %5100 = vst [vmem:[#allocation17 + $0x20] sm:$0xff] %v425_v50  ;;  %v7242_v61 = vadd.f32 %v7201_v16, %v231_v52  ;;  %v233_v62 = vmul.f32 %v7197_v13, %v130_v49  ;;  %5103 = vst [vmem:[#allocation17 + $0x38] sm:$0xff] %v428_v56  ;;  %v140_v27 = vld [vmem:[#allocation2 + $0xa8] sm:$0xff]  ;;  %v141_v32 = vld [vmem:[#allocation2 + $0xb0] sm:$0xff] }
  0x91   :  { %6453 = vmatprep.subr.bf16.mxu1 %v6770_v8  ;;  %6340 = vmatpush3.bf16.msra.mxu0 %v6771_v7  ;;  %5101 = vst [vmem:[#allocation17 + $0x28] sm:$0xff] %v426_v51  ;;  %5102 = vst [vmem:[#allocation17 + $0x30] sm:$0xff] %v427_v55  ;;  %v429_v2 = vmax.f32 %v7238_v57, 0.0  ;;  %v7251_v3 = vadd.f32 %v7201_v16, %v232_v58  ;;  %v234_v4 = vmul.f32 %v7197_v13, %v131_v53  ;;  %v142_v37 = vld [vmem:[#allocation2 + $0xb8] sm:$0xff]  ;;  %v143_v41 = vld [vmem:[#allocation2 + $0xc0] sm:$0xff] }
  0x92   :  { %6341 = vmatprep.subr.bf16.mxu0 %v6773_v10  ;;  %6349 = vmatprep.mubr.bf16.mxu0 %v517_v45  ;;  %v430_v5 = vmax.f32 %v7242_v61, 0.0  ;;  %v7256_v6 = vadd.f32 %v7201_v16, %v233_v62  ;;  %v235_v7 = vmul.f32 %v7197_v13, %v132_v59  ;;  %v237_v12 = vmul.f32 %v7197_v13, %v134_v63  ;;  %v144_v45 = vld [vmem:[#allocation2 + $0xc8] sm:$0xff]  ;;  %v145_v52 = vld [vmem:[#allocation2 + $0xd0] sm:$0xff]  ;;  %v146_v59 = vld [vmem:[#allocation2 + $0xd8] sm:$0xff] }
  0x93   :  { %5104 = vst [vmem:[#allocation17 + $0x40] sm:$0xff] %v429_v2  ;;  %v7264_v11 = vadd.f32 %v7201_v16, %v234_v4  ;;  %v238_v14 = vmul.f32 %v7197_v13, %v135_v0  ;;  %v518_v17 = vpack.c.bf16 %v424_v40, %v423_v39  ;;  %v519_v28 = vpack.c.bf16 %v426_v51, %v425_v50  ;;  %v148_v4 = vld [vmem:[#allocation2 + $0xe8] sm:$0xff] }
  0x94   :  { %6454 = vmatpush3.bf16.msra.mxu1 %v6770_v8  ;;  %v236_v8 = vmul.f32 %v7197_v13, %v133_v60  ;;  %5105 = vst [vmem:[#allocation17 + $0x48] sm:$0xff] %v430_v5  ;;  %v432_v18 = vmax.f32 %v7256_v6, 0.0  ;;  %v7281_v23 = vadd.f32 %v7201_v16, %v237_v12  ;;  %v240_v31 = vmul.f32 %v7197_v13, %v137_v15 }
  0x95   :  { %6455 = vmatprep.subr.bf16.mxu1 %v6772_v9  ;;  %6342 = vmatpush3.bf16.msra.mxu0 %v6773_v10  ;;  %v431_v10 = vmax.f32 %v7251_v3, 0.0  ;;  %v433_v22 = vmax.f32 %v7264_v11, 0.0  ;;  %v7285_v25 = vadd.f32 %v7201_v16, %v238_v14  ;;  %v241_v36 = vmul.f32 %v7197_v13, %v138_v21  ;;  %v149_v14 = vld [vmem:[#allocation2 + $0xf0] sm:$0xff] }
  0x96   :  { %6343 = vmatprep.subr.bf16.mxu0 %v6775_v19  ;;  %v7275_v20 = vadd.f32 %v7201_v16, %v236_v8  ;;  %5107 = vst [vmem:[#allocation17 + $0x58] sm:$0xff] %v432_v18  ;;  %v7305_v38 = vadd.f32 %v7201_v16, %v240_v31  ;;  %v242_v39 = vmul.f32 %v7197_v13, %v139_v26 }
  0x97   :  { %5106 = vst [vmem:[#allocation17 + $0x50] sm:$0xff] %v431_v10  ;;  %5108 = vst [vmem:[#allocation17 + $0x60] sm:$0xff] %v433_v22  ;;  %v437_v35 = vmax.f32 %v7285_v25, 0.0  ;;  %v243_v40 = vmul.f32 %v7197_v13, %v140_v27  ;;  %v7315_v43 = vadd.f32 %v7201_v16, %v241_v36  ;;  %v245_v51 = vmul.f32 %v7197_v13, %v142_v37  ;;  %v152_v27 = vld [vmem:[#allocation2 + $0x108] sm:$0xff]  ;;  %v153_v37 = vld [vmem:[#allocation2 + $0x110] sm:$0xff] }
  0x98   :  { %6456 = vmatpush3.bf16.msra.mxu1 %v6772_v9  ;;  %v136_v9 = vld [vmem:[#allocation2 + $0x88] sm:$0xff]  ;;  %v435_v30 = vmax.f32 %v7275_v20, 0.0  ;;  %v439_v48 = vmax.f32 %v7305_v38, 0.0  ;;  %v7320_v49 = vadd.f32 %v7201_v16, %v242_v39  ;;  %v246_v58 = vmul.f32 %v7197_v13, %v143_v41 }
  0x99   :  { %6457 = vmatprep.subr.bf16.mxu1 %v6774_v33  ;;  %6344 = vmatpush3.bf16.msra.mxu0 %v6775_v19  ;;  %v7272_v19 = vadd.f32 %v7201_v16, %v235_v7  ;;  %v239_v24 = vmul.f32 %v7197_v13, %v136_v9  ;;  %5112 = vst [vmem:[#allocation17 + $0x80] sm:$0xff] %v437_v35  ;;  %v440_v53 = vmax.f32 %v7315_v43, 0.0 }
  0x9a   :  { %6345 = vmatprep.subr.bf16.mxu0 %v6777_v44  ;;  %5110 = vst [vmem:[#allocation17 + $0x70] sm:$0xff] %v435_v30  ;;  %v7323_v50 = vadd.f32 %v7201_v16, %v243_v40  ;;  %5114 = vst [vmem:[#allocation17 + $0x90] sm:$0xff] %v439_v48  ;;  %v441_v60 = vmax.f32 %v7320_v49, 0.0  ;;  %v7338_v63 = vadd.f32 %v7201_v16, %v245_v51 }
  0x9b   :  { %v434_v29 = vmax.f32 %v7272_v19, 0.0  ;;  %v7296_v34 = vadd.f32 %v7201_v16, %v239_v24  ;;  %v247_v0 = vmul.f32 %v7197_v13, %v144_v45  ;;  %v520_v7 = vpack.c.bf16 %v428_v56, %v427_v55  ;;  %5115 = vst [vmem:[#allocation17 + $0x98] sm:$0xff] %v440_v53  ;;  %v150_v56 = vld [vmem:[#allocation2 + $0xf8] sm:$0xff] }
  0x9c   :  { %6458 = vmatpush3.bf16.msra.mxu1 %v6774_v33  ;;  %v436_v33 = vmax.f32 %v7281_v23, 0.0  ;;  %v442_v62 = vmax.f32 %v7323_v50, 0.0  ;;  %v7349_v9 = vadd.f32 %v7201_v16, %v246_v58  ;;  %v248_v12 = vmul.f32 %v7197_v13, %v145_v52  ;;  %5116 = vst [vmem:[#allocation17 + $0xa0] sm:$0xff] %v441_v60 }
  0x9d   :  { %6459 = vmatprep.subr.bf16.mxu1 %v6776_v54  ;;  %6346 = vmatpush3.bf16.msra.mxu0 %v6777_v44  ;;  %5109 = vst [vmem:[#allocation17 + $0x68] sm:$0xff] %v434_v29  ;;  %v438_v42 = vmax.f32 %v7296_v34, 0.0  ;;  %v244_v44 = vmul.f32 %v7197_v13, %v141_v32  ;;  %v521_v15 = vpack.c.bf16 %v430_v5, %v429_v2  ;;  %v444_v46 = vmax.f32 %v7338_v63, 0.0 }
  0x9e   :  { %6347 = vmatprep.subr.bf16.mxu0 %v6778_v1  ;;  %5111 = vst [vmem:[#allocation17 + $0x78] sm:$0xff] %v436_v33  ;;  %5117 = vst [vmem:[#allocation17 + $0xa8] sm:$0xff] %v442_v62  ;;  %v7362_v47 = vadd.f32 %v7201_v16, %v247_v0  ;;  %v249_v55 = vmul.f32 %v7197_v13, %v146_v59  ;;  %v445_v57 = vmax.f32 %v7349_v9, 0.0  ;;  %v155_v59 = vld [vmem:[#allocation2 + $0x120] sm:$0xff]  ;;  %v156_v0 = vld [vmem:[#allocation2 + $0x128] sm:$0xff] }
  0x9f   :  { %5113 = vst [vmem:[#allocation17 + $0x88] sm:$0xff] %v438_v42  ;;  %v7369_v61 = vadd.f32 %v7201_v16, %v248_v12  ;;  %v251_v5 = vmul.f32 %v7197_v13, %v148_v4  ;;  %5119 = vst [vmem:[#allocation17 + $0xb8] sm:$0xff] %v444_v46  ;;  %v252_v26 = vmul.f32 %v7197_v13, %v149_v14  ;;  %v157_v14 = vld [vmem:[#allocation2 + $0x130] sm:$0xff] }
  0xa0   :  { %6460 = vmatpush3.bf16.msra.mxu1 %v6776_v54  ;;  %v7330_v54 = vadd.f32 %v7201_v16, %v244_v44  ;;  %v446_v21 = vmax.f32 %v7362_v47, 0.0  ;;  %v7377_v24 = vadd.f32 %v7201_v16, %v249_v55  ;;  %5120 = vst [vmem:[#allocation17 + $0xc0] sm:$0xff] %v445_v57  ;;  %v253_v36 = vmul.f32 %v7197_v13, %v150_v56  ;;  %v154_v44 = vld [vmem:[#allocation2 + $0x118] sm:$0xff]  ;;  %v159_v55 = vld [vmem:[#allocation2 + $0x140] sm:$0xff] }
  0xa1   :  { %6348 = vmatpush3.bf16.msra.mxu0 %v6778_v1  ;;  %v147_v1 = vld [vmem:[#allocation2 + $0xe0] sm:$0xff]  ;;  %v7387_v32 = vadd.f32 %v7201_v16, %v251_v5  ;;  %v7394_v40 = vadd.f32 %v7201_v16, %v252_v26  ;;  %v255_v58 = vmul.f32 %v7197_v13, %v152_v27  ;;  %v256_v12 = vmul.f32 %v7197_v13, %v153_v37  ;;  %v160_v26 = vld [vmem:[#allocation2 + $0x148] sm:$0xff]  ;;  %v161_v27 = vld [vmem:[#allocation2 + $0x150] sm:$0xff] }
  0xa2   :  { %v443_v8 = vmax.f32 %v7330_v54, 0.0  ;;  %v250_v2 = vmul.f32 %v7197_v13, %v147_v1  ;;  %5121 = vst [vmem:[#allocation17 + $0xc8] sm:$0xff] %v446_v21  ;;  %v448_v39 = vmax.f32 %v7377_v24, 0.0  ;;  %v7402_v52 = vadd.f32 %v7201_v16, %v253_v36 }
  0xa3   :  { %6462 = vmatmul.mubr.bf16.vlgmr.msra.gmra.mrb[0].mxu1 %v518_v17  ;;  %v450_v51 = vmax.f32 %v7387_v32, 0.0  ;;  %v522_v1 = vpack.c.bf16 %v432_v18, %v431_v10  ;;  %v451_v4 = vmax.f32 %v7394_v40, 0.0  ;;  %v523_v3 = vpack.c.bf16 %v434_v29, %v433_v22 }
  0xa4   :  { %6465 = vmatprep.mubr.bf16.mxu1 %v519_v28  ;;  %6350 = vmatmul.mubr.bf16.vlgmr.msra.gmra.mrb[0].mxu0 %v518_v17  ;;  %5118 = vst [vmem:[#allocation17 + $0xb0] sm:$0xff] %v443_v8  ;;  %v151_v17 = vld [vmem:[#allocation2 + $0x100] sm:$0xff]  ;;  %v7384_v31 = vadd.f32 %v7201_v16, %v250_v2  ;;  %5123 = vst [vmem:[#allocation17 + $0xd8] sm:$0xff] %v448_v39  ;;  %v452_v6 = vmax.f32 %v7402_v52, 0.0  ;;  %v7426_v10 = vadd.f32 %v7201_v16, %v255_v58  ;;  %v162_v58 = vld [vmem:[#allocation2 + $0x158] sm:$0xff] }
  0xa5   :  { %6353 = vmatprep.mubr.bf16.mxu0 %v519_v28  ;;  %v447_v28 = vmax.f32 %v7369_v61, 0.0  ;;  %v254_v41 = vmul.f32 %v7197_v13, %v151_v17  ;;  %5125 = vst [vmem:[#allocation17 + $0xe8] sm:$0xff] %v450_v51  ;;  %v257_v18 = vmul.f32 %v7197_v13, %v154_v44  ;;  %5126 = vst [vmem:[#allocation17 + $0xf0] sm:$0xff] %v451_v4 }
  0xa6   :  { %v449_v45 = vmax.f32 %v7384_v31, 0.0  ;;  %v7433_v19 = vadd.f32 %v7201_v16, %v256_v12  ;;  %v258_v22 = vmul.f32 %v7197_v13, %v155_v59  ;;  %v259_v29 = vmul.f32 %v7197_v13, %v156_v0  ;;  %5127 = vst [vmem:[#allocation17 + $0xf8] sm:$0xff] %v452_v6  ;;  %v163_v59 = vld [vmem:[#allocation2 + $0x160] sm:$0xff]  ;;  %v164_v0 = vld [vmem:[#allocation2 + $0x168] sm:$0xff] }
  0xa7   :  { %5122 = vst [vmem:[#allocation17 + $0xd0] sm:$0xff] %v447_v28  ;;  %v7441_v56 = vpack.c.bf16 %v436_v33, %v435_v30  ;;  %v454_v2 = vmax.f32 %v7426_v10, 0.0  ;;  %v7447_v5 = vadd.f32 %v7201_v16, %v257_v18  ;;  %v260_v17 = vmul.f32 %v7197_v13, %v157_v14 }
  0xa8   :  { %5124 = vst [vmem:[#allocation17 + $0xe0] sm:$0xff] %v449_v45  ;;  %v455_v20 = vmax.f32 %v7433_v19, 0.0  ;;  %v7454_v23 = vadd.f32 %v7201_v16, %v258_v22  ;;  %v7457_v30 = vadd.f32 %v7201_v16, %v259_v29  ;;  %v7464_v36 = vpack.c.bf16 %v438_v42, %v437_v35  ;;  %v165_v22 = vld [vmem:[#allocation2 + $0x170] sm:$0xff] }
  0xa9   :  { %5129 = vst [vmem:[#allocation17 + $0x108] sm:$0xff] %v454_v2  ;;  %v456_v37 = vmax.f32 %v7447_v5, 0.0  ;;  %v262_v44 = vmul.f32 %v7197_v13, %v159_v55  ;;  %v263_v42 = vmul.f32 %v7197_v13, %v160_v26  ;;  %v7485_v12 = vpack.c.bf16 %v440_v53, %v439_v48 }
  0xaa   :  { %5130 = vst [vmem:[#allocation17 + $0x110] sm:$0xff] %v455_v20  ;;  %v457_v25 = vmax.f32 %v7454_v23, 0.0  ;;  %v458_v34 = vmax.f32 %v7457_v30, 0.0  ;;  %v7498_v38 = vpack.c.bf16 %v442_v62, %v441_v60  ;;  %v265_v53 = vmul.f32 %v7197_v13, %v162_v58 }
  0xab   :  { %6466 = vmatmul.mubr.bf16.gmra.mrb[4].mxu1 %v520_v7  ;;  %5131 = vst [vmem:[#allocation17 + $0x118] sm:$0xff] %v456_v37  ;;  %v7491_v18 = vadd.f32 %v7201_v16, %v262_v44  ;;  %v7506_v48 = vadd.f32 %v7201_v16, %v263_v42  ;;  %v266_v60 = vmul.f32 %v7197_v13, %v163_v59 }
  0xac   :  { %6469 = vmatprep.mubr.bf16.mxu1 %v521_v15  ;;  %6354 = vmatmul.mubr.bf16.gmra.mrb[4].mxu0 %v520_v7  ;;  %v7413_v7 = vadd.f32 %v7201_v16, %v254_v41  ;;  %v7470_v41 = vadd.f32 %v7201_v16, %v260_v17  ;;  %5132 = vst [vmem:[#allocation17 + $0x120] sm:$0xff] %v457_v25  ;;  %5133 = vst [vmem:[#allocation17 + $0x128] sm:$0xff] %v458_v34 }
  0xad   :  { %6357 = vmatprep.mubr.bf16.mxu0 %v521_v15  ;;  %v158_v15 = vld [vmem:[#allocation2 + $0x138] sm:$0xff]  ;;  %v461_v49 = vmax.f32 %v7491_v18, 0.0  ;;  %v267_v62 = vmul.f32 %v7197_v13, %v164_v0  ;;  %v7521_v29 = vpack.c.bf16 %v444_v46, %v443_v8  ;;  %v462_v55 = vmax.f32 %v7506_v48, 0.0 }
  0xae   :  { %v453_v11 = vmax.f32 %v7413_v7, 0.0  ;;  %v261_v33 = vmul.f32 %v7197_v13, %v158_v15  ;;  %v459_v14 = vmax.f32 %v7470_v41, 0.0  ;;  %v264_v15 = vmul.f32 %v7197_v13, %v161_v27  ;;  %v169_v27 = vld [vmem:[#allocation2 + $0x190] sm:$0xff]  ;;  %v170_v0 = vld [vmem:[#allocation2 + $0x198] sm:$0xff] }
  0xaf   :  { %v7527_v17 = vadd.f32 %v7201_v16, %v265_v53  ;;  %v268_v26 = vmul.f32 %v7197_v13, %v165_v22  ;;  %5136 = vst [vmem:[#allocation17 + $0x140] sm:$0xff] %v461_v49  ;;  %v7534_v63 = vadd.f32 %v7201_v16, %v266_v60  ;;  %v7537_v8 = vadd.f32 %v7201_v16, %v267_v62  ;;  %v172_v22 = vld [vmem:[#allocation2 + $0x1a8] sm:$0xff] }
  0xb0   :  { %5128 = vst [vmem:[#allocation17 + $0x100] sm:$0xff] %v453_v11  ;;  %v7478_v35 = vadd.f32 %v7201_v16, %v261_v33  ;;  %5134 = vst [vmem:[#allocation17 + $0x130] sm:$0xff] %v459_v14  ;;  %v7513_v50 = vadd.f32 %v7201_v16, %v264_v15  ;;  %v168_v33 = vld [vmem:[#allocation2 + $0x188] sm:$0xff]  ;;  %v7544_v44 = vpack.c.bf16 %v446_v21, %v445_v57  ;;  %v171_v15 = vld [vmem:[#allocation2 + $0x1a0] sm:$0xff]  ;;  %v2309_v48 = vlaneseq }
  0xb1   :  { %5137 = vst [vmem:[#allocation17 + $0x148] sm:$0xff] %v462_v55  ;;  %v10707_v58 = vmax.f32 %v7527_v17, 0.0  ;;  %v7550_v42 = vadd.f32 %v7201_v16, %v268_v26  ;;  %v10706_v9 = vmax.f32 %v7534_v63, 0.0  ;;  %v10705_v47 = vmax.f32 %v7537_v8, 0.0  ;;  %v175_v26 = vld [vmem:[#allocation2 + $0x1c0] sm:$0xff] }
  0xb2   :  { %v460_v43 = vmax.f32 %v7478_v35, 0.0  ;;  %v10708_v54 = vmax.f32 %v7513_v50, 0.0  ;;  %v271_v21 = vmul.f32 %v7197_v13, %v168_v33  ;;  %v7567_v53 = vpack.c.bf16 %v448_v39, %v447_v28 }
  0xb3   :  { %6470 = vmatmul.mubr.bf16.gmra.mrb[8].mxu1 %v522_v1  ;;  %5139 = vst [vmem:[#allocation17 + $0x158] sm:$0xff] %v10707_v58  ;;  %v272_v62 = vmul.f32 %v7197_v13, %v169_v27  ;;  %v7581_v61 = vpack.c.bf16 %v450_v51, %v449_v45  ;;  %5140 = vst [vmem:[#allocation17 + $0x160] sm:$0xff] %v10706_v9  ;;  %v273_v39 = vmul.f32 %v7197_v13, %v170_v0  ;;  %v177_v0 = vld [vmem:[#allocation2 + $0x1d0] sm:$0xff] }
  0xb4   :  { %6473 = vmatprep.mubr.bf16.mxu1 %v523_v3  ;;  %6358 = vmatmul.mubr.bf16.gmra.mrb[8].mxu0 %v522_v1  ;;  %v166_v1 = vld [vmem:[#allocation2 + $0x178] sm:$0xff]  ;;  %5135 = vst [vmem:[#allocation17 + $0x138] sm:$0xff] %v460_v43  ;;  %5138 = vst [vmem:[#allocation17 + $0x150] sm:$0xff] %v10708_v54  ;;  %v7589_v28 = vadd.f32 %v7201_v16, %v271_v21  ;;  %v274_v45 = vmul.f32 %v7197_v13, %v171_v15  ;;  %v10717_v41 = vmax.f32 %v7513_v50, 0.0 }
  0xb5   :  { %6361 = vmatprep.mubr.bf16.mxu0 %v523_v3  ;;  %v167_v3 = vld [vmem:[#allocation2 + $0x180] sm:$0xff]  ;;  %v269_v46 = vmul.f32 %v7197_v13, %v166_v1  ;;  %v10704_v1 = vmax.f32 %v7550_v42, 0.0  ;;  %5141 = vst [vmem:[#allocation17 + $0x168] sm:$0xff] %v10705_v47  ;;  %v7597_v32 = vadd.f32 %v7201_v16, %v272_v62  ;;  %v275_v51 = vmul.f32 %v7197_v13, %v172_v22 }
  0xb6   :  { %v270_v59 = vmul.f32 %v7197_v13, %v167_v3  ;;  %v173_v3 = vld [vmem:[#allocation2 + $0x1b0] sm:$0xff]  ;;  %v7605_v33 = vpack.c.bf16 %v452_v6, %v451_v4  ;;  %v7618_v52 = vadd.f32 %v7201_v16, %v274_v45  ;;  %v7628_v21 = vpack.c.bf16 %v454_v2, %v453_v11  ;;  %v179_v2 = vld [vmem:[#allocation2 + $0x1e0] sm:$0xff] }
  0xb7   :  { %v7559_v57 = vadd.f32 %v7201_v16, %v269_v46  ;;  %5142 = vst [vmem:[#allocation17 + $0x170] sm:$0xff] %v10704_v1  ;;  %v7611_v46 = vadd.f32 %v7201_v16, %v273_v39  ;;  %v276_v27 = vmul.f32 %v7197_v13, %v173_v3  ;;  %v10700_v40 = vmax.f32 %v7597_v32, 0.0  ;;  %v178_v3 = vld [vmem:[#allocation2 + $0x1d8] sm:$0xff]  ;;  %v209_v1 = vld [vmem:[#allocation2 + $0x2d0] sm:$0xff] }
  0xb8   :  { %v7573_v60 = vadd.f32 %v7201_v16, %v270_v59  ;;  %v176_v59 = vld [vmem:[#allocation2 + $0x1c8] sm:$0xff]  ;;  %v7621_v4 = vadd.f32 %v7201_v16, %v275_v51  ;;  %v278_v62 = vmul.f32 %v7197_v13, %v175_v26  ;;  %v10698_v39 = vmax.f32 %v7618_v52, 0.0 }
  0xb9   :  { %v10703_v24 = vmax.f32 %v7559_v57, 0.0  ;;  %v10699_v15 = vmax.f32 %v7611_v46, 0.0  ;;  %v379_v22 = vadd.f32 %v7201_v16, %v276_v27  ;;  %5146 = vst [vmem:[#allocation17 + $0x190] sm:$0xff] %v10700_v40  ;;  %v279_v11 = vmul.f32 %v7197_v13, %v176_v59  ;;  %v182_v59 = vld [vmem:[#allocation2 + $0x1f8] sm:$0xff]  ;;  %v196_v40 = vld [vmem:[#allocation2 + $0x268] sm:$0xff] }
  0xba   :  { %v10702_v31 = vmax.f32 %v7573_v60, 0.0  ;;  %v10697_v7 = vmax.f32 %v7621_v4, 0.0  ;;  %v7646_v45 = vpack.c.bf16 %v456_v37, %v455_v20  ;;  %v381_v26 = vadd.f32 %v7201_v16, %v278_v62  ;;  %5148 = vst [vmem:[#allocation17 + $0x1a0] sm:$0xff] %v10698_v39  ;;  %v188_v39 = vld [vmem:[#allocation2 + $0x228] sm:$0xff] }
  0xbb   :  { %6474 = vmatmul.mubr.bf16.gmra.mrb[12].mxu1 %v7441_v56  ;;  %5143 = vst [vmem:[#allocation17 + $0x178] sm:$0xff] %v10703_v24  ;;  %5147 = vst [vmem:[#allocation17 + $0x198] sm:$0xff] %v10699_v15  ;;  %v475_v51 = vmax.f32 %v379_v22, 0.0  ;;  %v280_v27 = vmul.f32 %v7197_v13, %v177_v0  ;;  %v7657_v19 = vpack.c.bf16 %v458_v34, %v457_v25  ;;  %v183_v0 = vld [vmem:[#allocation2 + $0x200] sm:$0xff]  ;;  %v10718_v35 = vmax.f32 %v7527_v17, 0.0 }
  0xbc   :  { %6477 = vmatprep.mubr.bf16.mxu1 %v7464_v36  ;;  %6362 = vmatmul.mubr.bf16.gmra.mrb[12].mxu0 %v7441_v56  ;;  %v174_v56 = vld [vmem:[#allocation2 + $0x1b8] sm:$0xff]  ;;  %5144 = vst [vmem:[#allocation17 + $0x180] sm:$0xff] %v10702_v31  ;;  %5149 = vst [vmem:[#allocation17 + $0x1a8] sm:$0xff] %v10697_v7  ;;  %v382_v20 = vadd.f32 %v7201_v16, %v279_v11  ;;  %v281_v37 = vmul.f32 %v7197_v13, %v178_v3  ;;  %v477_v23 = vmax.f32 %v381_v26, 0.0  ;;  %v204_v31 = vld [vmem:[#allocation2 + $0x2a8] sm:$0xff] }
  0xbd   :  { %6365 = vmatprep.mubr.bf16.mxu0 %v7464_v36  ;;  %v10701_v36 = vmax.f32 %v7589_v28, 0.0  ;;  %v277_v6 = vmul.f32 %v7197_v13, %v174_v56  ;;  %v180_v56 = vld [vmem:[#allocation2 + $0x1e8] sm:$0xff]  ;;  %5150 = vst [vmem:[#allocation17 + $0x1b0] sm:$0xff] %v475_v51  ;;  %v383_v30 = vadd.f32 %v7201_v16, %v280_v27  ;;  %v282_v25 = vmul.f32 %v7197_v13, %v179_v2  ;;  %v185_v27 = vld [vmem:[#allocation2 + $0x210] sm:$0xff] }
  0xbe   :  { %v283_v34 = vmul.f32 %v7197_v13, %v180_v56  ;;  %v478_v62 = vmax.f32 %v382_v20, 0.0  ;;  %v384_v3 = vadd.f32 %v7201_v16, %v281_v37  ;;  %5152 = vst [vmem:[#allocation17 + $0x1c0] sm:$0xff] %v477_v23  ;;  %v285_v56 = vmul.f32 %v7197_v13, %v182_v59  ;;  %v186_v20 = vld [vmem:[#allocation2 + $0x218] sm:$0xff] }
  0xbf   :  { %5145 = vst [vmem:[#allocation17 + $0x188] sm:$0xff] %v10701_v36  ;;  %v380_v10 = vadd.f32 %v7201_v16, %v277_v6  ;;  %v181_v6 = vld [vmem:[#allocation2 + $0x1f0] sm:$0xff]  ;;  %v479_v11 = vmax.f32 %v383_v30, 0.0  ;;  %v385_v26 = vadd.f32 %v7201_v16, %v282_v25  ;;  %v10720_v18 = vmax.f32 %v7537_v8, 0.0 }
  0xc0   :  { %v386_v2 = vadd.f32 %v7201_v16, %v283_v34  ;;  %v7677_v7 = vpack.c.bf16 %v478_v62, %v477_v23  ;;  %5153 = vst [vmem:[#allocation17 + $0x1c8] sm:$0xff] %v478_v62  ;;  %v388_v30 = vadd.f32 %v7201_v16, %v285_v56  ;;  %v187_v34 = vld [vmem:[#allocation2 + $0x220] sm:$0xff]  ;;  %v201_v36 = vld [vmem:[#allocation2 + $0x290] sm:$0xff]  ;;  %v10723_v50 = vmax.f32 %v7573_v60, 0.0 }
  0xc1   :  { %v476_v5 = vmax.f32 %v380_v10, 0.0  ;;  %v284_v10 = vmul.f32 %v7197_v13, %v181_v6  ;;  %5154 = vst [vmem:[#allocation17 + $0x1d0] sm:$0xff] %v479_v11  ;;  %v481_v6 = vmax.f32 %v385_v26, 0.0  ;;  %v10724_v17 = vmax.f32 %v7589_v28, 0.0 }
  0xc2   :  { %v482_v37 = vmax.f32 %v386_v2, 0.0  ;;  %v484_v26 = vmax.f32 %v388_v30, 0.0  ;;  %v289_v2 = vmul.f32 %v7197_v13, %v186_v20  ;;  %v10725_v8 = vmax.f32 %v7597_v32, 0.0 }
  0xc3   :  { %6478 = vmatmul.mubr.bf16.gmra.mrb[16].mxu1 %v7485_v12  ;;  %v7670_v22 = vpack.c.bf16 %v476_v5, %v475_v51  ;;  %5151 = vst [vmem:[#allocation17 + $0x1b8] sm:$0xff] %v476_v5  ;;  %v387_v51 = vadd.f32 %v7201_v16, %v284_v10  ;;  %v286_v5 = vmul.f32 %v7197_v13, %v183_v0  ;;  %v189_v10 = vld [vmem:[#allocation2 + $0x230] sm:$0xff]  ;;  %5156 = vst [vmem:[#allocation17 + $0x1e0] sm:$0xff] %v481_v6 }
  0xc4   :  { %6481 = vmatprep.mubr.bf16.mxu1 %v7498_v38  ;;  %6366 = vmatmul.mubr.bf16.gmra.mrb[16].mxu0 %v7485_v12  ;;  %v184_v12 = vld [vmem:[#allocation2 + $0x208] sm:$0xff]  ;;  %v7688_v0 = vpack.c.bf16 %v482_v37, %v481_v6  ;;  %5157 = vst [vmem:[#allocation17 + $0x1e8] sm:$0xff] %v482_v37  ;;  %5159 = vst [vmem:[#allocation17 + $0x1f8] sm:$0xff] %v484_v26  ;;  %v392_v20 = vadd.f32 %v7201_v16, %v289_v2  ;;  %v194_v2 = vld [vmem:[#allocation2 + $0x258] sm:$0xff]  ;;  %v10728_v60 = vmax.f32 %v7621_v4, 0.0 }
  0xc5   :  { %6369 = vmatprep.mubr.bf16.mxu0 %v7498_v38  ;;  %v480_v38 = vmax.f32 %v384_v3, 0.0  ;;  %v287_v25 = vmul.f32 %v7197_v13, %v184_v12  ;;  %v483_v23 = vmax.f32 %v387_v51, 0.0  ;;  %v389_v62 = vadd.f32 %v7201_v16, %v286_v5  ;;  %v191_v5 = vld [vmem:[#allocation2 + $0x240] sm:$0xff] }
  0xc6   :  { %v288_v3 = vmul.f32 %v7197_v13, %v185_v27  ;;  %v290_v27 = vmul.f32 %v7197_v13, %v187_v34  ;;  %v291_v51 = vmul.f32 %v7197_v13, %v188_v39  ;;  %v292_v30 = vmul.f32 %v7197_v13, %v189_v10 }
  0xc7   :  { %v7683_v59 = vpack.c.bf16 %v480_v38, %v479_v11  ;;  %5155 = vst [vmem:[#allocation17 + $0x1d8] sm:$0xff] %v480_v38  ;;  %v390_v12 = vadd.f32 %v7201_v16, %v287_v25  ;;  %v190_v11 = vld [vmem:[#allocation2 + $0x238] sm:$0xff]  ;;  %5158 = vst [vmem:[#allocation17 + $0x1f0] sm:$0xff] %v483_v23  ;;  %v485_v56 = vmax.f32 %v389_v62, 0.0  ;;  %v7697_v6 = vpack.c.bf16 %v484_v26, %v483_v23  ;;  %v192_v25 = vld [vmem:[#allocation2 + $0x248] sm:$0xff] }
  0xc8   :  { %v391_v38 = vadd.f32 %v7201_v16, %v288_v3  ;;  %v393_v34 = vadd.f32 %v7201_v16, %v290_v27  ;;  %v394_v39 = vadd.f32 %v7201_v16, %v291_v51  ;;  %v293_v3 = vmul.f32 %v7197_v13, %v190_v11  ;;  %v195_v51 = vld [vmem:[#allocation2 + $0x260] sm:$0xff] }
  0xc9   :  { %v486_v37 = vmax.f32 %v390_v12, 0.0  ;;  %5160 = vst [vmem:[#allocation17 + $0x200] sm:$0xff] %v485_v56  ;;  %v488_v26 = vmax.f32 %v392_v20, 0.0  ;;  %v395_v12 = vadd.f32 %v7201_v16, %v292_v30  ;;  %v294_v10 = vmul.f32 %v7197_v13, %v191_v5  ;;  %v197_v30 = vld [vmem:[#allocation2 + $0x270] sm:$0xff] }
  0xca   :  { %v487_v62 = vmax.f32 %v391_v38, 0.0  ;;  %v490_v15 = vmax.f32 %v394_v39, 0.0  ;;  %v396_v38 = vadd.f32 %v7201_v16, %v293_v3  ;;  %v295_v27 = vmul.f32 %v7197_v13, %v192_v25  ;;  %v198_v3 = vld [vmem:[#allocation2 + $0x278] sm:$0xff] }
  0xcb   :  { %6482 = vmatmul.mubr.bf16.gmra.mrb[20].mxu1 %v7521_v29  ;;  %v7705_v23 = vpack.c.bf16 %v486_v37, %v485_v56  ;;  %5161 = vst [vmem:[#allocation17 + $0x208] sm:$0xff] %v486_v37  ;;  %5163 = vst [vmem:[#allocation17 + $0x218] sm:$0xff] %v488_v26  ;;  %v491_v56 = vmax.f32 %v395_v12, 0.0  ;;  %v397_v37 = vadd.f32 %v7201_v16, %v294_v10  ;;  %v199_v10 = vld [vmem:[#allocation2 + $0x280] sm:$0xff] }
  0xcc   :  { %6485 = vmatprep.mubr.bf16.mxu1 %v7544_v44  ;;  %6370 = vmatmul.mubr.bf16.gmra.mrb[20].mxu0 %v7521_v29  ;;  %v193_v29 = vld [vmem:[#allocation2 + $0x250] sm:$0xff]  ;;  %5162 = vst [vmem:[#allocation17 + $0x210] sm:$0xff] %v487_v62  ;;  %v7711_v11 = vpack.c.bf16 %v488_v26, %v487_v62  ;;  %5165 = vst [vmem:[#allocation17 + $0x228] sm:$0xff] %v490_v15  ;;  %v398_v39 = vadd.f32 %v7201_v16, %v295_v27  ;;  %v200_v27 = vld [vmem:[#allocation2 + $0x288] sm:$0xff] }
  0xcd   :  { %6373 = vmatprep.mubr.bf16.mxu0 %v7544_v44  ;;  %v489_v44 = vmax.f32 %v393_v34, 0.0  ;;  %v296_v20 = vmul.f32 %v7197_v13, %v193_v29  ;;  %v492_v34 = vmax.f32 %v396_v38, 0.0  ;;  %v297_v25 = vmul.f32 %v7197_v13, %v194_v2  ;;  %5166 = vst [vmem:[#allocation17 + $0x230] sm:$0xff] %v491_v56 }
  0xce   :  { %v493_v62 = vmax.f32 %v397_v37, 0.0  ;;  %v298_v12 = vmul.f32 %v7197_v13, %v195_v51  ;;  %v299_v29 = vmul.f32 %v7197_v13, %v196_v40  ;;  %v300_v38 = vmul.f32 %v7197_v13, %v197_v30 }
  0xcf   :  { %v7715_v5 = vpack.c.bf16 %v490_v15, %v489_v44  ;;  %5164 = vst [vmem:[#allocation17 + $0x220] sm:$0xff] %v489_v44  ;;  %v399_v26 = vadd.f32 %v7201_v16, %v296_v20  ;;  %v7724_v15 = vpack.c.bf16 %v492_v34, %v491_v56  ;;  %5167 = vst [vmem:[#allocation17 + $0x238] sm:$0xff] %v492_v34  ;;  %v494_v44 = vmax.f32 %v398_v39, 0.0 }
  0xd0   :  { %v400_v2 = vadd.f32 %v7201_v16, %v297_v25  ;;  %5168 = vst [vmem:[#allocation17 + $0x240] sm:$0xff] %v493_v62  ;;  %v401_v51 = vadd.f32 %v7201_v16, %v298_v12  ;;  %v402_v40 = vadd.f32 %v7201_v16, %v299_v29  ;;  %v301_v20 = vmul.f32 %v7197_v13, %v198_v3  ;;  %v203_v3 = vld [vmem:[#allocation2 + $0x2a0] sm:$0xff] }
  0xd1   :  { %v495_v37 = vmax.f32 %v399_v26, 0.0  ;;  %v7733_v56 = vpack.c.bf16 %v494_v44, %v493_v62  ;;  %5169 = vst [vmem:[#allocation17 + $0x248] sm:$0xff] %v494_v44  ;;  %v403_v30 = vadd.f32 %v7201_v16, %v300_v38  ;;  %v302_v39 = vmul.f32 %v7197_v13, %v199_v10 }
  0xd2   :  { %v496_v34 = vmax.f32 %v400_v2, 0.0  ;;  %v497_v25 = vmax.f32 %v401_v51, 0.0  ;;  %v498_v26 = vmax.f32 %v402_v40, 0.0  ;;  %v404_v12 = vadd.f32 %v7201_v16, %v301_v20  ;;  %v205_v2 = vld [vmem:[#allocation2 + $0x2b0] sm:$0xff]  ;;  %v206_v40 = vld [vmem:[#allocation2 + $0x2b8] sm:$0xff] }
  0xd3   :  { %6486 = vmatmul.mubr.bf16.gmra.mrb[24].mxu1 %v7567_v53  ;;  %5170 = vst [vmem:[#allocation17 + $0x250] sm:$0xff] %v495_v37  ;;  %v303_v29 = vmul.f32 %v7197_v13, %v200_v27  ;;  %v405_v62 = vadd.f32 %v7201_v16, %v302_v39  ;;  %v304_v44 = vmul.f32 %v7197_v13, %v201_v36  ;;  %v207_v36 = vld [vmem:[#allocation2 + $0x2c0] sm:$0xff] }
  0xd4   :  { %6489 = vmatprep.mubr.bf16.mxu1 %v7581_v61  ;;  %6374 = vmatmul.mubr.bf16.gmra.mrb[24].mxu0 %v7567_v53  ;;  %v202_v53 = vld [vmem:[#allocation2 + $0x298] sm:$0xff]  ;;  %v7739_v24 = vpack.c.bf16 %v496_v34, %v495_v37  ;;  %5171 = vst [vmem:[#allocation17 + $0x258] sm:$0xff] %v496_v34  ;;  %v7743_v10 = vpack.c.bf16 %v498_v26, %v497_v25  ;;  %5172 = vst [vmem:[#allocation17 + $0x260] sm:$0xff] %v497_v25  ;;  %v500_v38 = vmax.f32 %v404_v12, 0.0  ;;  %v208_v12 = vld [vmem:[#allocation2 + $0x2c8] sm:$0xff] }
  0xd5   :  { %6377 = vmatprep.mubr.bf16.mxu0 %v7581_v61  ;;  %v499_v61 = vmax.f32 %v403_v30, 0.0  ;;  %5173 = vst [vmem:[#allocation17 + $0x268] sm:$0xff] %v498_v26  ;;  %v406_v51 = vadd.f32 %v7201_v16, %v303_v29  ;;  %v305_v27 = vmul.f32 %v7197_v13, %v202_v53  ;;  %v501_v37 = vmax.f32 %v405_v62, 0.0  ;;  %v6779_v62 = vld [vmem:[#allocation5] ss:$0 sm:$0xff] }
  0xd6   :  { %v407_v20 = vadd.f32 %v7201_v16, %v304_v44  ;;  %v306_v34 = vmul.f32 %v7197_v13, %v203_v3  ;;  %v307_v30 = vmul.f32 %v7197_v13, %v204_v31  ;;  %5175 = vst [vmem:[#allocation17 + $0x278] sm:$0xff] %v500_v38  ;;  %v308_v53 = vmul.f32 %v7197_v13, %v205_v2 }
  0xd7   :  { %5174 = vst [vmem:[#allocation17 + $0x270] sm:$0xff] %v499_v61  ;;  %v7751_v39 = vpack.c.bf16 %v500_v38, %v499_v61  ;;  %v502_v25 = vmax.f32 %v406_v51, 0.0  ;;  %v408_v26 = vadd.f32 %v7201_v16, %v305_v27  ;;  %5176 = vst [vmem:[#allocation17 + $0x280] sm:$0xff] %v501_v37  ;;  %v309_v44 = vmul.f32 %v6779_v62, %v206_v40  ;;  %v6780_v51 = vld [vmem:[#allocation7] ss:$0 sm:$0xff]  ;;  %v210_v27 = vld [vmem:[#allocation2 + $0x2d8] sm:$0xff] }
  0xd8   :  { %v503_v29 = vmax.f32 %v407_v20, 0.0  ;;  %v409_v3 = vadd.f32 %v7201_v16, %v306_v34  ;;  %v410_v31 = vadd.f32 %v7201_v16, %v307_v30  ;;  %v411_v13 = vadd.f32 %v6780_v51, %v308_v53  ;;  %v211_v30 = vld [vmem:[#allocation2 + $0x2e0] sm:$0xff]  ;;  %v212_v40 = vld [vmem:[#allocation2 + $0x2e8] sm:$0xff] }
  0xd9   :  { %v7759_v61 = vpack.c.bf16 %v502_v25, %v501_v37  ;;  %5177 = vst [vmem:[#allocation17 + $0x288] sm:$0xff] %v502_v25  ;;  %v504_v38 = vmax.f32 %v408_v26, 0.0  ;;  %v310_v2 = vmul.f32 %v6779_v62, %v207_v36  ;;  %v412_v47 = vadd.f32 %v6780_v51, %v309_v44  ;;  %v213_v26 = vld [vmem:[#allocation2 + $0x2f0] sm:$0xff] }
  0xda   :  { %5178 = vst [vmem:[#allocation17 + $0x290] sm:$0xff] %v503_v29  ;;  %v505_v20 = vmax.f32 %v409_v3, 0.0  ;;  %v506_v34 = vmax.f32 %v410_v31, 0.0  ;;  %v311_v16 = vmul.f32 %v6779_v62, %v208_v12  ;;  %v312_v25 = vmul.f32 %v6779_v62, %v209_v1  ;;  %v214_v3 = vld [vmem:[#allocation2 + $0x2f8] sm:$0xff] }
  0xdb   :  { %6490 = vmatmul.mubr.bf16.gmra.mrb[28].mxu1 %v7605_v33  ;;  %v7762_v9 = vpack.c.bf16 %v504_v38, %v503_v29  ;;  %5179 = vst [vmem:[#allocation17 + $0x298] sm:$0xff] %v504_v38  ;;  %v413_v37 = vadd.f32 %v6780_v51, %v310_v2  ;;  %v508_v36 = vmax.f32 %v412_v47, 0.0  ;;  %v313_v53 = vmul.f32 %v6779_v62, %v210_v27 }
  0xdc   :  { %6493 = vmatprep.mubr.bf16.mxu1 %v7628_v21  ;;  %6378 = vmatmul.mubr.bf16.gmra.mrb[28].mxu0 %v7605_v33  ;;  %v507_v33 = vmax.f32 %v411_v13, 0.0  ;;  %v7764_v58 = vpack.c.bf16 %v506_v34, %v505_v20  ;;  %5180 = vst [vmem:[#allocation17 + $0x2a0] sm:$0xff] %v505_v20  ;;  %5181 = vst [vmem:[#allocation17 + $0x2a8] sm:$0xff] %v506_v34  ;;  %v415_v12 = vadd.f32 %v6780_v51, %v312_v25 }
  0xdd   :  { %6381 = vmatprep.mubr.bf16.mxu0 %v7628_v21  ;;  %v414_v21 = vadd.f32 %v6780_v51, %v311_v16  ;;  %v509_v31 = vmax.f32 %v413_v37, 0.0  ;;  %v314_v44 = vmul.f32 %v6779_v62, %v211_v30  ;;  %v315_v54 = vmul.f32 %v6779_v62, %v212_v40  ;;  %5183 = vst [vmem:[#allocation17 + $0x2b8] sm:$0xff] %v508_v36 }
  0xde   :  { %5182 = vst [vmem:[#allocation17 + $0x2b0] sm:$0xff] %v507_v33  ;;  %v7766_v29 = vpack.c.bf16 %v508_v36, %v507_v33  ;;  %v416_v13 = vadd.f32 %v6780_v51, %v313_v53  ;;  %v316_v1 = vmul.f32 %v6779_v62, %v213_v26  ;;  %v511_v2 = vmax.f32 %v415_v12, 0.0 }
  0xdf   :  { %v510_v38 = vmax.f32 %v414_v21, 0.0  ;;  %5184 = vst [vmem:[#allocation17 + $0x2c0] sm:$0xff] %v509_v31  ;;  %v417_v20 = vadd.f32 %v6780_v51, %v314_v44  ;;  %v418_v47 = vadd.f32 %v6780_v51, %v315_v54  ;;  %v317_v34 = vmul.f32 %v6779_v62, %v214_v3 }
  0xe0   :  { %v512_v16 = vmax.f32 %v416_v13, 0.0  ;;  %v419_v30 = vadd.f32 %v6780_v51, %v316_v1  ;;  %5186 = vst [vmem:[#allocation17 + $0x2d0] sm:$0xff] %v511_v2  ;;  %v536_v62 = vpack.c.bf16 %v460_v43, %v459_v14  ;;  %v538_v14 = vpack.c.bf16 %v10718_v35, %v10717_v41 }
  0xe1   :  { %v7770_v27 = vpack.c.bf16 %v510_v38, %v509_v31  ;;  %5185 = vst [vmem:[#allocation17 + $0x2c8] sm:$0xff] %v510_v38  ;;  %v513_v40 = vmax.f32 %v417_v20, 0.0  ;;  %v514_v33 = vmax.f32 %v418_v47, 0.0  ;;  %v420_v37 = vadd.f32 %v6780_v51, %v317_v34 }
  0xe2   :  { %v7774_v25 = vpack.c.bf16 %v512_v16, %v511_v2  ;;  %5187 = vst [vmem:[#allocation17 + $0x2d8] sm:$0xff] %v512_v16  ;;  %v515_v54 = vmax.f32 %v419_v30, 0.0  ;;  %v537_v51 = vpack.c.bf16 %v462_v55, %v461_v49  ;;  %v10719_v43 = vmax.f32 %v7534_v63, 0.0 }
  0xe3   :  { %6494 = vmatmul.mubr.bf16.gmra.mrb[32].mxu1 %v7646_v45  ;;  %v7780_v26 = vpack.c.bf16 %v514_v33, %v513_v40  ;;  %5188 = vst [vmem:[#allocation17 + $0x2e0] sm:$0xff] %v513_v40  ;;  %5189 = vst [vmem:[#allocation17 + $0x2e8] sm:$0xff] %v514_v33  ;;  %v10721_v49 = vmax.f32 %v7550_v42, 0.0  ;;  %v10722_v55 = vmax.f32 %v7559_v57, 0.0  ;;  %v541_v53 = vpack.c.bf16 %v10724_v17, %v10723_v50 }
  0xe4   :  { %6497 = vmatprep.mubr.bf16.mxu1 %v7657_v19  ;;  %6382 = vmatmul.mubr.bf16.gmra.mrb[32].mxu0 %v7646_v45  ;;  %v516_v45 = vmax.f32 %v420_v37, 0.0  ;;  %5190 = vst [vmem:[#allocation17 + $0x2f0] sm:$0xff] %v515_v54  ;;  %v539_v36 = vpack.c.bf16 %v10720_v18, %v10719_v43  ;;  %v7804_v3 = vshrl.u32 %v2309_v48, 7  ;;  %v10726_v42 = vmax.f32 %v7611_v46, 0.0 }
  0xe5   :  { %6385 = vmatprep.mubr.bf16.mxu0 %v7657_v19  ;;  %v540_v21 = vpack.c.bf16 %v10722_v55, %v10721_v49  ;;  %v10727_v57 = vmax.f32 %v7618_v52, 0.0 }
  0xe6   :  { %v7786_v19 = vpack.c.bf16 %v516_v45, %v515_v54  ;;  %5191 = vst [vmem:[#allocation17 + $0x2f8] sm:$0xff] %v516_v45  ;;  %v2312_v63 = vadd.s32 16, %v7804_v3  ;;  %v542_v31 = vpack.c.bf16 %v10726_v42, %v10725_v8  ;;  %v2313_v38 = vadd.s32 24, %v7804_v3 }
  0xe7   :  { %v543_v12 = vpack.c.bf16 %v10728_v60, %v10727_v57  ;;  %v7820_v13 = vmul.u32.u64.low 2863311531, %v7804_v3  ;;  %v7821_v32 = vmul.u32.u64.high 2863311531, %v7804_v3, %v7820_v13  ;;  %v2311_v46 = vadd.s32 8, %v7804_v3 }
  0xe8   :  { %v7815_v28 = vmul.u32.u64.low 2863311531, %v2312_v63  ;;  %v7816_v44 = vmul.u32.u64.high 2863311531, %v2312_v63, %v7815_v28  ;;  %v7824_v1 = vmul.u32.u64.low 2863311531, %v2313_v38  ;;  %v7825_v52 = vmul.u32.u64.high 2863311531, %v2313_v38, %v7824_v1 }
  0xe9   :  { %v7828_v4 = vadd.s32 48, %v7804_v3  ;;  %v7833_v20 = vadd.s32 32, %v7804_v3  ;;  %v7836_v47 = vmul.u32.u64.low 2863311531, %v2311_v46  ;;  %v7837_v34 = vmul.u32.u64.high 2863311531, %v2311_v46, %v7836_v47 }
  0xea   :  { %v2532_v2 = vshrl.u32 %v7816_v44, 4  ;;  %v7840_v16 = vadd.s32 56, %v7804_v3  ;;  %v2510_v37 = vshrl.u32 %v7821_v32, 4  ;;  %v7854_v45 = vadd.s32 40, %v7804_v3 }
  0xeb   :  { %6498 = vmatmul.mubr.bf16.gmra.mrb[36].mxu1 %v536_v62  ;;  %v7844_v30 = vmul.u32.u64.low 2863311531, %v7828_v4  ;;  %v7845_v40 = vmul.u32.u64.high 2863311531, %v7828_v4, %v7844_v30  ;;  %v2543_v35 = vshrl.u32 %v7825_v52, 4  ;;  %v2521_v55 = vshrl.u32 %v7837_v34, 4 }
  0xec   :  { %6501 = vmatprep.mubr.bf16.mxu1 %v537_v51  ;;  %6386 = vmatmul.mubr.bf16.gmra.mrb[36].mxu0 %v536_v62  ;;  %v2533_v33 = vmul.u32 24, %v2532_v2  ;;  %v7850_v54 = vmul.u32.u64.low 2863311531, %v7833_v20  ;;  %v7851_v62 = vmul.u32.u64.high 2863311531, %v7833_v20, %v7850_v54 }
  0xed   :  { %6389 = vmatprep.mubr.bf16.mxu0 %v537_v51  ;;  %v7857_v51 = vadd.s32 80, %v7804_v3  ;;  %v2511_v43 = vmul.u32 24, %v2510_v37  ;;  %v2576_v50 = vshrl.u32 %v7845_v40, 4  ;;  %v2522_v42 = vmul.u32 24, %v2521_v55 }
  0xee   :  { %v2554_v8 = vshrl.u32 %v7851_v62, 4 }
  0xef   :  { %v7873_v48 = vmul.u32.u64.low 2863311531, %v7857_v51  ;;  %v7874_v49 = vmul.u32.u64.high 2863311531, %v7857_v51, %v7873_v48  ;;  %v7900_v1 = vsub.s32 %v2311_v46, %v2522_v42 }
  0xf0   :  { %v2555_v44 = vmul.u32 24, %v2554_v8  ;;  %v8125_v8 = vadd.s32 184, %v7804_v3 }
  0xf1   :  { %v2620_v32 = vshrl.u32 %v7874_v49, 4  ;;  %vm3561_vm8 = vcmp.ne.s32.totalorder %v7900_v1, 0  ;;  %vm3657_vm9 = vcmp.lt.s32.totalorder %v7900_v1, 0  ;;  %v7957_v49 = vadd.s32 104, %v7804_v3 }
  0xf2   :  { %v7925_v37 = vsub.s32 %v7833_v20, %v2555_v44  ;;  %v8022_v44 = vadd.s32 128, %v7804_v3 }
  0xf3   :  { %6502 = vmatmul.mubr.bf16.gmra.mrb[40].mxu1 %v538_v14  ;;  %v2621_v54 = vmul.u32 24, %v2620_v32 }
  0xf4   :  { %6505 = vmatprep.mubr.bf16.mxu1 %v539_v36  ;;  %6390 = vmatmul.mubr.bf16.gmra.mrb[40].mxu0 %v538_v14  ;;  %v2534_v14 = vsub.s32 %v2312_v63, %v2533_v33  ;;  %v2512_v63 = vsub.s32 %v7804_v3, %v2511_v43  ;;  %v7945_v43 = vadd.s32 120, %v7804_v3  ;;  %vm3564_vm12 = vcmp.ne.s32.totalorder %v7925_v37, 0 }
  0xf5   :  { %6393 = vmatprep.mubr.bf16.mxu0 %v539_v36  ;;  %v7869_v18 = vmul.u32.u64.low 2863311531, %v7854_v45  ;;  %v7870_v36 = vmul.u32.u64.high 2863311531, %v7854_v45, %v7869_v18  ;;  %vm3660_vm13 = vcmp.lt.s32.totalorder %v7925_v37, 0 }
  0xf6   :  { %vm3562_vm0 = vcmp.ne.s32.totalorder %v2534_v14, 0  ;;  %vm3658_vm1 = vcmp.lt.s32.totalorder %v2534_v14, 0  ;;  %v3850_v57 = vadd.s32 24, %v2534_v14  ;;  %vm3560_vm3 = vcmp.ne.s32.totalorder %v2512_v63, 0 }
  0xf7   :  { %vm3754_vm2 = vmand %vm3658_vm1, %vm3562_vm0  ;;  %vm3656_vm4 = vcmp.lt.s32.totalorder %v2512_v63, 0  ;;  %v3848_v28 = vadd.s32 24, %v2512_v63  ;;  %v2565_v13 = vshrl.u32 %v7870_v36, 4  ;;  %v2622_v36 = vsub.s32 %v7857_v51, %v2621_v54 }
  0xf8   :  { %v7907_v47 = vsel %vm3754_vm2, %v3850_v57, %v2534_v14  ;;  %vm3752_vm5 = vmand %vm3656_vm4, %vm3560_vm3 }
  0xf9   :  { %v7927_v62 = vsel %vm3752_vm5, %v3848_v28, %v2512_v63  ;;  %vm7979_vm1 = vmand %vm3657_vm9, %vm3561_vm8  ;;  %v3852_v63 = vadd.s32 24, %v7925_v37  ;;  %vm3570_vm5 = vcmp.ne.s32.totalorder %v2622_v36, 0 }
  0xfb   :  { %6506 = vmatmul.mubr.bf16.gmra.mrb[44].mxu1 %v540_v21 }
  0xfc   :  { %6509 = vmatprep.mubr.bf16.mxu1 %v541_v53  ;;  %6394 = vmatmul.mubr.bf16.gmra.mrb[44].mxu0 %v540_v21  ;;  %v2544_v21 = vmul.u32 24, %v2543_v35  ;;  %v7937_v35 = vadd.s32 96, %v7804_v3 }
  0xfd   :  { %6397 = vmatprep.mubr.bf16.mxu0 %v541_v53 }
  0xfe   :  { %v7891_v60 = vsub.s32 %v2313_v38, %v2544_v21  ;;  %v7971_v55 = vmul.u32.u64.low 2863311531, %v7937_v35  ;;  %v7972_v21 = vmul.u32.u64.high 2863311531, %v7937_v35, %v7971_v55 }
  0xff   :  { %v8096_v55 = vadd.s32 136, %v7804_v3 }
 0x100   :  { %vm3563_vm6 = vcmp.ne.s32.totalorder %v7891_v60, 0  ;;  %vm3659_vm7 = vcmp.lt.s32.totalorder %v7891_v60, 0  ;;  %v3851_v33 = vadd.s32 24, %v7891_v60 }
 0x101   :  { %vm7964_vm15 = vmand %vm3659_vm7, %vm3563_vm6  ;;  %vm3666_vm7 = vcmp.lt.s32.totalorder %v2622_v36, 0 }
 0x102   :  { %vm8004_vm6 = vmand %vm3660_vm13, %vm3564_vm12 }
 0x103   :  { %6510 = vmatmul.mubr.bf16.gmra.mrb[48].mxu1 %v542_v31  ;;  %vm8041_vm12 = vmand %vm3666_vm7, %vm3570_vm5 }
 0x104   :  { %6513 = vmatprep.mubr.bf16.mxu1 %v543_v12  ;;  %6398 = vmatmul.mubr.bf16.gmra.mrb[48].mxu0 %v542_v31 }
 0x105   :  { %6401 = vmatprep.mubr.bf16.mxu0 %v543_v12  ;;  %v2577_v12 = vmul.u32 24, %v2576_v50 }
 0x107   :  { %v7911_v34 = vsub.s32 %v7828_v4, %v2577_v12  ;;  %v2566_v4 = vmul.u32 24, %v2565_v13 }
 0x109   :  { %vm3566_vm10 = vcmp.ne.s32.totalorder %v7911_v34, 0  ;;  %vm3662_vm11 = vcmp.lt.s32.totalorder %v7911_v34, 0  ;;  %v2567_v18 = vsub.s32 %v7854_v45, %v2566_v4  ;;  %v3858_v4 = vadd.s32 24, %v2622_v36 }
 0x10a   :  { %vm7995_vm2 = vmand %vm3662_vm11, %vm3566_vm10 }
 0x10b   :  { %6514 = vmatmul.mubr.bf16.gmra.mrb[52].mxu1 %v7670_v22  ;;  %vm3565_vm3 = vcmp.ne.s32.totalorder %v2567_v18, 0  ;;  %vm3661_vm4 = vcmp.lt.s32.totalorder %v2567_v18, 0  ;;  %v8091_v45 = vsel %vm8041_vm12, %v3858_v4, %v2622_v36  ;;  %v8109_v36 = vadd.s32 176, %v7804_v3 }
 0x10c   :  { %6517 = vmatprep.mubr.bf16.mxu1 %v7677_v7  ;;  %6402 = vmatmul.mubr.bf16.gmra.mrb[52].mxu0 %v7670_v22  ;;  %v7860_v22 = vmul.u32.u64.low 2863311531, %v7840_v16  ;;  %v7861_v41 = vmul.u32.u64.high 2863311531, %v7840_v16, %v7860_v22  ;;  %vm8024_vm11 = vmand %vm3661_vm4, %vm3565_vm3  ;;  %v8158_v4 = vadd.s32 208, %v7804_v3 }
 0x10d   :  { %6405 = vmatprep.mubr.bf16.mxu0 %v7677_v7  ;;  %v7865_v7 = vadd.s32 64, %v7804_v3  ;;  %v3849_v22 = vadd.s32 24, %v7900_v1 }
 0x10e   :  { %v2587_v31 = vshrl.u32 %v7861_v41, 4 }
 0x10f   :  { %v7881_v17 = vmul.u32.u64.low 2863311531, %v7865_v7  ;;  %v7882_v53 = vmul.u32.u64.high 2863311531, %v7865_v7, %v7881_v17 }
 0x110   :  { %v2588_v38 = vmul.u32 24, %v2587_v31  ;;  %v8009_v31 = vmul.u32.u64.low 2863311531, %v7957_v49  ;;  %v8010_v57 = vmul.u32.u64.high 2863311531, %v7957_v49, %v8009_v31 }
 0x111   :  { %v2598_v30 = vshrl.u32 %v7882_v53, 4  ;;  %v7985_v17 = vmul.u32.u64.low 2863311531, %v7945_v43  ;;  %v7986_v53 = vmul.u32.u64.high 2863311531, %v7945_v43, %v7985_v17  ;;  %v8131_v31 = vadd.s32 168, %v7804_v3 }
 0x113   :  { %6518 = vmatmul.mubr.bf16.gmra.mrb[56].mxu1 %v7683_v59  ;;  %v2599_v41 = vmul.u32 24, %v2598_v30  ;;  %v8037_v30 = vsel %vm7964_vm15, %v3851_v33, %v7891_v60  ;;  %v8059_v33 = vsel %vm8004_vm6, %v3852_v63, %v7925_v37  ;;  %v8122_v63 = vadd.s32 160, %v7804_v3 }
 0x114   :  { %6521 = vmatprep.mubr.bf16.mxu1 %v7688_v0  ;;  %6406 = vmatmul.mubr.bf16.gmra.mrb[56].mxu0 %v7683_v59  ;;  %v7889_v59 = vadd.s32 88, %v7804_v3 }
 0x115   :  { %6409 = vmatprep.mubr.bf16.mxu0 %v7688_v0  ;;  %v7894_v0 = vadd.s32 72, %v7804_v3  ;;  %v2600_v51 = vsub.s32 %v7865_v7, %v2599_v41  ;;  %v7989_v7 = vadd.s32 144, %v7804_v3  ;;  %v8049_v41 = vsel %vm7979_vm1, %v3849_v22, %v7900_v1 }
 0x116   :  { %v7903_v52 = vmul.u32.u64.low 2863311531, %v7889_v59  ;;  %v7904_v2 = vmul.u32.u64.high 2863311531, %v7889_v59, %v7903_v52  ;;  %v2642_v1 = vshrl.u32 %v7972_v21, 4 }
 0x117   :  { %v7917_v46 = vmul.u32.u64.low 2863311531, %v7894_v0  ;;  %v7918_v40 = vmul.u32.u64.high 2863311531, %v7894_v0, %v7917_v46  ;;  %vm3568_vm9 = vcmp.ne.s32.totalorder %v2600_v51, 0  ;;  %vm3664_vm10 = vcmp.lt.s32.totalorder %v2600_v51, 0 }
 0x118   :  { %v2631_v48 = vshrl.u32 %v7904_v2, 4  ;;  %v8030_v52 = vmul.u32.u64.low 2863311531, %v7989_v7  ;;  %v8031_v2 = vmul.u32.u64.high 2863311531, %v7989_v7, %v8030_v52  ;;  %v3853_v46 = vadd.s32 24, %v2567_v18  ;;  %vm3760_vm13 = vmand %vm3664_vm10, %vm3568_vm9 }
 0x119   :  { %v2609_v50 = vshrl.u32 %v7918_v40, 4  ;;  %v3856_v54 = vadd.s32 24, %v2600_v51 }
 0x11a   :  { %v2632_v42 = vmul.u32 24, %v2631_v48  ;;  %v8087_v48 = vsel %vm8024_vm11, %v3853_v46, %v2567_v18  ;;  %v2643_v18 = vmul.u32 24, %v2642_v1  ;;  %v2708_v17 = vshrl.u32 %v8031_v2, 4 }
 0x11b   :  { %6522 = vmatmul.mubr.bf16.gmra.mrb[60].mxu1 %v7697_v6  ;;  %v2610_v32 = vmul.u32 24, %v2609_v50 }
 0x11c   :  { %6525 = vmatprep.mubr.bf16.mxu1 %v7705_v23  ;;  %6410 = vmatmul.mubr.bf16.gmra.mrb[60].mxu0 %v7697_v6  ;;  %v7921_v6 = vadd.s32 112, %v7804_v3 }
 0x11d   :  { %6413 = vmatprep.mubr.bf16.mxu0 %v7705_v23  ;;  %v7932_v23 = vsub.s32 %v7840_v16, %v2588_v38  ;;  %v3854_v16 = vadd.s32 24, %v7911_v34 }
 0x11e   :  { %v7941_v20 = vmul.u32.u64.low 2863311531, %v7921_v6  ;;  %v7942_v14 = vmul.u32.u64.high 2863311531, %v7921_v6, %v7941_v20 }
 0x11f   :  { %vm3567_vm14 = vcmp.ne.s32.totalorder %v7932_v23, 0  ;;  %vm3663_vm0 = vcmp.lt.s32.totalorder %v7932_v23, 0  ;;  %v3855_v28 = vadd.s32 24, %v7932_v23  ;;  %v8054_v60 = vsel %vm7995_vm2, %v3854_v16, %v7911_v34 }
 0x120   :  { %vm8016_vm8 = vmand %vm3663_vm0, %vm3567_vm14  ;;  %v2664_v38 = vshrl.u32 %v7942_v14, 4  ;;  %v8064_v20 = vsub.s32 %v7889_v59, %v2632_v42  ;;  %v8069_v22 = vmul.u32.u64.low 2863311531, %v8022_v44  ;;  %v8070_v14 = vmul.u32.u64.high 2863311531, %v8022_v44, %v8069_v22 }
 0x121   :  { %v8073_v34 = vadd.s32 152, %v7804_v3  ;;  %v8079_v37 = vsel %vm8016_vm8, %v3855_v28, %v7932_v23  ;;  %v8082_v59 = vsub.s32 %v7894_v0, %v2610_v32  ;;  %v2675_v16 = vshrl.u32 %v7986_v53, 4 }
 0x122   :  { %vm3571_vm14 = vcmp.ne.s32.totalorder %v8064_v20, 0  ;;  %vm3667_vm15 = vcmp.lt.s32.totalorder %v8064_v20, 0  ;;  %v8101_v0 = vadd.s32 24, %v8064_v20  ;;  %v2653_v23 = vshrl.u32 %v8010_v57, 4 }
 0x123   :  { %6526 = vmatmul.mubr.bf16.gmra.mrb[64].mxu1 %v7711_v11  ;;  %vm3569_vm0 = vcmp.ne.s32.totalorder %v8082_v59, 0  ;;  %v2676_v50 = vmul.u32 24, %v2675_v16  ;;  %vm3665_vm1 = vcmp.lt.s32.totalorder %v8082_v59, 0  ;;  %v2644_v57 = vsub.s32 %v7937_v35, %v2643_v18  ;;  %vm8166_vm5 = vmand %vm3667_vm15, %vm3571_vm14 }
 0x124   :  { %6529 = vmatprep.mubr.bf16.mxu1 %v7715_v5  ;;  %6414 = vmatmul.mubr.bf16.gmra.mrb[64].mxu0 %v7711_v11  ;;  %v8105_v21 = vmul.u32.u64.low 2863311531, %v8073_v34  ;;  %v8106_v11 = vmul.u32.u64.high 2863311531, %v8073_v34, %v8105_v21  ;;  %v2654_v42 = vmul.u32 24, %v2653_v23  ;;  %v2686_v12 = vshrl.u32 %v8070_v14, 4  ;;  %vm8179_vm7 = vmand %vm3665_vm1, %vm3569_vm0 }
 0x125   :  { %6417 = vmatprep.mubr.bf16.mxu0 %v7715_v5  ;;  %v8118_v53 = vmul.u32.u64.low 2863311531, %v8096_v55  ;;  %v8119_v5 = vmul.u32.u64.high 2863311531, %v8096_v55, %v8118_v53  ;;  %v8137_v28 = vmul.u32.u64.low 2863311531, %v8109_v36  ;;  %v8138_v13 = vmul.u32.u64.high 2863311531, %v8109_v36, %v8137_v28 }
 0x126   :  { %v2677_v32 = vsub.s32 %v7945_v43, %v2676_v50  ;;  %v8149_v35 = vmul.u32.u64.low 2863311531, %v8125_v8  ;;  %v8150_v2 = vmul.u32.u64.high 2863311531, %v8125_v8, %v8149_v35  ;;  %v2655_v46 = vsub.s32 %v7957_v49, %v2654_v42 }
 0x127   :  { %vm3572_vm4 = vcmp.ne.s32.totalorder %v2644_v57, 0  ;;  %v2719_v1 = vshrl.u32 %v8106_v11, 4  ;;  %vm3668_vm6 = vcmp.lt.s32.totalorder %v2644_v57, 0  ;;  %v3860_v49 = vadd.s32 24, %v2644_v57 }
 0x128   :  { %vm3575_vm8 = vcmp.ne.s32.totalorder %v2677_v32, 0  ;;  %vm3671_vm9 = vcmp.lt.s32.totalorder %v2677_v32, 0  ;;  %v3863_v23 = vadd.s32 24, %v2677_v32  ;;  %v2697_v18 = vshrl.u32 %v8119_v5, 4 }
 0x129   :  { %vm3573_vm11 = vcmp.ne.s32.totalorder %v2655_v46, 0  ;;  %vm3669_vm12 = vcmp.lt.s32.totalorder %v2655_v46, 0  ;;  %v8194_v21 = vmul.u32.u64.low 2863311531, %v8158_v4  ;;  %v8195_v11 = vmul.u32.u64.high 2863311531, %v8158_v4, %v8194_v21  ;;  %vm8211_vm14 = vmand %vm3671_vm9, %vm3575_vm8 }
 0x12a   :  { %v2720_v5 = vmul.u32 24, %v2719_v1  ;;  %v2752_v42 = vshrl.u32 %v8138_v13, 4  ;;  %vm3765_vm1 = vmand %vm3669_vm12, %vm3573_vm11  ;;  %v2698_v13 = vmul.u32 24, %v2697_v18  ;;  %v8282_v18 = vadd.s32 240, %v7804_v3 }
 0x12b   :  { %6530 = vmatmul.mubr.bf16.gmra.mrb[68].mxu1 %v7724_v15  ;;  %v2796_v1 = vshrl.u32 %v8195_v11, 4  ;;  %v8294_v50 = vadd.s32 224, %v7804_v3 }
 0x12c   :  { %6533 = vmatprep.mubr.bf16.mxu1 %v7733_v56  ;;  %6418 = vmatmul.mubr.bf16.gmra.mrb[68].mxu0 %v7724_v15  ;;  %v2665_v15 = vmul.u32 24, %v2664_v38  ;;  %v2709_v38 = vmul.u32 24, %v2708_v17  ;;  %v3861_v17 = vadd.s32 24, %v2655_v46 }
 0x12d   :  { %6421 = vmatprep.mubr.bf16.mxu0 %v7733_v56  ;;  %v8093_v56 = vsel %vm3760_vm13, %v3856_v54, %v2600_v51  ;;  %v2687_v54 = vmul.u32 24, %v2686_v12  ;;  %vm8200_vm13 = vmand %vm3668_vm6, %vm3572_vm4  ;;  %v2797_v21 = vmul.u32 24, %v2796_v1 }
 0x12e   :  { %v8113_v51 = vsub.s32 %v7921_v6, %v2665_v15  ;;  %v3857_v6 = vadd.s32 24, %v8082_v59  ;;  %v2710_v14 = vsub.s32 %v7989_v7, %v2709_v38  ;;  %v8172_v15 = vadd.s32 192, %v7804_v3 }
 0x12f   :  { %v8205_v53 = vsub.s32 %v8022_v44, %v2687_v54  ;;  %v8223_v44 = vsel %vm8166_vm5, %v8101_v0, %v8064_v20  ;;  %v2763_v20 = vshrl.u32 %v8150_v2, 4  ;;  %v8258_v2 = vadd.s32 200, %v7804_v3 }
 0x130   :  { %vm3574_vm2 = vcmp.ne.s32.totalorder %v8113_v51, 0  ;;  %vm3670_vm3 = vcmp.lt.s32.totalorder %v8113_v51, 0  ;;  %v3862_v43 = vadd.s32 24, %v8113_v51  ;;  %vm3578_vm15 = vcmp.ne.s32.totalorder %v2710_v14, 0 }
 0x131   :  { %vm8189_vm10 = vmand %vm3670_vm3, %vm3574_vm2  ;;  %vm3674_vm0 = vcmp.lt.s32.totalorder %v2710_v14, 0  ;;  %v3866_v35 = vadd.s32 24, %v2710_v14  ;;  %vm3576_vm3 = vcmp.ne.s32.totalorder %v8205_v53, 0  ;;  %vm3672_vm4 = vcmp.lt.s32.totalorder %v8205_v53, 0 }
 0x132   :  { %vm3770_vm2 = vmand %vm3674_vm0, %vm3578_vm15 }
 0x133   :  { %6534 = vmatmul.mubr.bf16.gmra.mrb[72].mxu1 %v7739_v24  ;;  %vm8300_vm11 = vmand %vm3672_vm4, %vm3576_vm3 }
 0x134   :  { %6537 = vmatprep.mubr.bf16.mxu1 %v7743_v10  ;;  %6422 = vmatmul.mubr.bf16.gmra.mrb[72].mxu0 %v7739_v24  ;;  %v8145_v52 = vmul.u32.u64.low 2863311531, %v8122_v63  ;;  %v8146_v24 = vmul.u32.u64.high 2863311531, %v8122_v63, %v8145_v52 }
 0x135   :  { %6425 = vmatprep.mubr.bf16.mxu0 %v7743_v10  ;;  %v8154_v40 = vmul.u32.u64.low 2863311531, %v8131_v31  ;;  %v8155_v10 = vmul.u32.u64.high 2863311531, %v8131_v31, %v8154_v40  ;;  %v8236_v52 = vsel %vm8189_vm10, %v3862_v43, %v8113_v51  ;;  %v8252_v51 = vsel %vm8211_vm14, %v3863_v23, %v2677_v32 }
 0x136   :  { %v2730_v38 = vshrl.u32 %v8146_v24, 4  ;;  %v2753_v40 = vmul.u32 24, %v2752_v42  ;;  %v8248_v24 = vadd.s32 216, %v7804_v3  ;;  %v8254_v43 = vsel %vm3765_vm1, %v3861_v17, %v2655_v46 }
 0x137   :  { %v2741_v0 = vshrl.u32 %v8155_v10, 4  ;;  %v8265_v32 = vsel %vm3770_vm2, %v3866_v35, %v2710_v14  ;;  %v2764_v46 = vmul.u32 24, %v2763_v20 }
 0x138   :  { %v2731_v10 = vmul.u32 24, %v2730_v38  ;;  %v2754_v22 = vsub.s32 %v8109_v36, %v2753_v40  ;;  %v8278_v14 = vmul.u32.u64.low 2863311531, %v8258_v2  ;;  %v8279_v23 = vmul.u32.u64.high 2863311531, %v8258_v2, %v8278_v14 }
 0x139   :  { %v2742_v54 = vmul.u32 24, %v2741_v0  ;;  %v8288_v7 = vsub.s32 %v8125_v8, %v2764_v46  ;;  %v8341_v20 = vmul.u32.u64.low 2863311531, %v8294_v50  ;;  %v8342_v0 = vmul.u32.u64.high 2863311531, %v8294_v50, %v8341_v20 }
 0x13a   :  { %v2732_v36 = vsub.s32 %v8122_v63, %v2731_v10  ;;  %vm3582_vm9 = vcmp.ne.s32.totalorder %v2754_v22, 0  ;;  %vm3678_vm10 = vcmp.lt.s32.totalorder %v2754_v22, 0  ;;  %v3870_v12 = vadd.s32 24, %v2754_v22 }
 0x13b   :  { %6538 = vmatmul.mubr.bf16.gmra.mrb[76].mxu1 %v7751_v39  ;;  %vm3583_vm0 = vcmp.ne.s32.totalorder %v8288_v7, 0  ;;  %vm3679_vm1 = vcmp.lt.s32.totalorder %v8288_v7, 0  ;;  %vm8334_vm3 = vmand %vm3678_vm10, %vm3582_vm9 }
 0x13c   :  { %6541 = vmatprep.mubr.bf16.mxu1 %v7759_v61  ;;  %6426 = vmatmul.mubr.bf16.gmra.mrb[76].mxu0 %v7751_v39  ;;  %v8216_v39 = vmul.u32.u64.low 2863311531, %v8172_v15  ;;  %v8217_v28 = vmul.u32.u64.high 2863311531, %v8172_v15, %v8216_v39  ;;  %vm3676_vm14 = vcmp.lt.s32.totalorder %v2732_v36, 0 }
 0x13d   :  { %6429 = vmatprep.mubr.bf16.mxu0 %v7759_v61  ;;  %v8228_v61 = vsel %vm8179_vm7, %v3857_v6, %v8082_v59  ;;  %v8242_v59 = vsel %vm8200_vm13, %v3860_v49, %v2644_v57  ;;  %v8245_v6 = vsub.s32 %v8073_v34, %v2720_v5  ;;  %v3864_v34 = vadd.s32 24, %v8205_v53 }
 0x13e   :  { %v2699_v57 = vsub.s32 %v8096_v55, %v2698_v13  ;;  %v8272_v49 = vmul.u32.u64.low 2863311531, %v8248_v24  ;;  %v8273_v16 = vmul.u32.u64.high 2863311531, %v8248_v24, %v8272_v49  ;;  %v2774_v55 = vshrl.u32 %v8217_v28, 4 }
 0x13f   :  { %vm3579_vm5 = vcmp.ne.s32.totalorder %v8245_v6, 0  ;;  %vm3675_vm6 = vcmp.lt.s32.totalorder %v8245_v6, 0  ;;  %v8309_v5 = vadd.s32 248, %v7804_v3  ;;  %vm3580_vm13 = vcmp.ne.s32.totalorder %v2732_v36, 0 }
 0x140   :  { %vm3577_vm7 = vcmp.ne.s32.totalorder %v2699_v57, 0  ;;  %vm3673_vm8 = vcmp.lt.s32.totalorder %v2699_v57, 0  ;;  %v3865_v11 = vadd.s32 24, %v2699_v57  ;;  %v2775_v8 = vmul.u32 24, %v2774_v55  ;;  %vm8316_vm12 = vmand %vm3675_vm6, %vm3579_vm5 }
 0x141   :  { %v3868_v39 = vadd.s32 24, %v2732_v36  ;;  %vm8323_vm15 = vmand %vm3673_vm8, %vm3577_vm7  ;;  %v2798_v13 = vsub.s32 %v8158_v4, %v2797_v21  ;;  %v2807_v35 = vshrl.u32 %v8273_v16, 4  ;;  %v2785_v4 = vshrl.u32 %v8279_v23, 4 }
 0x142   :  { %vm3772_vm5 = vmand %vm3676_vm14, %vm3580_vm13  ;;  %v8349_v40 = vmul.u32.u64.low 2863311531, %v8309_v5  ;;  %v8350_v10 = vmul.u32.u64.high 2863311531, %v8309_v5, %v8349_v40  ;;  %v8355_v46 = vsel %vm8300_vm11, %v3864_v34, %v8205_v53  ;;  %v3871_v53 = vadd.s32 24, %v8288_v7 }
 0x143   :  { %6542 = vmatmul.mubr.bf16.gmra.mrb[80].mxu1 %v7762_v9  ;;  %vm8373_vm6 = vmand %vm3679_vm1, %vm3583_vm0  ;;  %vm3586_vm7 = vcmp.ne.s32.totalorder %v2798_v13, 0  ;;  %vm3682_vm8 = vcmp.lt.s32.totalorder %v2798_v13, 0  ;;  %v8381_v34 = vsel %vm8334_vm3, %v3870_v12, %v2754_v22  ;;  %v3874_v16 = vadd.s32 24, %v2798_v13 }
 0x144   :  { %6545 = vmatprep.mubr.bf16.mxu1 %v7764_v58  ;;  %6430 = vmatmul.mubr.bf16.gmra.mrb[80].mxu0 %v7762_v9  ;;  %v3867_v9 = vadd.s32 24, %v8245_v6  ;;  %v8394_v55 = vadd.s32 272, %v7804_v3  ;;  %v2808_v14 = vmul.u32 24, %v2807_v35  ;;  %v2786_v23 = vmul.u32 24, %v2785_v4  ;;  %vm3778_vm11 = vmand %vm3682_vm8, %vm3586_vm7 }
 0x145   :  { %6433 = vmatprep.mubr.bf16.mxu0 %v7764_v58  ;;  %v8291_v58 = vsub.s32 %v8131_v31, %v2742_v54  ;;  %v8305_v17 = vmul.u32.u64.low 2863311531, %v8282_v18  ;;  %v8306_v31 = vmul.u32.u64.high 2863311531, %v8282_v18, %v8305_v17  ;;  %v8403_v21 = vadd.s32 256, %v7804_v3 }
 0x146   :  { %v8360_v54 = vsel %vm8316_vm12, %v3867_v9, %v8245_v6  ;;  %v8417_v17 = vadd.s32 280, %v7804_v3  ;;  %v8422_v42 = vmul.u32.u64.low 2863311531, %v8394_v55  ;;  %v8423_v12 = vmul.u32.u64.high 2863311531, %v8394_v55, %v8422_v42 }
 0x147   :  { %vm3581_vm2 = vcmp.ne.s32.totalorder %v8291_v58, 0  ;;  %vm3677_vm4 = vcmp.lt.s32.totalorder %v8291_v58, 0  ;;  %v3869_v6 = vadd.s32 24, %v8291_v58  ;;  %v2840_v22 = vshrl.u32 %v8306_v31, 4 }
 0x148   :  { %vm8389_vm9 = vmand %vm3677_vm4, %vm3581_vm2  ;;  %v2818_v31 = vshrl.u32 %v8342_v0, 4  ;;  %v2787_v38 = vsub.s32 %v8258_v2, %v2786_v23  ;;  %v8436_v35 = vmul.u32.u64.low 2863311531, %v8403_v21  ;;  %v8437_v20 = vmul.u32.u64.high 2863311531, %v8403_v21, %v8436_v35 }
 0x149   :  { %v8414_v63 = vsel %vm8389_vm9, %v3869_v6, %v8291_v58  ;;  %v2809_v58 = vsub.s32 %v8248_v24, %v2808_v14  ;;  %v2841_v28 = vmul.u32 24, %v2840_v22  ;;  %v8440_v0 = vadd.s32 304, %v7804_v3 }
 0x14a   :  { %v8447_v4 = vadd.s32 288, %v7804_v3  ;;  %v8450_v24 = vadd.s32 312, %v7804_v3  ;;  %v2819_v2 = vmul.u32 24, %v2818_v31  ;;  %vm3585_vm0 = vcmp.ne.s32.totalorder %v2787_v38, 0 }
 0x14b   :  { %6546 = vmatmul.mubr.bf16.gmra.mrb[84].mxu1 %v7766_v29  ;;  %vm3587_vm14 = vcmp.ne.s32.totalorder %v2809_v58, 0  ;;  %vm3681_vm1 = vcmp.lt.s32.totalorder %v2787_v38, 0  ;;  %v3875_v31 = vadd.s32 24, %v2809_v58  ;;  %v3873_v42 = vadd.s32 24, %v2787_v38 }
 0x14c   :  { %6549 = vmatprep.mubr.bf16.mxu1 %v7770_v27  ;;  %6434 = vmatmul.mubr.bf16.gmra.mrb[84].mxu0 %v7766_v29  ;;  %v2776_v29 = vsub.s32 %v8172_v15, %v2775_v8  ;;  %v8367_v15 = vadd.s32 232, %v7804_v3  ;;  %v8469_v23 = vmul.u32.u64.low 2863311531, %v8447_v4  ;;  %v8470_v22 = vmul.u32.u64.high 2863311531, %v8447_v4, %v8469_v23 }
 0x14d   :  { %6437 = vmatprep.mubr.bf16.mxu0 %v7770_v27  ;;  %v8364_v27 = vsel %vm8323_vm15, %v3865_v11, %v2699_v57  ;;  %v8383_v57 = vsel %vm3772_vm5, %v3868_v39, %v2732_v36  ;;  %v8409_v11 = vsel %vm8373_vm6, %v3871_v53, %v8288_v7  ;;  %v8426_v7 = vadd.s32 264, %v7804_v3  ;;  %vm3777_vm5 = vmand %vm3681_vm1, %vm3585_vm0 }
 0x14e   :  { %vm3584_vm10 = vcmp.ne.s32.totalorder %v2776_v29, 0  ;;  %vm3680_vm12 = vcmp.lt.s32.totalorder %v2776_v29, 0  ;;  %v8399_v9 = vmul.u32.u64.low 2863311531, %v8367_v15  ;;  %v8400_v36 = vmul.u32.u64.high 2863311531, %v8367_v15, %v8399_v9 }
 0x14f   :  { %v3872_v8 = vadd.s32 24, %v2776_v29  ;;  %v8429_v39 = vsel %vm3778_vm11, %v3874_v16, %v2798_v13  ;;  %vm3776_vm13 = vmand %vm3680_vm12, %vm3584_vm10  ;;  %vm3683_vm15 = vcmp.lt.s32.totalorder %v2809_v58, 0  ;;  %v2842_v53 = vsub.s32 %v8282_v18, %v2841_v28 }
 0x150   :  { %10765 = vst [vmem:[#allocation24_spill] sm:$0xff] %v8429_v39  ;;  %v2829_v49 = vshrl.u32 %v8400_v36, 4  ;;  %v8462_v16 = vmul.u32.u64.low 2863311531, %v8440_v0  ;;  %v8463_v14 = vmul.u32.u64.high 2863311531, %v8440_v0, %v8462_v16  ;;  %v2820_v18 = vsub.s32 %v8294_v50, %v2819_v2  ;;  %vm8484_vm3 = vmand %vm3683_vm15, %vm3587_vm14 }
 0x151   :  { %v8452_v40 = vsel %vm3776_vm13, %v3872_v8, %v2776_v29  ;;  %v8466_v29 = vadd.s32 296, %v7804_v3  ;;  %v8473_v9 = vmul.u32.u64.low 2863311531, %v8450_v24  ;;  %v8474_v8 = vmul.u32.u64.high 2863311531, %v8450_v24, %v8473_v9 }
 0x152   :  { %10766 = vst [vmem:[#allocation25_spill] sm:$0xff] %v8452_v40  ;;  %v2884_v36 = vshrl.u32 %v8423_v12, 4  ;;  %vm3590_vm2 = vcmp.ne.s32.totalorder %v2842_v53, 0  ;;  %v8480_v28 = vadd.s32 336, %v7804_v3  ;;  %vm3686_vm4 = vcmp.lt.s32.totalorder %v2842_v53, 0 }
 0x153   :  { %6550 = vmatmul.mubr.bf16.gmra.mrb[88].mxu1 %v7774_v25  ;;  %v8490_v35 = vmul.u32.u64.low 2863311531, %v8466_v29  ;;  %v8491_v50 = vmul.u32.u64.high 2863311531, %v8466_v29, %v8490_v35  ;;  %v3878_v12 = vadd.s32 24, %v2842_v53  ;;  %v2830_v2 = vmul.u32 24, %v2829_v49  ;;  %vm3782_vm8 = vmand %vm3686_vm4, %vm3590_vm2 }
 0x154   :  { %6553 = vmatprep.mubr.bf16.mxu1 %v7780_v26  ;;  %6438 = vmatmul.mubr.bf16.gmra.mrb[88].mxu0 %v7774_v25  ;;  %v2851_v25 = vshrl.u32 %v8350_v10, 4  ;;  %v8455_v10 = vmul.u32.u64.low 2863311531, %v8426_v7  ;;  %v8456_v1 = vmul.u32.u64.high 2863311531, %v8426_v7, %v8455_v10  ;;  %vm3588_vm6 = vcmp.ne.s32.totalorder %v2820_v18, 0 }
 0x155   :  { %6441 = vmatprep.mubr.bf16.mxu0 %v7780_v26  ;;  %v8443_v26 = vmul.u32.u64.low 2863311531, %v8417_v17  ;;  %v8444_v13 = vmul.u32.u64.high 2863311531, %v8417_v17, %v8443_v26  ;;  %v2885_v16 = vmul.u32 24, %v2884_v36  ;;  %v8500_v9 = vadd.s32 320, %v7804_v3 }
 0x156   :  { %v2852_v6 = vmul.u32 24, %v2851_v25  ;;  %v2873_v23 = vshrl.u32 %v8456_v1, 4  ;;  %vm3684_vm7 = vcmp.lt.s32.totalorder %v2820_v18, 0  ;;  %v2906_v1 = vshrl.u32 %v8470_v22, 4 }
 0x157   :  { %v2895_v10 = vshrl.u32 %v8444_v13, 4  ;;  %v8504_v35 = vmul.u32.u64.low 2863311531, %v8480_v28  ;;  %v8505_v40 = vmul.u32.u64.high 2863311531, %v8480_v28, %v8504_v35  ;;  %v3876_v49 = vadd.s32 24, %v2820_v18  ;;  %vm3780_vm9 = vmand %vm3684_vm7, %vm3588_vm6 }
 0x158   :  { %v8495_v26 = vsub.s32 %v8309_v5, %v2852_v6  ;;  %v8509_v5 = vsel %vm8484_vm3, %v3875_v31, %v2809_v58  ;;  %v8511_v6 = vsel %vm3777_vm5, %v3873_v42, %v2787_v38  ;;  %v8517_v36 = vsub.s32 %v8367_v15, %v2830_v2 }
 0x159   :  { %10769 = vst [vmem:[#allocation26_spill] sm:$0xff] %v8511_v6  ;;  %v2939_v39 = vshrl.u32 %v8474_v8, 4  ;;  %v8522_v58 = vsub.s32 %v8394_v55, %v2885_v16  ;;  %v2874_v38 = vmul.u32 24, %v2873_v23  ;;  %v8528_v25 = vsel %vm3782_vm8, %v3878_v12, %v2842_v53 }
 0x15a   :  { %v8525_v31 = vmul.u32.u64.low 2863311531, %v8500_v9  ;;  %v8526_v42 = vmul.u32.u64.high 2863311531, %v8500_v9, %v8525_v31  ;;  %10770 = vst [vmem:[#allocation27_spill] sm:$0xff] %v8528_v25  ;;  %vm3591_vm10 = vcmp.ne.s32.totalorder %v8495_v26, 0  ;;  %v2917_v15 = vshrl.u32 %v8491_v50, 4 }
 0x15b   :  { %6554 = vmatmul.mubr.bf16.gmra.mrb[92].mxu1 %v7786_v19  ;;  %vm3687_vm11 = vcmp.lt.s32.totalorder %v8495_v26, 0  ;;  %v8534_v8 = vadd.s32 24, %v8495_v26  ;;  %v8539_v2 = vsel %vm3780_vm9, %v3876_v49, %v2820_v18  ;;  %vm3589_vm12 = vcmp.ne.s32.totalorder %v8517_v36, 0 }
 0x15c   :  { %6442 = vmatmul.mubr.bf16.gmra.mrb[92].mxu0 %v7786_v19  ;;  %v2862_v19 = vshrl.u32 %v8437_v20, 4  ;;  %v2928_v20 = vshrl.u32 %v8463_v14, 4  ;;  %v2896_v14 = vmul.u32 24, %v2895_v10  ;;  %10771 = vst [vmem:[#allocation28_spill] sm:$0xff] %v8539_v2  ;;  %v2940_v12 = vmul.u32 24, %v2939_v39  ;;  %vm8556_vm0 = vmand %vm3687_vm11, %vm3591_vm10 }
 0x15d   :  { %vm3685_vm13 = vcmp.lt.s32.totalorder %v8517_v36, 0  ;;  %v3877_v50 = vadd.s32 24, %v8517_v36  ;;  %vm3594_vm14 = vcmp.ne.s32.totalorder %v8522_v58, 0  ;;  %v2875_v10 = vsub.s32 %v8426_v7, %v2874_v38 }
 0x15e   :  { %v2863_v13 = vmul.u32 24, %v2862_v19  ;;  %v2929_v22 = vmul.u32 24, %v2928_v20  ;;  %v8543_v53 = vsub.s32 %v8417_v17, %v2896_v14  ;;  %vm3690_vm15 = vcmp.lt.s32.totalorder %v8522_v58, 0  ;;  %vm8566_vm3 = vmand %vm3685_vm13, %vm3589_vm12 }
 0x15f   :  { %v2907_v19 = vmul.u32 24, %v2906_v1  ;;  %v2918_v18 = vmul.u32 24, %v2917_v15  ;;  %v2972_v16 = vshrl.u32 %v8505_v40, 4  ;;  %v3882_v39 = vadd.s32 24, %v8522_v58  ;;  %vm8578_vm6 = vmand %vm3690_vm15, %vm3594_vm14 }
 0x160   :  { %v8537_v55 = vsub.s32 %v8403_v21, %v2863_v13  ;;  %v2930_v21 = vsub.s32 %v8440_v0, %v2929_v22  ;;  %vm3595_vm4 = vcmp.ne.s32.totalorder %v8543_v53, 0  ;;  %vm3691_vm5 = vcmp.lt.s32.totalorder %v8543_v53, 0  ;;  %v8692_v0 = vld [vmem:[#allocation13] ss:$0 sm:$0xff] }
 0x161   :  { %v2908_v7 = vsub.s32 %v8447_v4, %v2907_v19  ;;  %v2941_v40 = vsub.s32 %v8450_v24, %v2940_v12  ;;  %v8574_v23 = vadd.s32 344, %v7804_v3  ;;  %vm3593_vm7 = vcmp.ne.s32.totalorder %v2875_v10, 0  ;;  %vm8597_vm14 = vmand %vm3691_vm5, %vm3595_vm4 }
 0x162   :  { %vm3592_vm1 = vcmp.ne.s32.totalorder %v8537_v55, 0  ;;  %vm3688_vm2 = vcmp.lt.s32.totalorder %v8537_v55, 0  ;;  %v3880_v4 = vadd.s32 24, %v8537_v55  ;;  %vm3689_vm8 = vcmp.lt.s32.totalorder %v2875_v10, 0 }
 0x163   :  { %v2950_v35 = vshrl.u32 %v8526_v42, 4  ;;  %vm8588_vm11 = vmand %vm3688_vm2, %vm3592_vm1  ;;  %vm3598_vm12 = vcmp.ne.s32.totalorder %v2930_v21, 0  ;;  %vm3694_vm13 = vcmp.lt.s32.totalorder %v2930_v21, 0  ;;  %v2919_v13 = vsub.s32 %v8466_v29, %v2918_v18 }
 0x164   :  { %v2973_v1 = vmul.u32 24, %v2972_v16  ;;  %v10780_v49 = vmov 0  ;;  %v3883_v14 = vadd.s32 24, %v8543_v53  ;;  %v8603_v38 = vadd.s32 328, %v7804_v3  ;;  %vm8609_vm10 = vmand %vm3689_vm8, %vm3593_vm7 }
 0x165   :  { %v10781_v49 = vsel %vm8597_vm14, 4294967295, %v10780_v49  ;;  %v3881_v31 = vadd.s32 24, %v2875_v10  ;;  %v3886_v42 = vadd.s32 24, %v2930_v21  ;;  %vm3599_vm4 = vcmp.ne.s32.totalorder %v2941_v40, 0  ;;  %vm8617_vm14 = vmand %vm3694_vm13, %vm3598_vm12 }
 0x166   :  { %vm3695_vm5 = vcmp.lt.s32.totalorder %v2941_v40, 0  ;;  %vm4139_vm1 = vcmp.lt.s32.totalorder %v8037_v30, 17  ;;  %v3884_v15 = vadd.s32 24, %v2908_v7  ;;  %v2951_v19 = vmul.u32 24, %v2950_v35 }
 0x167   :  { %v8622_v12 = vmul.u32.u64.low 2863311531, %v8574_v23  ;;  %v8623_v18 = vmul.u32.u64.high 2863311531, %v8574_v23, %v8622_v12  ;;  %vm4041_vm7 = vcmp.ge.s32.totalorder %v8049_v41, 1  ;;  %vm4137_vm8 = vcmp.lt.s32.totalorder %v8049_v41, 17 }
 0x168   :  { %vm10786_vm2 = vcmp.ne.s32.totalorder %v2908_v7, 0  ;;  %vm10787_vm15 = vcmp.lt.s32.totalorder %v2908_v7, 0  ;;  %v3887_v2 = vadd.s32 24, %v2941_v40  ;;  %vm3597_vm12 = vcmp.ne.s32.totalorder %v2919_v13, 0 }
 0x169   :  { %vm8629_vm9 = vmand %vm10787_vm15, %vm10786_vm2  ;;  %vm3693_vm13 = vcmp.lt.s32.totalorder %v2919_v13, 0  ;;  %v8634_v25 = vsub.s32 %v8480_v28, %v2973_v1  ;;  %v8640_v35 = vsel %vm8556_vm0, %v8534_v8, %v8495_v26  ;;  %v8645_v12 = vsel %vm8566_vm3, %v3877_v50, %v8517_v36  ;;  %v8657_v1 = vld [vmem:[#allocation11] ss:$0 sm:$0xff] }
 0x16a   :  { %v8650_v6 = vsel %vm8578_vm6, %v3882_v39, %v8522_v58  ;;  %vm3791_vm15 = vmand %vm3695_vm5, %vm3599_vm4  ;;  %v8655_v28 = vadd.s32 368, %v7804_v3  ;;  %v8662_v26 = vsel %vm8588_vm11, %v3880_v4, %v8537_v55  ;;  %vm10790_vm0 = vnez %v10781_v49 }
 0x16b   :  { %v8667_v36 = vsel %vm10790_vm0, %v3883_v14, %v8543_v53  ;;  %v8671_v58 = vsel %vm8609_vm10, %v3881_v31, %v2875_v10  ;;  %v3885_v8 = vadd.s32 24, %v2919_v13  ;;  %v8675_v50 = vsel %vm8617_vm14, %v3886_v42, %v2930_v21  ;;  %vm8682_vm3 = vmand %vm3693_vm13, %vm3597_vm12 }
 0x16c   :  { %v8679_v17 = vsel %vm8629_vm9, %v3884_v15, %v2908_v7  ;;  %v8687_v53 = vsub.s32 %v8500_v9, %v2951_v19  ;;  %v8690_v10 = vadd.s32 352, %v7804_v3  ;;  %v8694_v21 = vsel %vm3791_vm15, %v3887_v2, %v2941_v40 }
 0x16d   :  { %10791 = vst [vmem:[#allocation29_spill] sm:$0xff] %v8679_v17  ;;  %10794 = vst [vmem:[#allocation30_spill] sm:$0xff] %v8694_v21  ;;  %vm3602_vm6 = vcmp.ne.s32.totalorder %v8634_v25, 0  ;;  %v8698_v7 = vmul.u32.u64.low 2863311531, %v8603_v38  ;;  %v8699_v20 = vmul.u32.u64.high 2863311531, %v8603_v38, %v8698_v7  ;;  %vm4046_vm9 = vcmp.ge.s32.totalorder %v8054_v60, 1 }
 0x16e   :  { %vm4142_vm10 = vcmp.lt.s32.totalorder %v8054_v60, 17  ;;  %vm3698_vm11 = vcmp.lt.s32.totalorder %v8634_v25, 0  ;;  %v8706_v9 = vmul.u32.u64.low 2863311531, %v8655_v28  ;;  %v8707_v49 = vmul.u32.u64.high 2863311531, %v8655_v28, %v8706_v9 }
 0x16f   :  { %vm4044_vm14 = vcmp.ge.s32.totalorder %v8059_v33, 1  ;;  %vm4140_vm2 = vcmp.lt.s32.totalorder %v8059_v33, 17  ;;  %v8714_v29 = vsel %vm8682_vm3, %v3885_v8, %v2919_v13  ;;  %v3890_v31 = vadd.s32 24, %v8634_v25 }
 0x170   :  { %10795 = vst [vmem:[#allocation31_spill] sm:$0xff] %v8714_v29  ;;  %v8718_v42 = vadd.s32 376, %v7804_v3  ;;  %vm10796_vm4 = vcmp.lt.s32.totalorder %v7907_v47, 17  ;;  %vm10797_vm5 = vcmp.ge.s32.totalorder %v7907_v47, 1  ;;  %vm3600_vm0 = vcmp.ne.s32.totalorder %v8687_v53, 0 }
 0x171   :  { %vm8725_vm12 = vmand %vm10797_vm5, %vm10796_vm4  ;;  %v2983_v8 = vshrl.u32 %v8623_v18, 4  ;;  %vm10802_vm13 = vcmp.lt.s32.totalorder %v7927_v62, 17  ;;  %vm10803_vm15 = vcmp.ge.s32.totalorder %v7927_v62, 1  ;;  %v3888_v21 = vadd.s32 24, %v8687_v53 }
 0x172   :  { %vm8742_vm5 = vmand %vm3698_vm11, %vm3602_vm6  ;;  %vm3696_vm6 = vcmp.lt.s32.totalorder %v8687_v53, 0  ;;  %vm10806_vm11 = vcmp.ge.s32.totalorder %v8037_v30, 1 }
 0x173   :  { %vm8754_vm3 = vmand %vm10803_vm15, %vm10802_vm13  ;;  %v8781_v30 = vsel %vm8742_vm5, %v3890_v31, %v8634_v25  ;;  %vm4049_vm5 = vcmp.ge.s32.totalorder %v8228_v61, 1 }
 0x174   :  { %vm8764_vm4 = vmand %vm10806_vm11, %vm4139_vm1  ;;  %vm4050_vm1 = vcmp.ge.s32.totalorder %v8091_v45, 1  ;;  %vm10818_vm11 = vcmp.ge.s32.totalorder %v8079_v37, 1 }
 0x175   :  { %vm8774_vm13 = vmand %vm4041_vm7, %vm4137_vm8  ;;  %vm4146_vm7 = vcmp.lt.s32.totalorder %v8091_v45, 17  ;;  %vm4048_vm8 = vcmp.ge.s32.totalorder %v8093_v56, 1 }
 0x176   :  { %v6463_v39 = vpop.f32.mrb[0].mxu1  ;;  %vm8811_vm15 = vmand %vm3696_vm6, %vm3600_vm0  ;;  %vm4145_vm6 = vcmp.lt.s32.totalorder %v8228_v61, 17 }
 0x177   :  { %v2016_v4 = vmul.f32 %v6463_v39, %v8657_v1  ;;  %v1624_v24 = vpop.f32.mrb[1].mxu1  ;;  %v6351_v14 = vpop.f32.mrb[0].mxu0  ;;  %vm8826_vm0 = vmand %vm4046_vm9, %vm4142_vm10  ;;  %vm10817_vm10 = vcmp.lt.s32.totalorder %v8079_v37, 17 }
 0x178   :  { %v2014_v2 = vmul.f32 %v8657_v1, %v1624_v24  ;;  %v6464_v40 = vpop.f32.mrb[2].mxu1  ;;  %v663_v13 = vpop.f32.mrb[1].mxu0  ;;  %vm8843_vm9 = vmand %vm4044_vm14, %vm4140_vm2  ;;  %vm10821_vm14 = vcmp.lt.s32.totalorder %v8087_v48, 17  ;;  %vm10822_vm2 = vcmp.ge.s32.totalorder %v8087_v48, 1 }
 0x179   :  { %v2119_v22 = vadd.f32 %v8692_v0, %v2016_v4  ;;  %v2017_v19 = vmul.f32 %v6464_v40, %v8657_v1  ;;  %v1627_v16 = vpop.f32.mrb[3].mxu1  ;;  %v6352_v39 = vpop.f32.mrb[2].mxu0  ;;  %v8747_v4 = vmul.u32.u64.low 2863311531, %v8690_v10  ;;  %v8748_v18 = vmul.u32.u64.high 2863311531, %v8690_v10, %v8747_v4 }
 0x17a   :  { %v2117_v55 = vadd.f32 %v8692_v0, %v2014_v2  ;;  %v2015_v47 = vmul.f32 %v8657_v1, %v1627_v16  ;;  %v5655_v40 = vpack.c.bf16 %v6352_v39, %v6351_v14  ;;  %v666_v16 = vpop.f32.mrb[3].mxu0  ;;  %v2961_v39 = vshrl.u32 %v8699_v20, 4 }
 0x17b   :  { %v2215_v24 = vmax.f32 %v2119_v22, 0.0  ;;  %v2120_v2 = vadd.f32 %v8692_v0, %v2017_v19  ;;  %v5650_v4 = vpack.c.bf16 %v666_v16, %v663_v13  ;;  %v2984_v19 = vmul.u32 24, %v2983_v8 }
 0x17c   :  { %v2213_v29 = vmax.f32 %v2117_v55, 0.0  ;;  %v2118_v62 = vadd.f32 %v8692_v0, %v2015_v47  ;;  %6127 = vst [vmem:[#allocation14 + $0x8] sm:$0xff] %v5655_v40   ;;  %v8784_v13 = vadd.s32 360, %v7804_v3  ;;  %v3016_v20 = vshrl.u32 %v8707_v49, 4 }
 0x17d   :  { %v2216_v17 = vmax.f32 %v2120_v2, 0.0  ;;  %5651 = vst [vmem:[#allocation14] sm:$0xff] %v5650_v4   ;;  %v8788_v41 = vmul.u32.u64.low 2863311531, %v8718_v42  ;;  %v8789_v2 = vmul.u32.u64.high 2863311531, %v8718_v42, %v8788_v41  ;;  %v4522_v40 = vsel %vm8725_vm12, %v2215_v24, 0.0 }
 0x17e   :  { %v2214_v55 = vmax.f32 %v2118_v62, 0.0  ;;  %v6467_v47 = vpop.f32.mrb[4].mxu1  ;;  %v4520_v7 = vsel %vm8754_vm3, %v2213_v29, 0.0  ;;  %vm4144_vm12 = vcmp.lt.s32.totalorder %v8093_v56, 17  ;;  %vm4051_vm3 = vcmp.ge.s32.totalorder %v8223_v44, 1 }
 0x17f   :  { %v4523_v25 = vsel %vm8764_vm4, %v2216_v17, 0.0  ;;  %v2020_v31 = vmul.f32 %v6467_v47, %v8657_v1  ;;  %v1640_v8 = vpop.f32.mrb[5].mxu1  ;;  %v6355_v17 = vpop.f32.mrb[4].mxu0  ;;  %vm4147_vm4 = vcmp.lt.s32.totalorder %v8223_v44, 17  ;;  %v2962_v37 = vmul.u32 24, %v2961_v39 }
 0x180   :  { %v5895_v16 = vpack.c.bf16 %v4523_v25, %v4522_v40  ;;  %v4521_v15 = vsel %vm8774_vm13, %v2214_v55, 0.0  ;;  %v2018_v24 = vmul.f32 %v8657_v1, %v1640_v8  ;;  %v6468_v22 = vpop.f32.mrb[6].mxu1  ;;  %v679_v14 = vpop.f32.mrb[5].mxu0  ;;  %v8820_v55 = vsub.s32 %v8574_v23, %v2984_v19  ;;  %vm8857_vm13 = vmand %vm10818_vm11, %vm10817_vm10 }
 0x181   :  { %v5890_v29 = vpack.c.bf16 %v4521_v15, %v4520_v7  ;;  %v2123_v9 = vadd.f32 %v8692_v0, %v2020_v31  ;;  %v2021_v62 = vmul.f32 %v6468_v22, %v8657_v1  ;;  %v1643_v4 = vpop.f32.mrb[7].mxu1  ;;  %v6356_v25 = vpop.f32.mrb[6].mxu0  ;;  %v8851_v15 = vsel %vm8811_vm15, %v3888_v21, %v8687_v53  ;;  %vm8869_vm15 = vmand %vm10822_vm2, %vm10821_vm14 }
 0x182   :  { %6174 = vst [vmem:[#allocation15 + $0x8] sm:$0xff] %v5895_v16   ;;  %v2121_v41 = vadd.f32 %v8692_v0, %v2018_v24  ;;  %v2019_v40 = vmul.f32 %v8657_v1, %v1643_v4  ;;  %v8835_v23 = vmul.u32.u64.low 2863311531, %v8784_v13  ;;  %v8836_v19 = vmul.u32.u64.high 2863311531, %v8784_v13, %v8835_v23  ;;  %v682_v16 = vpop.f32.mrb[7].mxu0 }
 0x183   :  { %5891 = vst [vmem:[#allocation15] sm:$0xff] %v5890_v29   ;;  %v2219_v60 = vmax.f32 %v2123_v9, 0.0  ;;  %v2124_v8 = vadd.f32 %v8692_v0, %v2021_v62  ;;  %v5665_v7 = vpack.c.bf16 %v6356_v25, %v6355_v17  ;;  %v5660_v29 = vpack.c.bf16 %v682_v16, %v679_v14 }
 0x184   :  { %v2217_v24 = vmax.f32 %v2121_v41, 0.0  ;;  %v2122_v22 = vadd.f32 %v8692_v0, %v2019_v40  ;;  %v8863_v17 = vadd.s32 400, %v7804_v3  ;;  %v3017_v21 = vmul.u32 24, %v3016_v20 }
 0x185   :  { %v2220_v9 = vmax.f32 %v2124_v8, 0.0  ;;  %6129 = vst [vmem:[#allocation14 + $0x18] sm:$0xff] %v5665_v7   ;;  %v2994_v49 = vshrl.u32 %v8748_v18, 4  ;;  %6128 = vst [vmem:[#allocation14 + $0x10] sm:$0xff] %v5660_v29   ;;  %vm3603_vm10 = vcmp.ne.s32.totalorder %v8820_v55, 0  ;;  %v8876_v14 = vadd.s32 384, %v7804_v3 }
 0x186   :  { %v2218_v62 = vmax.f32 %v2122_v22, 0.0  ;;  %v6471_v4 = vpop.f32.mrb[8].mxu1  ;;  %v8879_v41 = vadd.s32 408, %v7804_v3  ;;  %v4526_v48 = vsel %vm8826_vm0, %v2219_v60, 0.0  ;;  %vm4150_vm14 = vcmp.lt.s32.totalorder %v8236_v52, 17 }
 0x187   :  { %v4527_v39 = vsel %vm8857_vm13, %v2220_v9, 0.0  ;;  %v2024_v20 = vmul.f32 %v6471_v4, %v8657_v1  ;;  %v1656_v18 = vpop.f32.mrb[9].mxu1  ;;  %vm3699_vm2 = vcmp.lt.s32.totalorder %v8820_v55, 0  ;;  %v4524_v40 = vsel %vm8843_vm9, %v2217_v24, 0.0  ;;  %v6359_v8 = vpop.f32.mrb[8].mxu0 }
 0x188   :  { %v5905_v25 = vpack.c.bf16 %v4527_v39, %v4526_v48  ;;  %v4525_v47 = vsel %vm8869_vm15, %v2218_v62, 0.0  ;;  %v2022_v23 = vmul.f32 %v8657_v1, %v1656_v18  ;;  %v6472_v60 = vpop.f32.mrb[10].mxu1  ;;  %vm4052_vm0 = vcmp.ge.s32.totalorder %v8242_v59, 1  ;;  %v695_v31 = vpop.f32.mrb[9].mxu0  ;;  %vm8907_vm15 = vmand %vm4050_vm1, %vm4146_vm7 }
 0x189   :  { %vm4148_vm13 = vcmp.lt.s32.totalorder %v8242_v59, 17  ;;  %v5900_v7 = vpack.c.bf16 %v4525_v47, %v4524_v40  ;;  %v2127_v16 = vadd.f32 %v8692_v0, %v2024_v20  ;;  %v2025_v33 = vmul.f32 %v6472_v60, %v8657_v1  ;;  %v1659_v22 = vpop.f32.mrb[11].mxu1  ;;  %v6360_v62 = vpop.f32.mrb[10].mxu0  ;;  %vm8923_vm1 = vmand %vm4048_vm8, %vm4144_vm12 }
 0x18a   :  { %v8901_v24 = vsub.s32 %v8603_v38, %v2962_v37  ;;  %6176 = vst [vmem:[#allocation15 + $0x18] sm:$0xff] %v5905_v25   ;;  %v2125_v9 = vadd.f32 %v8692_v0, %v2022_v23  ;;  %v2023_v53 = vmul.f32 %v8657_v1, %v1659_v22  ;;  %v3891_v38 = vadd.s32 24, %v8820_v55  ;;  %v698_v20 = vpop.f32.mrb[11].mxu0  ;;  %vm8932_vm7 = vmand %vm4051_vm3, %vm4147_vm4 }
 0x18b   :  { %v8917_v37 = vsub.s32 %v8655_v28, %v3017_v21  ;;  %6175 = vst [vmem:[#allocation15 + $0x10] sm:$0xff] %v5900_v7   ;;  %v2223_v45 = vmax.f32 %v2127_v16, 0.0  ;;  %v2128_v48 = vadd.f32 %v8692_v0, %v2025_v33  ;;  %v5675_v39 = vpack.c.bf16 %v6360_v62, %v6359_v8  ;;  %vm8942_vm8 = vmand %vm4049_vm5, %vm4145_vm6 }
 0x18c   :  { %v2995_v18 = vmul.u32 24, %v2994_v49  ;;  %v2221_v40 = vmax.f32 %v2125_v9, 0.0  ;;  %v2126_v56 = vadd.f32 %v8692_v0, %v2023_v53  ;;  %v5670_v21 = vpack.c.bf16 %v698_v20, %v695_v31  ;;  %vm8963_vm11 = vmand %vm3699_vm2, %vm3603_vm10 }
 0x18d   :  { %v3027_v25 = vshrl.u32 %v8789_v2, 4  ;;  %v2224_v47 = vmax.f32 %v2128_v48, 0.0  ;;  %6131 = vst [vmem:[#allocation14 + $0x28] sm:$0xff] %v5675_v39   ;;  %vm3601_vm12 = vcmp.ne.s32.totalorder %v8901_v24, 0  ;;  %vm3697_vm3 = vcmp.lt.s32.totalorder %v8901_v24, 0 }
 0x18e   :  { %v3889_v44 = vadd.s32 24, %v8901_v24  ;;  %v2222_v23 = vmax.f32 %v2126_v56, 0.0  ;;  %6130 = vst [vmem:[#allocation14 + $0x20] sm:$0xff] %v5670_v21   ;;  %v6475_v60 = vpop.f32.mrb[12].mxu1  ;;  %vm3606_vm4 = vcmp.ne.s32.totalorder %v8917_v37, 0  ;;  %vm3702_vm9 = vcmp.lt.s32.totalorder %v8917_v37, 0  ;;  %vm8981_vm2 = vmand %vm3697_vm3, %vm3601_vm12 }
 0x18f   :  { %v3894_v61 = vadd.s32 24, %v8917_v37  ;;  %v4530_v2 = vsel %vm8907_vm15, %v2223_v45, 0.0  ;;  %v4531_v8 = vsel %vm8932_vm7, %v2224_v47, 0.0  ;;  %v2028_v7 = vmul.f32 %v6475_v60, %v8657_v1  ;;  %v1672_v16 = vpop.f32.mrb[13].mxu1  ;;  %v6363_v45 = vpop.f32.mrb[12].mxu0 }
 0x190   :  { %vm4058_vm5 = vcmp.ge.s32.totalorder %v8265_v32, 1  ;;  %vm4154_vm6 = vcmp.lt.s32.totalorder %v8265_v32, 17  ;;  %v8968_v22 = vsub.s32 %v8690_v10, %v2995_v18  ;;  %v4528_v31 = vsel %vm8923_vm1, %v2221_v40, 0.0  ;;  %v6476_v62 = vpop.f32.mrb[14].mxu1  ;;  %v711_v18 = vpop.f32.mrb[13].mxu0 }
 0x191   :  { %v5915_v29 = vpack.c.bf16 %v4531_v8, %v4530_v2  ;;  %v4529_v9 = vsel %vm8942_vm8, %v2222_v23, 0.0  ;;  %v2026_v53 = vmul.f32 %v8657_v1, %v1672_v16  ;;  %vm4056_vm15 = vcmp.ge.s32.totalorder %v8355_v46, 1  ;;  %v1675_v20 = vpop.f32.mrb[15].mxu1  ;;  %vm8993_vm8 = vmand %vm3702_vm9, %vm3606_vm4  ;;  %v6364_v49 = vpop.f32.mrb[14].mxu0 }
 0x192   :  { %vm4152_vm10 = vcmp.lt.s32.totalorder %v8355_v46, 17  ;;  %v5910_v4 = vpack.c.bf16 %v4529_v9, %v4528_v31  ;;  %v2131_v48 = vadd.f32 %v8692_v0, %v2028_v7  ;;  %v2029_v39 = vmul.f32 %v6476_v62, %v8657_v1  ;;  %v714_v7 = vpop.f32.mrb[15].mxu0 }
 0x193   :  { %vm4155_vm7 = vcmp.lt.s32.totalorder %v8360_v54, 17  ;;  %v3005_v28 = vshrl.u32 %v8836_v19, 4  ;;  %6178 = vst [vmem:[#allocation15 + $0x28] sm:$0xff] %v5915_v29   ;;  %vm10839_vm12 = vcmp.ge.s32.totalorder %v8236_v52, 1  ;;  %v2129_v21 = vadd.f32 %v8692_v0, %v2026_v53 }
 0x194   :  { %vm9002_vm3 = vmand %vm10839_vm12, %vm4150_vm14  ;;  %v2027_v47 = vmul.f32 %v8657_v1, %v1675_v20  ;;  %v9013_v19 = vsel %vm8963_vm11, %v3891_v38, %v8820_v55  ;;  %v3028_v23 = vmul.u32 24, %v3027_v25  ;;  %6177 = vst [vmem:[#allocation15 + $0x20] sm:$0xff] %v5910_v4   ;;  %v2227_v52 = vmax.f32 %v2131_v48, 0.0 }
 0x195   :  { %vm9019_vm14 = vmand %vm4052_vm0, %vm4148_vm13  ;;  %v2132_v2 = vadd.f32 %v8692_v0, %v2029_v39  ;;  %v5685_v8 = vpack.c.bf16 %v6364_v49, %v6363_v45  ;;  %v9027_v55 = vsel %vm8981_vm2, %v3889_v44, %v8901_v24  ;;  %v2225_v38 = vmax.f32 %v2129_v21, 0.0 }
 0x196   :  { %vm10844_vm11 = vcmp.lt.s32.totalorder %v8252_v51, 17  ;;  %vm10845_vm12 = vcmp.ge.s32.totalorder %v8252_v51, 1  ;;  %v2130_v25 = vadd.f32 %v8692_v0, %v2027_v47  ;;  %v5680_v16 = vpack.c.bf16 %v714_v7, %v711_v18 }
 0x197   :  { %vm9033_vm9 = vmand %vm10845_vm12, %vm10844_vm11  ;;  %v9041_v33 = vsel %vm8993_vm8, %v3894_v61, %v8917_v37  ;;  %v2228_v31 = vmax.f32 %v2132_v2, 0.0  ;;  %vm10848_vm0 = vcmp.lt.s32.totalorder %v8254_v43, 17  ;;  %vm10849_vm13 = vcmp.ge.s32.totalorder %v8254_v43, 1  ;;  %6133 = vst [vmem:[#allocation14 + $0x38] sm:$0xff] %v5685_v8   ;;  %v6479_v43 = vpop.f32.mrb[16].mxu1  ;;  %v6367_v18 = vpop.f32.mrb[16].mxu0 }
 0x198   :  { %vm9047_vm2 = vmand %vm10849_vm13, %vm10848_vm0  ;;  %vm4062_vm11 = vcmp.ge.s32.totalorder %v8381_v34, 1  ;;  %vm4158_vm12 = vcmp.lt.s32.totalorder %v8381_v34, 17  ;;  %vm3604_vm4 = vcmp.ne.s32.totalorder %v8968_v22, 0  ;;  %vm3700_vm1 = vcmp.lt.s32.totalorder %v8968_v22, 0  ;;  %6132 = vst [vmem:[#allocation14 + $0x30] sm:$0xff] %v5680_v16   ;;  %v1688_v62 = vpop.f32.mrb[17].mxu1 }
 0x199   :  { %v3006_v51 = vmul.u32 24, %v3005_v28  ;;  %v4534_v37 = vsel %vm9002_vm3, %v2227_v52, 0.0  ;;  %v2226_v44 = vmax.f32 %v2130_v25, 0.0  ;;  %v3892_v61 = vadd.s32 24, %v8968_v22  ;;  %v6480_v20 = vpop.f32.mrb[18].mxu1  ;;  %v727_v49 = vpop.f32.mrb[17].mxu0 }
 0x19a   :  { %v9059_v29 = vsub.s32 %v8718_v42, %v3028_v23  ;;  %v4535_v9 = vsel %vm9033_vm9, %v2228_v31, 0.0  ;;  %v2032_v53 = vmul.f32 %v6479_v43, %v8657_v1  ;;  %v4532_v4 = vsel %vm9019_vm14, %v2225_v38, 0.0  ;;  %vm9079_vm9 = vmand %vm3700_vm1, %vm3604_vm4  ;;  %v1691_v47 = vpop.f32.mrb[19].mxu1  ;;  %v6368_v8 = vpop.f32.mrb[18].mxu0 }
 0x19b   :  { %v9065_v45 = vmul.u32.u64.low 2863311531, %v8863_v17  ;;  %v9066_v10 = vmul.u32.u64.high 2863311531, %v8863_v17, %v9065_v45  ;;  %v5925_v48 = vpack.c.bf16 %v4535_v9, %v4534_v37  ;;  %v4533_v39 = vsel %vm9047_vm2, %v2226_v44, 0.0  ;;  %vm9094_vm1 = vmand %vm4058_vm5, %vm4154_vm6  ;;  %v730_v16 = vpop.f32.mrb[19].mxu0 }
 0x19c   :  { %v2030_v42 = vmul.f32 %v8657_v1, %v1688_v62  ;;  %vm4060_vm8 = vcmp.ge.s32.totalorder %v8383_v57, 1  ;;  %vm4156_vm3 = vcmp.lt.s32.totalorder %v8383_v57, 17  ;;  %v5920_v28 = vpack.c.bf16 %v4533_v39, %v4532_v4  ;;  %vm9110_vm5 = vmand %vm4056_vm15, %vm4152_vm10 }
 0x19d   :  { %v2135_v56 = vadd.f32 %v8692_v0, %v2032_v53  ;;  %v2033_v21 = vmul.f32 %v6480_v20, %v8657_v1  ;;  %vm4063_vm14 = vcmp.ge.s32.totalorder %v8409_v11, 1  ;;  %vm4159_vm0 = vcmp.lt.s32.totalorder %v8409_v11, 17  ;;  %6180 = vst [vmem:[#allocation15 + $0x38] sm:$0xff] %v5925_v48   ;;  %v10865_v48 = vld [vmem:[#allocation24_spill] sm:$0xff]  ;;  %v10882_v11 = vld [vmem:[#allocation27_spill] sm:$0xff] }
 0x19e   :  { %v9088_v23 = vsub.s32 %v8784_v13, %v3006_v51  ;;  %v2133_v60 = vadd.f32 %v8692_v0, %v2030_v42  ;;  %v2031_v2 = vmul.f32 %v8657_v1, %v1691_v47  ;;  %6179 = vst [vmem:[#allocation15 + $0x30] sm:$0xff] %v5920_v28   ;;  %v5695_v25 = vpack.c.bf16 %v6368_v8, %v6367_v18  ;;  %v6483_v9 = vpop.f32.mrb[20].mxu1 }
 0x19f   :  { %v9103_v13 = vmul.u32.u64.low 2863311531, %v8876_v14  ;;  %v9104_v7 = vmul.u32.u64.high 2863311531, %v8876_v14, %v9103_v13  ;;  %v2231_v38 = vmax.f32 %v2135_v56, 0.0  ;;  %v2136_v59 = vadd.f32 %v8692_v0, %v2033_v21  ;;  %v1704_v4 = vpop.f32.mrb[21].mxu1  ;;  %v6371_v21 = vpop.f32.mrb[20].mxu0 }
 0x1a0   :  { %v9118_v31 = vsel %vm9079_vm9, %v3892_v61, %v8968_v22  ;;  %v2229_v24 = vmax.f32 %v2133_v60, 0.0  ;;  %vm10858_vm6 = vcmp.ge.s32.totalorder %v8360_v54, 1  ;;  %v2134_v51 = vadd.f32 %v8692_v0, %v2031_v2  ;;  %6135 = vst [vmem:[#allocation14 + $0x48] sm:$0xff] %v5695_v25   ;;  %v6484_v56 = vpop.f32.mrb[22].mxu1  ;;  %v743_v2 = vpop.f32.mrb[21].mxu0 }
 0x1a1   :  { %vm9124_vm2 = vmand %vm10858_vm6, %vm4155_vm7  ;;  %v5690_v37 = vpack.c.bf16 %v730_v16, %v727_v49  ;;  %v9130_v44 = vadd.s32 392, %v7804_v3  ;;  %v2232_v43 = vmax.f32 %v2136_v59, 0.0  ;;  %vm10861_vm15 = vcmp.lt.s32.totalorder %v8364_v27, 17  ;;  %v1707_v60 = vpop.f32.mrb[23].mxu1  ;;  %v6372_v32 = vpop.f32.mrb[22].mxu0  ;;  %v10871_v59 = vld [vmem:[#allocation26_spill] sm:$0xff] }
 0x1a2   :  { %vm10862_vm10 = vcmp.ge.s32.totalorder %v8364_v27, 1  ;;  %vm3607_vm7 = vcmp.ne.s32.totalorder %v9059_v29, 0  ;;  %vm3703_vm6 = vcmp.lt.s32.totalorder %v9059_v29, 0  ;;  %v9143_v54 = vadd.s32 432, %v7804_v3  ;;  %v746_v22 = vpop.f32.mrb[23].mxu0 }
 0x1a3   :  { %vm9136_vm9 = vmand %vm10862_vm10, %vm10861_vm15  ;;  %v2230_v61 = vmax.f32 %v2134_v51, 0.0  ;;  %6134 = vst [vmem:[#allocation14 + $0x40] sm:$0xff] %v5690_v37   ;;  %v3895_v53 = vadd.s32 24, %v9059_v29  ;;  %vm3605_vm4 = vcmp.ne.s32.totalorder %v9088_v23, 0  ;;  %vm3701_vm15 = vcmp.lt.s32.totalorder %v9088_v23, 0 }
 0x1a4   :  { %v4538_v27 = vsel %vm9094_vm1, %v2231_v38, 0.0  ;;  %v4539_v62 = vsel %vm9124_vm2, %v2232_v43, 0.0  ;;  %v2036_v45 = vmul.f32 %v6483_v9, %v8657_v1  ;;  %vm4066_vm10 = vcmp.ge.s32.totalorder %v10865_v48, 1  ;;  %vm9164_vm1 = vmand %vm4062_vm11, %vm4158_vm12 }
 0x1a5   :  { %vm4162_vm13 = vcmp.lt.s32.totalorder %v10865_v48, 17  ;;  %v3060_v39 = vshrl.u32 %v9066_v10, 4  ;;  %v4536_v42 = vsel %vm9110_vm5, %v2229_v24, 0.0  ;;  %v5935_v20 = vpack.c.bf16 %v4539_v62, %v4538_v27  ;;  %v10868_v10 = vld [vmem:[#allocation25_spill] sm:$0xff] }
 0x1a6   :  { %v4537_v18 = vsel %vm9136_vm9, %v2230_v61, 0.0  ;;  %v2034_v28 = vmul.f32 %v8657_v1, %v1704_v4  ;;  %vm4064_vm2 = vcmp.ge.s32.totalorder %v10868_v10, 1  ;;  %vm4160_vm5 = vcmp.lt.s32.totalorder %v10868_v10, 17  ;;  %vm9179_vm9 = vmand %vm3703_vm6, %vm3607_vm7 }
 0x1a7   :  { %v5930_v47 = vpack.c.bf16 %v4537_v18, %v4536_v42  ;;  %v2139_v49 = vadd.f32 %v8692_v0, %v2036_v45  ;;  %v2037_v52 = vmul.f32 %v6484_v56, %v8657_v1  ;;  %v3893_v8 = vadd.s32 24, %v9088_v23  ;;  %6182 = vst [vmem:[#allocation15 + $0x48] sm:$0xff] %v5935_v20   ;;  %vm9192_vm7 = vmand %vm3701_vm15, %vm3605_vm4  ;;  %v6487_v42 = vpop.f32.mrb[24].mxu1  ;;  %v10883_v20 = vld [vmem:[#allocation28_spill] sm:$0xff] }
 0x1a8   :  { %v2137_v13 = vadd.f32 %v8692_v0, %v2034_v28  ;;  %v2035_v38 = vmul.f32 %v8657_v1, %v1707_v60  ;;  %vm4065_vm11 = vcmp.ge.s32.totalorder %v10871_v59, 1  ;;  %vm4161_vm12 = vcmp.lt.s32.totalorder %v10871_v59, 17  ;;  %vm9204_vm6 = vmand %vm4060_vm8, %vm4156_vm3 }
 0x1a9   :  { %v3038_v16 = vshrl.u32 %v9104_v7, 4  ;;  %v9198_v24 = vadd.s32 416, %v7804_v3  ;;  %6181 = vst [vmem:[#allocation15 + $0x40] sm:$0xff] %v5930_v47   ;;  %v2235_v46 = vmax.f32 %v2139_v49, 0.0  ;;  %v2140_v37 = vadd.f32 %v8692_v0, %v2037_v52  ;;  %vm9213_vm4 = vmand %vm4063_vm14, %vm4159_vm0  ;;  %v1720_v49 = vpop.f32.mrb[25].mxu1 }
 0x1aa   :  { %v5705_v43 = vpack.c.bf16 %v6372_v32, %v6371_v21  ;;  %v3061_v61 = vmul.u32 24, %v3060_v39  ;;  %v2233_v9 = vmax.f32 %v2137_v13, 0.0  ;;  %v2138_v57 = vadd.f32 %v8692_v0, %v2035_v38  ;;  %v6488_v40 = vpop.f32.mrb[26].mxu1  ;;  %v6375_v13 = vpop.f32.mrb[24].mxu0 }
 0x1ab   :  { %v5700_v27 = vpack.c.bf16 %v746_v22, %v743_v2  ;;  %v9221_v62 = vsel %vm9179_vm9, %v3895_v53, %v9059_v29  ;;  %v2236_v45 = vmax.f32 %v2140_v37, 0.0  ;;  %vm10878_vm8 = vcmp.lt.s32.totalorder %v8414_v63, 17 }
 0x1ac   :  { %vm10879_vm3 = vcmp.ge.s32.totalorder %v8414_v63, 1  ;;  %6137 = vst [vmem:[#allocation14 + $0x58] sm:$0xff] %v5705_v43   ;;  %vm4070_vm14 = vcmp.ge.s32.totalorder %v10882_v11, 1  ;;  %vm4166_vm0 = vcmp.lt.s32.totalorder %v10882_v11, 17  ;;  %v9236_v39 = vsel %vm9192_vm7, %v3893_v8, %v9088_v23 }
 0x1ad   :  { %vm9227_vm15 = vmand %vm10879_vm3, %vm10878_vm8  ;;  %v9239_v29 = vadd.s32 440, %v7804_v3  ;;  %v9242_v53 = vadd.s32 424, %v7804_v3  ;;  %v2234_v63 = vmax.f32 %v2138_v57, 0.0  ;;  %6136 = vst [vmem:[#allocation14 + $0x50] sm:$0xff] %v5700_v27   ;;  %vm4068_vm9 = vcmp.ge.s32.totalorder %v10883_v20, 1 }
 0x1ae   :  { %vm4164_vm8 = vcmp.lt.s32.totalorder %v10883_v20, 17  ;;  %v3039_v18 = vmul.u32 24, %v3038_v16  ;;  %v9247_v28 = vadd.s32 464, %v7804_v3  ;;  %v9250_v23 = vadd.s32 448, %v7804_v3  ;;  %v1723_v16 = vpop.f32.mrb[27].mxu1 }
 0x1af   :  { %v4542_v56 = vsel %vm9164_vm1, %v2235_v46, 0.0  ;;  %v4543_v21 = vsel %vm9213_vm4, %v2236_v45, 0.0  ;;  %v2040_v47 = vmul.f32 %v6487_v42, %v8657_v1  ;;  %v9258_v52 = vsub.s32 %v8863_v17, %v3061_v61  ;;  %v759_v46 = vpop.f32.mrb[25].mxu0 }
 0x1b0   :  { %v4540_v60 = vsel %vm9204_vm6, %v2233_v9, 0.0  ;;  %v5945_v2 = vpack.c.bf16 %v4543_v21, %v4542_v56  ;;  %v4541_v34 = vsel %vm9227_vm15, %v2234_v63, 0.0  ;;  %v2038_v8 = vmul.f32 %v8657_v1, %v1720_v49  ;;  %vm9276_vm6 = vmand %vm4066_vm10, %vm4162_vm13  ;;  %v6376_v22 = vpop.f32.mrb[26].mxu0  ;;  %v6491_v49 = vpop.f32.mrb[28].mxu1 }
 0x1b1   :  { %v5940_v38 = vpack.c.bf16 %v4541_v34, %v4540_v60  ;;  %v2143_v32 = vadd.f32 %v8692_v0, %v2040_v47  ;;  %v2041_v25 = vmul.f32 %v6488_v40, %v8657_v1  ;;  %vm4071_vm1 = vcmp.ge.s32.totalorder %v8640_v35, 1  ;;  %vm9294_vm13 = vmand %vm4064_vm2, %vm4160_vm5  ;;  %v762_v45 = vpop.f32.mrb[27].mxu0 }
 0x1b2   :  { %vm4167_vm7 = vcmp.lt.s32.totalorder %v8640_v35, 17  ;;  %v9270_v17 = vadd.s32 472, %v7804_v3  ;;  %6184 = vst [vmem:[#allocation15 + $0x58] sm:$0xff] %v5945_v2   ;;  %v2141_v37 = vadd.f32 %v8692_v0, %v2038_v8  ;;  %v2039_v43 = vmul.f32 %v8657_v1, %v1723_v16  ;;  %vm9310_vm5 = vmand %vm4065_vm11, %vm4161_vm12  ;;  %v1736_v2 = vpop.f32.mrb[29].mxu1 }
 0x1b3   :  { %v9285_v61 = vsub.s32 %v8876_v14, %v3039_v18  ;;  %v9288_v9 = vadd.s32 456, %v7804_v3  ;;  %6183 = vst [vmem:[#allocation15 + $0x50] sm:$0xff] %v5940_v38   ;;  %v2239_v48 = vmax.f32 %v2143_v32, 0.0  ;;  %v2144_v57 = vadd.f32 %v8692_v0, %v2041_v25  ;;  %v6492_v16 = vpop.f32.mrb[30].mxu1 }
 0x1b4   :  { %v5715_v27 = vpack.c.bf16 %v6376_v22, %v6375_v13  ;;  %vm3610_vm10 = vcmp.ne.s32.totalorder %v9258_v52, 0  ;;  %v2237_v14 = vmax.f32 %v2141_v37, 0.0  ;;  %vm10888_vm15 = vcmp.lt.s32.totalorder %v8509_v5, 17  ;;  %v1739_v22 = vpop.f32.mrb[31].mxu1 }
 0x1b5   :  { %vm10889_vm4 = vcmp.ge.s32.totalorder %v8509_v5, 1  ;;  %v2142_v4 = vadd.f32 %v8692_v0, %v2039_v43  ;;  %v5710_v63 = vpack.c.bf16 %v762_v45, %v759_v46  ;;  %vm3706_vm2 = vcmp.lt.s32.totalorder %v9258_v52, 0  ;;  %v6379_v46 = vpop.f32.mrb[28].mxu0 }
 0x1b6   :  { %vm4259_vm3 = vmand %vm10889_vm4, %vm10888_vm15  ;;  %v2240_v10 = vmax.f32 %v2144_v57, 0.0  ;;  %6139 = vst [vmem:[#allocation14 + $0x68] sm:$0xff] %v5715_v27   ;;  %v3898_v18 = vadd.s32 24, %v9258_v52  ;;  %v9316_v5 = vmul.u32.u64.low 2863311531, %v8879_v41  ;;  %v9317_v56 = vmul.u32.u64.high 2863311531, %v8879_v41, %v9316_v5 }
 0x1b7   :  { %v4546_v21 = vsel %vm9276_vm6, %v2239_v48, 0.0  ;;  %v2238_v47 = vmax.f32 %v2142_v4, 0.0  ;;  %6138 = vst [vmem:[#allocation14 + $0x60] sm:$0xff] %v5710_v63   ;;  %vm3608_vm4 = vcmp.ne.s32.totalorder %v9285_v61, 0  ;;  %vm3704_vm11 = vcmp.lt.s32.totalorder %v9285_v61, 0  ;;  %vm9338_vm6 = vmand %vm4070_vm14, %vm4166_vm0  ;;  %v775_v48 = vpop.f32.mrb[29].mxu0 }
 0x1b8   :  { %v4547_v59 = vsel %vm4259_vm3, %v2240_v10, 0.0  ;;  %v2044_v60 = vmul.f32 %v6491_v49, %v8657_v1  ;;  %vm4074_vm12 = vcmp.ge.s32.totalorder %v8650_v6, 1  ;;  %vm4170_vm15 = vcmp.lt.s32.totalorder %v8650_v6, 17  ;;  %v6380_v20 = vpop.f32.mrb[30].mxu0  ;;  %vm9366_vm3 = vmand %vm3706_vm2, %vm3610_vm10 }
 0x1b9   :  { %v9327_v34 = vmul.u32.u64.low 2863311531, %v9130_v44  ;;  %v9328_v8 = vmul.u32.u64.high 2863311531, %v9130_v44, %v9327_v34  ;;  %v4544_v40 = vsel %vm9294_vm13, %v2237_v14, 0.0  ;;  %v5955_v13 = vpack.c.bf16 %v4547_v59, %v4546_v21  ;;  %v778_v5 = vpop.f32.mrb[31].mxu0  ;;  %vm9390_vm10 = vmand %vm4071_vm1, %vm4167_vm7 }
 0x1ba   :  { %v4545_v38 = vsel %vm9310_vm5, %v2238_v47, 0.0  ;;  %v2042_v25 = vmul.f32 %v8657_v1, %v1736_v2  ;;  %vm4168_vm13 = vcmp.lt.s32.totalorder %v8662_v26, 17  ;;  %v2147_v37 = vadd.f32 %v8692_v0, %v2044_v60  ;;  %vm9350_vm5 = vmand %vm4068_vm9, %vm4164_vm8 }
 0x1bb   :  { %v5950_v51 = vpack.c.bf16 %v4545_v38, %v4544_v40  ;;  %v2045_v43 = vmul.f32 %v6492_v16, %v8657_v1  ;;  %vm4075_vm14 = vcmp.ge.s32.totalorder %v8667_v36, 1  ;;  %vm4171_vm0 = vcmp.lt.s32.totalorder %v8667_v36, 17  ;;  %6186 = vst [vmem:[#allocation15 + $0x68] sm:$0xff] %v5955_v13   ;;  %vm9379_vm9 = vmand %vm3704_vm11, %vm3608_vm4 }
 0x1bc   :  { %v3896_v7 = vadd.s32 24, %v9285_v61  ;;  %v2145_v57 = vadd.f32 %v8692_v0, %v2042_v25  ;;  %v2043_v27 = vmul.f32 %v8657_v1, %v1739_v22  ;;  %vm4169_vm8 = vcmp.lt.s32.totalorder %v8671_v58, 17 }
 0x1bd   :  { %v9371_v14 = vmul.u32.u64.low 2863311531, %v9143_v54  ;;  %v9372_v4 = vmul.u32.u64.high 2863311531, %v9143_v54, %v9371_v14  ;;  %6185 = vst [vmem:[#allocation15 + $0x60] sm:$0xff] %v5950_v51   ;;  %v2243_v63 = vmax.f32 %v2147_v37, 0.0  ;;  %v2148_v10 = vadd.f32 %v8692_v0, %v2045_v43 }
 0x1be   :  { %v5725_v42 = vpack.c.bf16 %v6380_v20, %v6379_v46  ;;  %v9384_v47 = vadd.s32 496, %v7804_v3  ;;  %v2241_v49 = vmax.f32 %v2145_v57, 0.0  ;;  %v2146_v60 = vadd.f32 %v8692_v0, %v2043_v27  ;;  %v6495_v46 = vpop.f32.mrb[32].mxu1  ;;  %v6383_v27 = vpop.f32.mrb[32].mxu0  ;;  %v10906_v20 = vld [vmem:[#allocation29_spill] sm:$0xff] }
 0x1bf   :  { %v5720_v2 = vpack.c.bf16 %v778_v5, %v775_v48  ;;  %v9396_v34 = vadd.s32 480, %v7804_v3  ;;  %v2244_v40 = vmax.f32 %v2148_v10, 0.0  ;;  %vm10902_vm2 = vcmp.lt.s32.totalorder %v8645_v12, 17  ;;  %v1752_v43 = vpop.f32.mrb[33].mxu1  ;;  %v791_v11 = vpop.f32.mrb[33].mxu0  ;;  %v10907_v10 = vld [vmem:[#allocation30_spill] sm:$0xff] }
 0x1c0   :  { %vm10903_vm4 = vcmp.ge.s32.totalorder %v8645_v12, 1  ;;  %6141 = vst [vmem:[#allocation14 + $0x78] sm:$0xff] %v5725_v42   ;;  %v9409_v35 = vsel %vm9366_vm3, %v3898_v18, %v9258_v52  ;;  %v3071_v38 = vshrl.u32 %v9317_v56, 4  ;;  %v9413_v25 = vadd.s32 504, %v7804_v3  ;;  %v6496_v57 = vpop.f32.mrb[34].mxu1  ;;  %v6384_v59 = vpop.f32.mrb[34].mxu0 }
 0x1c1   :  { %vm9402_vm11 = vmand %vm10903_vm4, %vm10902_vm2  ;;  %v2242_v16 = vmax.f32 %v2146_v60, 0.0  ;;  %6140 = vst [vmem:[#allocation14 + $0x70] sm:$0xff] %v5720_v2   ;;  %v9418_v12 = vsel %vm9379_vm9, %v3896_v7, %v9285_v61  ;;  %v9421_v51 = vadd.s32 488, %v7804_v3  ;;  %v9424_v37 = vadd.s32 528, %v7804_v3  ;;  %v10910_v60 = vld [vmem:[#allocation31_spill] sm:$0xff] }
 0x1c2   :  { %v4550_v52 = vsel %vm9338_vm6, %v2243_v63, 0.0  ;;  %v4551_v18 = vsel %vm9390_vm10, %v2244_v40, 0.0  ;;  %v2048_v56 = vmul.f32 %v6495_v46, %v8657_v1  ;;  %vm4078_vm1 = vcmp.ge.s32.totalorder %v8675_v50, 1  ;;  %v1755_v63 = vpop.f32.mrb[35].mxu1  ;;  %vm9449_vm10 = vmand %vm4074_vm12, %vm4170_vm15 }
 0x1c3   :  { %vm4174_vm7 = vcmp.lt.s32.totalorder %v8675_v50, 17  ;;  %v3049_v61 = vshrl.u32 %v9328_v8, 4  ;;  %v4548_v22 = vsel %vm9350_vm5, %v2241_v49, 0.0  ;;  %v5965_v48 = vpack.c.bf16 %v4551_v18, %v4550_v52 }
 0x1c4   :  { %v4549_v32 = vsel %vm9402_vm11, %v2242_v16, 0.0  ;;  %v2046_v7 = vmul.f32 %v8657_v1, %v1752_v43  ;;  %vm4076_vm6 = vcmp.ge.s32.totalorder %v10906_v20, 1  ;;  %vm4172_vm3 = vcmp.lt.s32.totalorder %v10906_v20, 17  ;;  %v794_v16 = vpop.f32.mrb[35].mxu0  ;;  %vm9474_vm11 = vmand %vm4075_vm14, %vm4171_vm0 }
 0x1c5   :  { %v5960_v45 = vpack.c.bf16 %v4549_v32, %v4548_v22  ;;  %v2151_v14 = vadd.f32 %v8692_v0, %v2048_v56  ;;  %v2049_v8 = vmul.f32 %v6496_v57, %v8657_v1  ;;  %vm4079_vm5 = vcmp.ge.s32.totalorder %v10907_v10, 1  ;;  %6188 = vst [vmem:[#allocation15 + $0x78] sm:$0xff] %v5965_v48   ;;  %v6499_v32 = vpop.f32.mrb[36].mxu1 }
 0x1c6   :  { %vm4175_vm9 = vcmp.lt.s32.totalorder %v10907_v10, 17  ;;  %v3072_v42 = vmul.u32 24, %v3071_v38  ;;  %v2149_v21 = vadd.f32 %v8692_v0, %v2046_v7  ;;  %v2047_v49 = vmul.f32 %v8657_v1, %v1755_v63 }
 0x1c7   :  { %v3104_v2 = vshrl.u32 %v9372_v4, 4  ;;  %v9459_v40 = vadd.s32 512, %v7804_v3  ;;  %6187 = vst [vmem:[#allocation15 + $0x70] sm:$0xff] %v5960_v45   ;;  %v2247_v6 = vmax.f32 %v2151_v14, 0.0  ;;  %vm10911_vm12 = vcmp.ge.s32.totalorder %v8662_v26, 1 }
 0x1c8   :  { %vm9465_vm15 = vmand %vm10911_vm12, %vm4168_vm13  ;;  %v2152_v1 = vadd.f32 %v8692_v0, %v2049_v8  ;;  %v5735_v38 = vpack.c.bf16 %v6384_v59, %v6383_v27  ;;  %v3050_v46 = vmul.u32 24, %v3049_v61  ;;  %v2245_v52 = vmax.f32 %v2149_v21, 0.0  ;;  %v9509_v45 = vld [vmem:[#allocation11] ss:$0 sm:$0xff]  ;;  %v1768_v8 = vpop.f32.mrb[37].mxu1  ;;  %v6387_v59 = vpop.f32.mrb[36].mxu0 }
 0x1c9   :  { %v2150_v26 = vadd.f32 %v8692_v0, %v2047_v49  ;;  %v5730_v18 = vpack.c.bf16 %v794_v16, %v791_v11  ;;  %vm4082_vm13 = vcmp.ge.s32.totalorder %v8781_v30, 1  ;;  %vm4178_vm12 = vcmp.lt.s32.totalorder %v8781_v30, 17  ;;  %v6500_v49 = vpop.f32.mrb[38].mxu1 }
 0x1ca   :  { %v9482_v56 = vadd.s32 536, %v7804_v3  ;;  %v2248_v43 = vmax.f32 %v2152_v1, 0.0  ;;  %vm10916_vm2 = vcmp.ge.s32.totalorder %v8671_v58, 1  ;;  %6143 = vst [vmem:[#allocation14 + $0x88] sm:$0xff] %v5735_v38   ;;  %v9493_v0 = vsub.s32 %v8879_v41, %v3072_v42  ;;  %v1771_v1 = vpop.f32.mrb[39].mxu1  ;;  %v807_v38 = vpop.f32.mrb[37].mxu0 }
 0x1cb   :  { %vm9488_vm4 = vmand %vm10916_vm2, %vm4169_vm8  ;;  %v9496_v61 = vadd.s32 520, %v7804_v3  ;;  %v9499_v22 = vadd.s32 560, %v7804_v3  ;;  %v2246_v48 = vmax.f32 %v2150_v26, 0.0  ;;  %6142 = vst [vmem:[#allocation14 + $0x80] sm:$0xff] %v5730_v18   ;;  %v3105_v7 = vmul.u32 24, %v3104_v2  ;;  %v6388_v4 = vpop.f32.mrb[38].mxu0 }
 0x1cc   :  { %v9502_v58 = vmul.u32.u64.low 2863311531, %v9198_v24  ;;  %v9503_v57 = vmul.u32.u64.high 2863311531, %v9198_v24, %v9502_v58  ;;  %v4554_v27 = vsel %vm9449_vm10, %v2247_v6, 0.0  ;;  %v4555_v41 = vsel %vm9474_vm11, %v2248_v43, 0.0  ;;  %v9522_v6 = vld [vmem:[#allocation13] ss:$0 sm:$0xff] }
 0x1cd   :  { %v2052_v14 = vmul.f32 %v9509_v45, %v6499_v32  ;;  %v9513_v63 = vsub.s32 %v9130_v44, %v3050_v46  ;;  %v4552_v11 = vsel %vm9465_vm15, %v2245_v52, 0.0  ;;  %v5975_v42 = vpack.c.bf16 %v4555_v41, %v4554_v27 }
 0x1ce   :  { %v4553_v21 = vsel %vm9488_vm4, %v2246_v48, 0.0  ;;  %v2050_v5 = vmul.f32 %v9509_v45, %v1768_v8  ;;  %vm4176_vm0 = vcmp.lt.s32.totalorder %v8851_v15, 17  ;;  %v2053_v13 = vmul.f32 %v9509_v45, %v6500_v49  ;;  %vm9533_vm4 = vmand %vm4078_vm1, %vm4174_vm7  ;;  %v810_v48 = vpop.f32.mrb[39].mxu0 }
 0x1cf   :  { %v5970_v2 = vpack.c.bf16 %v4553_v21, %v4552_v11  ;;  %v2155_v44 = vadd.f32 %v9522_v6, %v2052_v14  ;;  %vm3611_vm2 = vcmp.ne.s32.totalorder %v9493_v0, 0  ;;  %6190 = vst [vmem:[#allocation15 + $0x88] sm:$0xff] %v5975_v42   ;;  %v2051_v52 = vmul.f32 %v9509_v45, %v1771_v1  ;;  %vm9549_vm1 = vmand %vm4076_vm6, %vm4172_vm3  ;;  %v6503_v11 = vpop.f32.mrb[40].mxu1 }
 0x1d0   :  { %v2153_v46 = vadd.f32 %v9522_v6, %v2050_v5  ;;  %vm3707_vm8 = vcmp.lt.s32.totalorder %v9493_v0, 0  ;;  %v9543_v26 = vsub.s32 %v9143_v54, %v3105_v7  ;;  %v2156_v43 = vadd.f32 %v9522_v6, %v2053_v13  ;;  %vm9561_vm7 = vmand %vm4079_vm5, %vm4175_vm9  ;;  %v1784_v49 = vpop.f32.mrb[41].mxu1 }
 0x1d1   :  { %6189 = vst [vmem:[#allocation15 + $0x80] sm:$0xff] %v5970_v2   ;;  %v2251_v50 = vmax.f32 %v2155_v44, 0.0  ;;  %v5745_v36 = vpack.c.bf16 %v6388_v4, %v6387_v59  ;;  %v9555_v32 = vadd.s32 24, %v9493_v0  ;;  %v2154_v20 = vadd.f32 %v9522_v6, %v2051_v52  ;;  %v6504_v30 = vpop.f32.mrb[42].mxu1 }
 0x1d2   :  { %v2249_v58 = vmax.f32 %v2153_v46, 0.0  ;;  %v5740_v7 = vpack.c.bf16 %v810_v48, %v807_v38  ;;  %v3082_v27 = vshrl.u32 %v9503_v57, 4  ;;  %v2252_v41 = vmax.f32 %v2156_v43, 0.0  ;;  %v6391_v38 = vpop.f32.mrb[40].mxu0 }
 0x1d3   :  { %vm10925_vm6 = vcmp.lt.s32.totalorder %v10910_v60, 17  ;;  %vm10926_vm3 = vcmp.ge.s32.totalorder %v10910_v60, 1  ;;  %6145 = vst [vmem:[#allocation14 + $0x98] sm:$0xff] %v5745_v36   ;;  %vm3609_vm5 = vcmp.ne.s32.totalorder %v9513_v63, 0  ;;  %vm3705_vm9 = vcmp.lt.s32.totalorder %v9513_v63, 0  ;;  %v823_v18 = vpop.f32.mrb[41].mxu0 }
 0x1d4   :  { %vm9571_vm15 = vmand %vm10926_vm3, %vm10925_vm6  ;;  %v3897_v10 = vadd.s32 24, %v9513_v63  ;;  %v2250_v8 = vmax.f32 %v2154_v20, 0.0  ;;  %6144 = vst [vmem:[#allocation14 + $0x90] sm:$0xff] %v5740_v7   ;;  %vm3614_vm14 = vcmp.ne.s32.totalorder %v9543_v26, 0  ;;  %vm3710_vm6 = vcmp.lt.s32.totalorder %v9543_v26, 0  ;;  %v6392_v54 = vpop.f32.mrb[42].mxu0 }
 0x1d5   :  { %v3902_v60 = vadd.s32 24, %v9543_v26  ;;  %v4558_v57 = vsel %vm9533_vm4, %v2251_v50, 0.0  ;;  %v4559_v42 = vsel %vm9561_vm7, %v2252_v41, 0.0  ;;  %v2056_v21 = vmul.f32 %v9509_v45, %v6503_v11  ;;  %vm9592_vm3 = vmand %vm4082_vm13, %vm4178_vm12  ;;  %v1787_v50 = vpop.f32.mrb[43].mxu1  ;;  %v826_v11 = vpop.f32.mrb[43].mxu0 }
 0x1d6   :  { %vm4084_vm11 = vcmp.ge.s32.totalorder %v9118_v31, 1  ;;  %vm4180_vm10 = vcmp.lt.s32.totalorder %v9118_v31, 17  ;;  %v3083_v59 = vmul.u32 24, %v3082_v27  ;;  %v4556_v2 = vsel %vm9549_vm1, %v2249_v58, 0.0  ;;  %vm9607_vm13 = vmand %vm3707_vm8, %vm3611_vm2 }
 0x1d7   :  { %v5985_v44 = vpack.c.bf16 %v4559_v42, %v4558_v57  ;;  %v4557_v13 = vsel %vm9571_vm15, %v2250_v8, 0.0  ;;  %v2054_v1 = vmul.f32 %v9509_v45, %v1784_v49  ;;  %v2159_v52 = vadd.f32 %v9522_v6, %v2056_v21  ;;  %vm9619_vm15 = vmand %vm3705_vm9, %vm3609_vm5 }
 0x1d8   :  { %v5980_v46 = vpack.c.bf16 %v4557_v13, %v4556_v2  ;;  %v2057_v4 = vmul.f32 %v9509_v45, %v6504_v30  ;;  %vm4087_vm12 = vcmp.ge.s32.totalorder %v9221_v62, 1  ;;  %vm4183_vm4 = vcmp.lt.s32.totalorder %v9221_v62, 17  ;;  %vm9634_vm1 = vmand %vm3710_vm6, %vm3614_vm14 }
 0x1d9   :  { %v9624_v36 = vsub.s32 %v9198_v24, %v3083_v59  ;;  %6192 = vst [vmem:[#allocation15 + $0x98] sm:$0xff] %v5985_v44   ;;  %v2157_v48 = vadd.f32 %v9522_v6, %v2054_v1  ;;  %v2055_v58 = vmul.f32 %v9509_v45, %v1787_v50  ;;  %vm4181_vm2 = vcmp.lt.s32.totalorder %v9236_v39, 17 }
 0x1da   :  { %v9639_v24 = vmul.u32.u64.low 2863311531, %v9239_v29  ;;  %v9640_v7 = vmul.u32.u64.high 2863311531, %v9239_v29, %v9639_v24  ;;  %6191 = vst [vmem:[#allocation15 + $0x90] sm:$0xff] %v5980_v46   ;;  %v2255_v27 = vmax.f32 %v2159_v52, 0.0  ;;  %vm10937_vm7 = vcmp.ge.s32.totalorder %v8851_v15, 1 }
 0x1db   :  { %vm9646_vm5 = vmand %vm10937_vm7, %vm4176_vm0  ;;  %v2160_v14 = vadd.f32 %v9522_v6, %v2057_v4  ;;  %v5755_v8 = vpack.c.bf16 %v6392_v54, %v6391_v38  ;;  %v9652_v57 = vadd.s32 544, %v7804_v3  ;;  %v2253_v42 = vmax.f32 %v2157_v48, 0.0  ;;  %v6395_v4 = vpop.f32.mrb[44].mxu0 }
 0x1dc   :  { %vm10940_vm14 = vcmp.lt.s32.totalorder %v9013_v19, 17  ;;  %vm10941_vm9 = vcmp.ge.s32.totalorder %v9013_v19, 1  ;;  %v2158_v15 = vadd.f32 %v9522_v6, %v2055_v58  ;;  %v5750_v49 = vpack.c.bf16 %v826_v11, %v823_v18  ;;  %v839_v54 = vpop.f32.mrb[45].mxu0 }
 0x1dd   :  { %vm9658_vm6 = vmand %vm10941_vm9, %vm10940_vm14  ;;  %v9667_v59 = vsel %vm9607_vm13, %v9555_v32, %v9493_v0  ;;  %v2256_v2 = vmax.f32 %v2160_v14, 0.0  ;;  %vm10944_vm0 = vcmp.lt.s32.totalorder %v9027_v55, 17  ;;  %vm10945_vm7 = vcmp.ge.s32.totalorder %v9027_v55, 1  ;;  %6147 = vst [vmem:[#allocation14 + $0xa8] sm:$0xff] %v5755_v8   ;;  %v6507_v55 = vpop.f32.mrb[44].mxu1 }
 0x1de   :  { %vm9673_vm8 = vmand %vm10945_vm7, %vm10944_vm0  ;;  %v9680_v44 = vsel %vm9619_vm15, %v3897_v10, %v9513_v63  ;;  %v9685_v0 = vsel %vm9634_vm1, %v3902_v60, %v9543_v26  ;;  %v9688_v32 = vadd.s32 568, %v7804_v3  ;;  %v2254_v13 = vmax.f32 %v2158_v15, 0.0  ;;  %6146 = vst [vmem:[#allocation14 + $0xa0] sm:$0xff] %v5750_v49   ;;  %v1800_v60 = vpop.f32.mrb[45].mxu1 }
 0x1df   :  { %vm3612_vm13 = vcmp.ne.s32.totalorder %v9624_v36, 0  ;;  %v3115_v1 = vshrl.u32 %v9640_v7, 4  ;;  %v9693_v30 = vadd.s32 552, %v7804_v3  ;;  %v4562_v63 = vsel %vm9592_vm3, %v2255_v27, 0.0  ;;  %v6508_v52 = vpop.f32.mrb[46].mxu1  ;;  %v6396_v27 = vpop.f32.mrb[46].mxu0 }
 0x1e0   :  { %v4563_v26 = vsel %vm9658_vm6, %v2256_v2, 0.0  ;;  %v2060_v10 = vmul.f32 %v9509_v45, %v6507_v55  ;;  %vm4090_vm15 = vcmp.ge.s32.totalorder %v9409_v35, 1  ;;  %vm4186_vm1 = vcmp.lt.s32.totalorder %v9409_v35, 17  ;;  %v1803_v58 = vpop.f32.mrb[47].mxu1  ;;  %v842_v31 = vpop.f32.mrb[47].mxu0 }
 0x1e1   :  { %vm3708_vm14 = vcmp.lt.s32.totalorder %v9624_v36, 0  ;;  %v4560_v38 = vsel %vm9646_vm5, %v2253_v42, 0.0  ;;  %v5995_v16 = vpack.c.bf16 %v4563_v26, %v4562_v63  ;;  %v4561_v5 = vsel %vm9673_vm8, %v2254_v13, 0.0 }
 0x1e2   :  { %v2058_v46 = vmul.f32 %v9509_v45, %v1800_v60  ;;  %vm4088_vm3 = vcmp.ge.s32.totalorder %v9418_v12, 1  ;;  %vm4184_vm9 = vcmp.lt.s32.totalorder %v9418_v12, 17  ;;  %v5990_v50 = vpack.c.bf16 %v4561_v5, %v4560_v38 }
 0x1e3   :  { %v2163_v18 = vadd.f32 %v9522_v6, %v2060_v10  ;;  %vm10948_vm6 = vcmp.lt.s32.totalorder %v9041_v33, 17  ;;  %vm10949_vm0 = vcmp.ge.s32.totalorder %v9041_v33, 1  ;;  %v2061_v48 = vmul.f32 %v9509_v45, %v6508_v52  ;;  %6194 = vst [vmem:[#allocation15 + $0xa8] sm:$0xff] %v5995_v16  }
 0x1e4   :  { %vm9715_vm5 = vmand %vm10949_vm0, %vm10948_vm6  ;;  %vm4187_vm7 = vcmp.lt.s32.totalorder %v9667_v59, 17  ;;  %v9723_v20 = vadd.s32 592, %v7804_v3  ;;  %v2161_v24 = vadd.f32 %v9522_v6, %v2058_v46  ;;  %v2059_v7 = vmul.f32 %v9509_v45, %v1803_v58  ;;  %6193 = vst [vmem:[#allocation15 + $0xa0] sm:$0xff] %v5990_v50  }
 0x1e5   :  { %vm9730_vm6 = vmand %vm4084_vm11, %vm4180_vm10  ;;  %vm4185_vm8 = vcmp.lt.s32.totalorder %v9680_v44, 17  ;;  %v3900_v41 = vadd.s32 24, %v9624_v36  ;;  %v3116_v14 = vmul.u32 24, %v3115_v1  ;;  %v2259_v8 = vmax.f32 %v2163_v18, 0.0 }
 0x1e6   :  { %v2164_v11 = vadd.f32 %v9522_v6, %v2061_v48  ;;  %v5765_v42 = vpack.c.bf16 %v6396_v27, %v6395_v4  ;;  %vm3804_vm10 = vmand %vm3708_vm14, %vm3612_vm13  ;;  %v9744_v21 = vadd.s32 576, %v7804_v3  ;;  %v2257_v15 = vmax.f32 %v2161_v24, 0.0  ;;  %v6399_v48 = vpop.f32.mrb[48].mxu0 }
 0x1e7   :  { %vm9750_vm11 = vmand %vm4087_vm12, %vm4183_vm4  ;;  %v2162_v2 = vadd.f32 %v9522_v6, %v2059_v7  ;;  %v5760_v19 = vpack.c.bf16 %v842_v31, %v839_v54  ;;  %v3117_v13 = vsub.s32 %v9239_v29, %v3116_v14  ;;  %vm10956_vm13 = vcmp.ge.s32.totalorder %v9236_v39, 1  ;;  %v6511_v29 = vpop.f32.mrb[48].mxu1  ;;  %v855_v27 = vpop.f32.mrb[49].mxu0 }
 0x1e8   :  { %v2260_v55 = vmax.f32 %v2164_v11, 0.0  ;;  %vm9760_vm14 = vmand %vm10956_vm13, %vm4181_vm2  ;;  %6149 = vst [vmem:[#allocation14 + $0xb8] sm:$0xff] %v5765_v42   ;;  %v9765_v62 = vmul.u32.u64.low 2863311531, %v9242_v53  ;;  %v9766_v63 = vmul.u32.u64.high 2863311531, %v9242_v53, %v9765_v62  ;;  %v9769_v26 = vadd.s32 600, %v7804_v3  ;;  %v1816_v5 = vpop.f32.mrb[49].mxu1 }
 0x1e9   :  { %v2258_v10 = vmax.f32 %v2162_v2, 0.0  ;;  %6148 = vst [vmem:[#allocation14 + $0xb0] sm:$0xff] %v5760_v19   ;;  %v9772_v60 = vsel %vm3804_vm10, %v3900_v41, %v9624_v36  ;;  %vm3615_vm12 = vcmp.ne.s32.totalorder %v3117_v13, 0  ;;  %vm3711_vm4 = vcmp.lt.s32.totalorder %v3117_v13, 0  ;;  %v6512_v43 = vpop.f32.mrb[50].mxu1  ;;  %v6400_v11 = vpop.f32.mrb[50].mxu0 }
 0x1ea   :  { %v4566_v39 = vsel %vm9715_vm5, %v2259_v8, 0.0  ;;  %v4567_v38 = vsel %vm9750_vm11, %v2260_v55, 0.0  ;;  %v2064_v16 = vmul.f32 %v9509_v45, %v6511_v29  ;;  %vm4094_vm2 = vcmp.ge.s32.totalorder %v9685_v0, 1  ;;  %vm9781_vm0 = vmand %vm3711_vm4, %vm3615_vm12  ;;  %v1819_v7 = vpop.f32.mrb[51].mxu1  ;;  %v858_v2 = vpop.f32.mrb[51].mxu0 }
 0x1eb   :  { %vm4190_vm13 = vcmp.lt.s32.totalorder %v9685_v0, 17  ;;  %v3903_v36 = vadd.s32 24, %v3117_v13  ;;  %v4564_v52 = vsel %vm9730_vm6, %v2257_v15, 0.0  ;;  %v6005_v4 = vpack.c.bf16 %v4567_v38, %v4566_v39  ;;  %vm9799_vm5 = vmand %vm4090_vm15, %vm4186_vm1  ;;  %v6515_v38 = vpop.f32.mrb[52].mxu1 }
 0x1ec   :  { %v4565_v50 = vsel %vm9760_vm14, %v2258_v10, 0.0  ;;  %v2062_v18 = vmul.f32 %v9509_v45, %v1816_v5  ;;  %v2167_v54 = vadd.f32 %v9522_v6, %v2064_v16  ;;  %v2065_v24 = vmul.f32 %v9509_v45, %v6512_v43  ;;  %vm9813_vm15 = vmand %vm4088_vm3, %vm4184_vm9 }
 0x1ed   :  { %v6000_v58 = vpack.c.bf16 %v4565_v50, %v4564_v52  ;;  %v9793_v41 = vadd.s32 584, %v7804_v3  ;;  %6196 = vst [vmem:[#allocation15 + $0xb8] sm:$0xff] %v6005_v4   ;;  %v2063_v8 = vmul.f32 %v9509_v45, %v1819_v7  ;;  %vm4092_vm6 = vcmp.ge.s32.totalorder %v9772_v60, 1  ;;  %v1832_v52 = vpop.f32.mrb[53].mxu1  ;;  %vm9863_vm14 = vmand %vm4094_vm2, %vm4190_vm13 }
 0x1ee   :  { %v2165_v14 = vadd.f32 %v9522_v6, %v2062_v18  ;;  %vm4188_vm10 = vcmp.lt.s32.totalorder %v9772_v60, 17  ;;  %v3999_v42 = vsel %vm9781_vm0, %v3903_v36, %v3117_v13  ;;  %v2263_v31 = vmax.f32 %v2167_v54, 0.0  ;;  %v6403_v54 = vpop.f32.mrb[52].mxu0 }
 0x1ef   :  { %6195 = vst [vmem:[#allocation15 + $0xb0] sm:$0xff] %v6000_v58   ;;  %v2168_v15 = vadd.f32 %v9522_v6, %v2065_v24  ;;  %v5775_v49 = vpack.c.bf16 %v6400_v11, %v6399_v48  ;;  %v3093_v19 = vshrl.u32 %v9766_v63, 4  ;;  %vm10965_vm1 = vcmp.ge.s32.totalorder %v9667_v59, 1  ;;  %v6516_v58 = vpop.f32.mrb[54].mxu1  ;;  %vm9882_vm13 = vmand %vm4092_vm6, %vm4188_vm10 }
 0x1f0   :  { %v2261_v55 = vmax.f32 %v2165_v14, 0.0  ;;  %vm9823_vm0 = vmand %vm10965_vm1, %vm4187_vm7  ;;  %v2166_v12 = vadd.f32 %v9522_v6, %v2063_v8  ;;  %v5770_v1 = vpack.c.bf16 %v858_v2, %v855_v27  ;;  %v9829_v62 = vadd.s32 624, %v7804_v3  ;;  %v1835_v33 = vpop.f32.mrb[55].mxu1  ;;  %v871_v14 = vpop.f32.mrb[53].mxu0 }
 0x1f1   :  { %v2264_v10 = vmax.f32 %v2168_v15, 0.0  ;;  %vm10968_vm3 = vcmp.ge.s32.totalorder %v9680_v44, 1  ;;  %6151 = vst [vmem:[#allocation14 + $0xc8] sm:$0xff] %v5775_v49   ;;  %vm4095_vm7 = vcmp.ge.s32.totalorder %v3999_v42, 1  ;;  %v3094_v59 = vmul.u32 24, %v3093_v19  ;;  %v6404_v35 = vpop.f32.mrb[54].mxu0 }
 0x1f2   :  { %vm9835_vm9 = vmand %vm10968_vm3, %vm4185_vm8  ;;  %v9840_v29 = vadd.s32 608, %v7804_v3  ;;  %v2262_v39 = vmax.f32 %v2166_v12, 0.0  ;;  %6150 = vst [vmem:[#allocation14 + $0xc0] sm:$0xff] %v5770_v1   ;;  %vm4191_vm11 = vcmp.lt.s32.totalorder %v3999_v42, 17  ;;  %v4570_v44 = vsel %vm9799_vm5, %v2263_v31, 0.0  ;;  %v874_v19 = vpop.f32.mrb[55].mxu0 }
 0x1f3   :  { %v9843_v16 = vmul.u32.u64.low 2863311531, %v9247_v28  ;;  %v9844_v5 = vmul.u32.u64.high 2863311531, %v9247_v28, %v9843_v16  ;;  %v4571_v46 = vsel %vm9823_vm0, %v2264_v10, 0.0  ;;  %v2068_v36 = vmul.f32 %v9509_v45, %v6515_v38  ;;  %vm9873_vm2 = vmand %vm4095_vm7, %vm4191_vm11 }
 0x1f4   :  { %v3095_v4 = vsub.s32 %v9242_v53, %v3094_v59  ;;  %v4568_v50 = vsel %vm9813_vm15, %v2261_v55, 0.0  ;;  %v6015_v18 = vpack.c.bf16 %v4571_v46, %v4570_v44  ;;  %v4569_v43 = vsel %vm9835_vm9, %v2262_v39, 0.0  ;;  %v6519_v16 = vpop.f32.mrb[56].mxu1 }
 0x1f5   :  { %v2066_v48 = vmul.f32 %v9509_v45, %v1832_v52  ;;  %v6010_v24 = vpack.c.bf16 %v4569_v43, %v4568_v50  ;;  %v2171_v7 = vadd.f32 %v9522_v6, %v2068_v36  ;;  %v2069_v27 = vmul.f32 %v9509_v45, %v6516_v58  ;;  %v1848_v36 = vpop.f32.mrb[57].mxu1 }
 0x1f6   :  { %vm3613_vm8 = vcmp.ne.s32.totalorder %v3095_v4, 0  ;;  %6198 = vst [vmem:[#allocation15 + $0xc8] sm:$0xff] %v6015_v18   ;;  %v2067_v11 = vmul.f32 %v9509_v45, %v1835_v33  ;;  %vm3709_vm12 = vcmp.lt.s32.totalorder %v3095_v4, 0  ;;  %v3901_v31 = vadd.s32 24, %v3095_v4  ;;  %v6520_v58 = vpop.f32.mrb[58].mxu1 }
 0x1f7   :  { %v2169_v8 = vadd.f32 %v9522_v6, %v2066_v48  ;;  %6197 = vst [vmem:[#allocation15 + $0xc0] sm:$0xff] %v6010_v24   ;;  %v2267_v15 = vmax.f32 %v2171_v7, 0.0  ;;  %v2172_v49 = vadd.f32 %v9522_v6, %v2069_v27  ;;  %vm3805_vm4 = vmand %vm3709_vm12, %vm3613_vm8  ;;  %v5785_v2 = vpack.c.bf16 %v6404_v35, %v6403_v54  ;;  %v6407_v54 = vpop.f32.mrb[56].mxu0  ;;  %v1851_v33 = vpop.f32.mrb[59].mxu1 }
 0x1f8   :  { %v3148_v0 = vshrl.u32 %v9844_v5, 4  ;;  %v2170_v12 = vadd.f32 %v9522_v6, %v2067_v11  ;;  %v3997_v1 = vsel %vm3805_vm4, %v3901_v31, %v3095_v4  ;;  %v5780_v10 = vpack.c.bf16 %v874_v19, %v871_v14  ;;  %v887_v14 = vpop.f32.mrb[57].mxu0 }
 0x1f9   :  { %v2265_v55 = vmax.f32 %v2169_v8, 0.0  ;;  %v2268_v59 = vmax.f32 %v2172_v49, 0.0  ;;  %vm4093_vm5 = vcmp.ge.s32.totalorder %v3997_v1, 1  ;;  %vm4189_vm15 = vcmp.lt.s32.totalorder %v3997_v1, 17  ;;  %6153 = vst [vmem:[#allocation14 + $0xd8] sm:$0xff] %v5785_v2   ;;  %v6408_v11 = vpop.f32.mrb[58].mxu0 }
 0x1fa   :  { %v9887_v42 = vadd.s32 632, %v7804_v3  ;;  %v4574_v39 = vsel %vm9863_vm14, %v2267_v15, 0.0  ;;  %v2266_v38 = vmax.f32 %v2170_v12, 0.0  ;;  %vm4285_vm1 = vmand %vm4093_vm5, %vm4189_vm15  ;;  %6152 = vst [vmem:[#allocation14 + $0xd0] sm:$0xff] %v5780_v10   ;;  %v3149_v5 = vmul.u32 24, %v3148_v0  ;;  %v890_v15 = vpop.f32.mrb[59].mxu0 }
 0x1fb   :  { %v9892_v60 = vadd.s32 616, %v7804_v3  ;;  %v4575_v44 = vsel %vm9873_vm2, %v2268_v59, 0.0  ;;  %v2072_v46 = vmul.f32 %v9509_v45, %v6519_v16  ;;  %v4572_v50 = vsel %vm9882_vm13, %v2265_v55, 0.0 }
 0x1fc   :  { %v9898_v52 = vmul.u32.u64.low 2863311531, %v9250_v23  ;;  %v9899_v4 = vmul.u32.u64.high 2863311531, %v9250_v23, %v9898_v52  ;;  %v6025_v18 = vpack.c.bf16 %v4575_v44, %v4574_v39  ;;  %v4573_v43 = vsel %vm4285_vm1, %v2266_v38, 0.0  ;;  %v6523_v38 = vpop.f32.mrb[60].mxu1 }
 0x1fd   :  { %v3150_v48 = vsub.s32 %v9247_v28, %v3149_v5  ;;  %v6020_v24 = vpack.c.bf16 %v4573_v43, %v4572_v50  ;;  %v2070_v7 = vmul.f32 %v9509_v45, %v1848_v36  ;;  %v2073_v27 = vmul.f32 %v9509_v45, %v6520_v58  ;;  %v1864_v36 = vpop.f32.mrb[61].mxu1 }
 0x1fe   :  { %v9907_v53 = vadd.s32 656, %v7804_v3  ;;  %6200 = vst [vmem:[#allocation15 + $0xd8] sm:$0xff] %v6025_v18   ;;  %v9910_v31 = vadd.s32 640, %v7804_v3  ;;  %v2175_v28 = vadd.f32 %v9522_v6, %v2072_v46  ;;  %v3126_v35 = vshrl.u32 %v9899_v4, 4  ;;  %v6524_v43 = vpop.f32.mrb[62].mxu1 }
 0x1ff   :  { %vm3618_vm6 = vcmp.ne.s32.totalorder %v3150_v48, 0  ;;  %vm3714_vm10 = vcmp.lt.s32.totalorder %v3150_v48, 0  ;;  %v3906_v8 = vadd.s32 24, %v3150_v48  ;;  %6199 = vst [vmem:[#allocation15 + $0xd0] sm:$0xff] %v6020_v24   ;;  %v9915_v49 = vadd.s32 664, %v7804_v3  ;;  %v1867_v24 = vpop.f32.mrb[63].mxu1 }
 0x200   :  { %vm3810_vm0 = vmand %vm3714_vm10, %vm3618_vm6  ;;  %v9918_v2 = vadd.s32 648, %v7804_v3  ;;  %v9921_v0 = vmul.u32.u64.low 2863311531, %v9270_v17  ;;  %v9922_v55 = vmul.u32.u64.high 2863311531, %v9270_v17, %v9921_v0  ;;  %v2071_v13 = vmul.f32 %v9509_v45, %v1851_v33 }
 0x201   :  { %v4002_v19 = vsel %vm3810_vm0, %v3906_v8, %v3150_v48  ;;  %v9926_v12 = vadd.f32 %v9522_v6, %v2070_v7  ;;  %v3127_v1 = vmul.u32 24, %v3126_v35  ;;  %v9929_v10 = vadd.f32 %v9522_v6, %v2073_v27  ;;  %v9945_v48 = vpop.f32.mrb[60].mxu0 }
 0x202   :  { %vm4098_vm3 = vcmp.ge.s32.totalorder %v4002_v19, 1  ;;  %vm4194_vm9 = vcmp.lt.s32.totalorder %v4002_v19, 17  ;;  %v9932_v63 = vmul.u32.u64.low 2863311531, %v9288_v9  ;;  %v9933_v59 = vmul.u32.u64.high 2863311531, %v9288_v9, %v9932_v63  ;;  %v9956_v7 = vpop.f32.mrb[61].mxu0 }
 0x203   :  { %v5795_v39 = vpack.c.bf16 %v6408_v11, %v6407_v54  ;;  %v2271_v16 = vmax.f32 %v2175_v28, 0.0  ;;  %v3128_v5 = vsub.s32 %v9250_v23, %v3127_v1  ;;  %v5790_v44 = vpack.c.bf16 %v890_v15, %v887_v14  ;;  %vm9949_vm7 = vmand %vm4098_vm3, %vm4194_vm9  ;;  %v6412_v11 = vpop.f32.mrb[62].mxu0 }
 0x204   :  { %v2076_v46 = vmul.f32 %v9509_v45, %v6523_v38  ;;  %v3159_v52 = vshrl.u32 %v9922_v55, 4  ;;  %v9939_v4 = vadd.f32 %v9522_v6, %v2071_v13  ;;  %v2269_v27 = vmax.f32 %v9926_v12, 0.0  ;;  %v9966_v0 = vpop.f32.mrb[63].mxu0 }
 0x205   :  { %6155 = vst [vmem:[#allocation14 + $0xe8] sm:$0xff] %v5795_v39   ;;  %v9942_v50 = vmul.u32.u64.low 2863311531, %v9384_v47  ;;  %v9943_v18 = vmul.u32.u64.high 2863311531, %v9384_v47, %v9942_v50  ;;  %vm3616_vm11 = vcmp.ne.s32.totalorder %v3128_v5, 0  ;;  %vm3712_vm8 = vcmp.lt.s32.totalorder %v3128_v5, 0  ;;  %6154 = vst [vmem:[#allocation14 + $0xe0] sm:$0xff] %v5790_v44  }
 0x206   :  { %v3904_v58 = vadd.s32 24, %v3128_v5  ;;  %v9954_v54 = vadd.f32 %v9522_v6, %v2076_v46  ;;  %vm3808_vm14 = vmand %vm3712_vm8, %vm3616_vm11  ;;  %v2272_v33 = vmax.f32 %v9929_v10, 0.0  ;;  %v3160_v14 = vmul.u32 24, %v3159_v52  ;;  %v9991_v23 = vpop.f32.mrb[64].mxu0 }
 0x207   :  { %v3137_v8 = vshrl.u32 %v9933_v59, 4  ;;  %v2074_v35 = vmul.f32 %v9509_v45, %v1864_v36  ;;  %v9963_v15 = vmul.u32.u64.low 2863311531, %v9396_v34  ;;  %v9964_v19 = vmul.u32.u64.high 2863311531, %v9396_v34, %v9963_v15 }
 0x208   :  { %v4000_v28 = vsel %vm3808_vm14, %v3904_v58, %v3128_v5  ;;  %v4578_v55 = vsel %vm9949_vm7, %v2271_v16, 0.0  ;;  %v3161_v13 = vsub.s32 %v9270_v17, %v3160_v14  ;;  %v2077_v10 = vmul.f32 %v9509_v45, %v6524_v43  ;;  %v6527_v5 = vpop.f32.mrb[64].mxu1  ;;  %v10001_v14 = vpop.f32.mrb[65].mxu0 }
 0x209   :  { %v3138_v1 = vmul.u32 24, %v3137_v8  ;;  %vm4096_vm12 = vcmp.ge.s32.totalorder %v4000_v28, 1  ;;  %v2270_v63 = vmax.f32 %v9939_v4, 0.0  ;;  %v2275_v59 = vmax.f32 %v9954_v54, 0.0  ;;  %v9980_v36 = vpop.f32.mrb[65].mxu1 }
 0x20a   :  { %v3192_v39 = vshrl.u32 %v9943_v18, 4  ;;  %vm4192_vm4 = vcmp.lt.s32.totalorder %v4000_v28, 17  ;;  %vm3619_vm2 = vcmp.ne.s32.totalorder %v3161_v13, 0  ;;  %vm3715_vm13 = vcmp.lt.s32.totalorder %v3161_v13, 0  ;;  %v9989_v43 = vpop.f32.mrb[66].mxu1  ;;  %v10005_v28 = vpop.f32.mrb[66].mxu0 }
 0x20b   :  { %v3907_v38 = vadd.s32 24, %v3161_v13  ;;  %vm3811_vm5 = vmand %vm3715_vm13, %vm3619_vm2  ;;  %v3139_v16 = vsub.s32 %v9288_v9, %v3138_v1  ;;  %v9977_v17 = vadd.f32 %v9522_v6, %v2074_v35  ;;  %v3170_v46 = vshrl.u32 %v9964_v19, 4  ;;  %v9999_v58 = vpop.f32.mrb[67].mxu1 }
 0x20c   :  { %v3193_v44 = vmul.u32 24, %v3192_v39  ;;  %v9983_v4 = vadd.f32 %v9522_v6, %v2077_v10  ;;  %v9986_v50 = vmul.u32.u64.low 2863311531, %v9413_v25  ;;  %v9987_v18 = vmul.u32.u64.high 2863311531, %v9413_v25, %v9986_v50  ;;  %vm9995_vm15 = vmand %vm4096_vm12, %vm4192_vm4 }
 0x20d   :  { %v4003_v52 = vsel %vm3811_vm5, %v3907_v38, %v3161_v13  ;;  %vm3617_vm10 = vcmp.ne.s32.totalorder %v3139_v16, 0  ;;  %vm3713_vm0 = vcmp.lt.s32.totalorder %v3139_v16, 0  ;;  %v3905_v8 = vadd.s32 24, %v3139_v16  ;;  %v10012_v38 = vpop.f32.mrb[67].mxu0 }
 0x20e   :  { %vm4099_vm1 = vcmp.ge.s32.totalorder %v4003_v52, 1  ;;  %vm4195_vm6 = vcmp.lt.s32.totalorder %v4003_v52, 17  ;;  %v3194_v35 = vsub.s32 %v9384_v47, %v3193_v44  ;;  %v3171_v15 = vmul.u32 24, %v3170_v46  ;;  %vm3809_vm9 = vmand %vm3713_vm0, %vm3617_vm10  ;;  %v10029_v9 = vpop.f32.mrb[68].mxu0 }
 0x20f   :  { %vm4291_vm3 = vmand %vm4099_vm1, %vm4195_vm6  ;;  %v2075_v19 = vmul.f32 %v9509_v45, %v1867_v24  ;;  %v10008_v1 = vmul.u32.u64.low 2863311531, %v9421_v51  ;;  %v10009_v10 = vmul.u32.u64.high 2863311531, %v9421_v51, %v10008_v1  ;;  %v5805_v39 = vpack.c.bf16 %v6412_v11, %v9945_v48 }
 0x210   :  { %v4579_v13 = vsel %vm4291_vm3, %v2272_v33, 0.0  ;;  %v4001_v50 = vsel %vm3809_vm9, %v3905_v8, %v3139_v16  ;;  %vm3622_vm7 = vcmp.ne.s32.totalorder %v3194_v35, 0  ;;  %vm3718_vm11 = vcmp.lt.s32.totalorder %v3194_v35, 0  ;;  %v10023_v16 = vpop.f32.mrb[68].mxu1 }
 0x211   :  { %v6035_v52 = vpack.c.bf16 %v4579_v13, %v4578_v55  ;;  %vm4097_vm8 = vcmp.ge.s32.totalorder %v4001_v50, 1  ;;  %vm4193_vm14 = vcmp.lt.s32.totalorder %v4001_v50, 17  ;;  %vm3814_vm12 = vmand %vm3718_vm11, %vm3622_vm7  ;;  %v3910_v47 = vadd.s32 24, %v3194_v35  ;;  %6157 = vst [vmem:[#allocation14 + $0xf8] sm:$0xff] %v5805_v39  }
 0x212   :  { %v3172_v24 = vsub.s32 %v9396_v34, %v3171_v15  ;;  %v4576_v33 = vsel %vm9995_vm15, %v2269_v27, 0.0  ;;  %vm4289_vm4 = vmand %vm4097_vm8, %vm4193_vm14  ;;  %v3203_v48 = vshrl.u32 %v9987_v18, 4  ;;  %v5800_v11 = vpack.c.bf16 %v9966_v0, %v9956_v7  ;;  %v10025_v34 = vpop.f32.mrb[69].mxu1 }
 0x213   :  { %6202 = vst [vmem:[#allocation15 + $0xe8] sm:$0xff] %v6035_v52   ;;  %v2080_v55 = vmul.f32 %v9509_v45, %v6527_v5  ;;  %v4577_v44 = vsel %vm4289_vm4, %v2270_v63, 0.0  ;;  %v4006_v46 = vsel %vm3814_vm12, %v3910_v47, %v3194_v35  ;;  %v10027_v18 = vpop.f32.mrb[70].mxu1  ;;  %v10032_v0 = vadd.f32 %v9522_v6, %v2075_v19  ;;  %v10040_v35 = vpop.f32.mrb[69].mxu0 }
 0x214   :  { %vm3620_vm2 = vcmp.ne.s32.totalorder %v3172_v24, 0  ;;  %vm3716_vm13 = vcmp.lt.s32.totalorder %v3172_v24, 0  ;;  %v6030_v12 = vpack.c.bf16 %v4577_v44, %v4576_v33  ;;  %vm4102_vm5 = vcmp.ge.s32.totalorder %v4006_v46, 1  ;;  %6156 = vst [vmem:[#allocation14 + $0xf0] sm:$0xff] %v5800_v11   ;;  %v10038_v8 = vpop.f32.mrb[71].mxu1  ;;  %v10048_v19 = vpop.f32.mrb[70].mxu0 }
 0x215   :  { %vm4198_vm15 = vcmp.lt.s32.totalorder %v4006_v46, 17  ;;  %vm3812_vm1 = vmand %vm3716_vm13, %vm3620_vm2  ;;  %v3908_v27 = vadd.s32 24, %v3172_v24  ;;  %v3204_v7 = vmul.u32 24, %v3203_v48  ;;  %v3181_v63 = vshrl.u32 %v10009_v10, 4  ;;  %v10053_v50 = vpop.f32.mrb[71].mxu0  ;;  %v10071_v46 = vpop.f32.mrb[72].mxu1 }
 0x216   :  { %v10036_v5 = vadd.f32 %v9522_v6, %v2080_v55  ;;  %6201 = vst [vmem:[#allocation15 + $0xe0] sm:$0xff] %v6030_v12   ;;  %v10043_v13 = vmul.u32.u64.low 2863311531, %v9424_v37  ;;  %v10044_v1 = vmul.u32.u64.high 2863311531, %v9424_v37, %v10043_v13  ;;  %v2078_v39 = vmul.f32 %v9509_v45, %v9980_v36  ;;  %vm4294_vm6 = vmand %vm4102_vm5, %vm4198_vm15  ;;  %v10084_v54 = vpop.f32.mrb[72].mxu0 }
 0x217   :  { %v4004_v15 = vsel %vm3812_vm1, %v3908_v27, %v3172_v24  ;;  %v3205_v10 = vsub.s32 %v9413_v25, %v3204_v7  ;;  %v3182_v52 = vmul.u32 24, %v3181_v63  ;;  %v2273_v47 = vmax.f32 %v9977_v17, 0.0 }
 0x218   :  { %vm4100_vm10 = vcmp.ge.s32.totalorder %v4004_v15, 1  ;;  %vm4196_vm0 = vcmp.lt.s32.totalorder %v4004_v15, 17  ;;  %v2276_v24 = vmax.f32 %v9983_v4, 0.0  ;;  %v2274_v25 = vmax.f32 %v10032_v0, 0.0  ;;  %v10080_v0 = vpop.f32.mrb[73].mxu1 }
 0x219   :  { %v10058_v33 = vmul.u32.u64.low 2863311531, %v9459_v40  ;;  %v10059_v48 = vmul.u32.u64.high 2863311531, %v9459_v40, %v10058_v33  ;;  %vm10061_vm3 = vmand %vm4100_vm10, %vm4196_vm0  ;;  %vm3623_vm9 = vcmp.ne.s32.totalorder %v3205_v10, 0  ;;  %vm3719_vm7 = vcmp.lt.s32.totalorder %v3205_v10, 0 }
 0x21a   :  { %v3911_v11 = vadd.s32 24, %v3205_v10  ;;  %v4582_v55 = vsel %vm4294_vm6, %v2275_v59, 0.0  ;;  %vm3815_vm11 = vmand %vm3719_vm7, %vm3623_vm9  ;;  %v3183_v17 = vsub.s32 %v9421_v51, %v3182_v52  ;;  %v3236_v44 = vshrl.u32 %v10044_v1, 4  ;;  %v10082_v51 = vpop.f32.mrb[74].mxu1 }
 0x21b   :  { %v10074_v27 = vadd.f32 %v9522_v6, %v2078_v39  ;;  %v10077_v7 = vmul.u32.u64.low 2863311531, %v9482_v56  ;;  %v10078_v63 = vmul.u32.u64.high 2863311531, %v9482_v56, %v10077_v7  ;;  %v4580_v59 = vsel %vm10061_vm3, %v2273_v47, 0.0  ;;  %v10089_v39 = vpop.f32.mrb[75].mxu1 }
 0x21c   :  { %v4007_v12 = vsel %vm3815_vm11, %v3911_v11, %v3205_v10  ;;  %vm3621_vm12 = vcmp.ne.s32.totalorder %v3183_v17, 0  ;;  %vm3717_vm4 = vcmp.lt.s32.totalorder %v3183_v17, 0  ;;  %v3909_v15 = vadd.s32 24, %v3183_v17  ;;  %v10091_v10 = vpop.f32.mrb[73].mxu0 }
 0x21d   :  { %vm4103_vm8 = vcmp.ge.s32.totalorder %v4007_v12, 1  ;;  %vm4199_vm14 = vcmp.lt.s32.totalorder %v4007_v12, 17  ;;  %v3237_v13 = vmul.u32 24, %v3236_v44  ;;  %v3214_v1 = vshrl.u32 %v10059_v48, 4  ;;  %vm3813_vm13 = vmand %vm3717_vm4, %vm3621_vm12  ;;  %v10099_v36 = vpop.f32.mrb[74].mxu0 }
 0x21e   :  { %vm4295_vm2 = vmand %vm4103_vm8, %vm4199_vm14  ;;  %v2081_v33 = vmul.f32 %v9509_v45, %v9989_v43  ;;  %v10096_v11 = vmul.u32.u64.low 2863311531, %v9496_v61  ;;  %v10097_v12 = vmul.u32.u64.high 2863311531, %v9496_v61, %v10096_v11  ;;  %v4005_v7 = vsel %vm3813_vm13, %v3909_v15, %v3183_v17  ;;  %v10102_v4 = vpop.f32.mrb[75].mxu0 }
 0x21f   :  { %v4583_v52 = vsel %vm4295_vm2, %v2276_v24, 0.0  ;;  %v3238_v44 = vsub.s32 %v9424_v37, %v3237_v13  ;;  %v3215_v48 = vmul.u32 24, %v3214_v1  ;;  %vm4101_vm5 = vcmp.ge.s32.totalorder %v4005_v7, 1  ;;  %v10110_v1 = vpop.f32.mrb[76].mxu1 }
 0x220   :  { %v6045_v47 = vpack.c.bf16 %v4583_v52, %v4582_v55  ;;  %vm4197_vm15 = vcmp.lt.s32.totalorder %v4005_v7, 17  ;;  %v3247_v24 = vshrl.u32 %v10078_v63, 4  ;;  %v2079_v43 = vmul.f32 %v9509_v45, %v9999_v58  ;;  %v10112_v45 = vpop.f32.mrb[77].mxu1 }
 0x221   :  { %vm4293_vm1 = vmand %vm4101_vm5, %vm4197_vm15  ;;  %vm3626_vm6 = vcmp.ne.s32.totalorder %v3238_v44, 0  ;;  %vm3722_vm10 = vcmp.lt.s32.totalorder %v3238_v44, 0  ;;  %v3914_v11 = vadd.s32 24, %v3238_v44  ;;  %v3216_v55 = vsub.s32 %v9459_v40, %v3215_v48 }
 0x222   :  { %6204 = vst [vmem:[#allocation15 + $0xf8] sm:$0xff] %v6045_v47   ;;  %v4581_v17 = vsel %vm4293_vm1, %v2274_v25, 0.0  ;;  %vm3818_vm0 = vmand %vm3722_vm10, %vm3626_vm6  ;;  %v2184_v37 = vadd.f32 %v9522_v6, %v2081_v33  ;;  %v3248_v15 = vmul.u32 24, %v3247_v24  ;;  %v3225_v13 = vshrl.u32 %v10097_v12, 4  ;;  %v10118_v33 = vpop.f32.mrb[78].mxu1  ;;  %v10120_v47 = vpop.f32.mrb[76].mxu0 }
 0x223   :  { %v6040_v63 = vpack.c.bf16 %v4581_v17, %v4580_v59  ;;  %v4010_v52 = vsel %vm3818_vm0, %v3914_v11, %v3238_v44  ;;  %vm3624_vm3 = vcmp.ne.s32.totalorder %v3216_v55, 0  ;;  %vm3720_vm9 = vcmp.lt.s32.totalorder %v3216_v55, 0  ;;  %v10126_v44 = vpop.f32.mrb[79].mxu1  ;;  %v10128_v48 = vpop.f32.mrb[77].mxu0 }
 0x224   :  { %vm4106_vm7 = vcmp.ge.s32.totalorder %v4010_v52, 1  ;;  %vm3816_vm11 = vmand %vm3720_vm9, %vm3624_vm3  ;;  %v3912_v58 = vadd.s32 24, %v3216_v55  ;;  %v3249_v40 = vsub.s32 %v9482_v56, %v3248_v15  ;;  %v10116_v25 = vadd.f32 %v9522_v6, %v2079_v43  ;;  %v10130_v6 = vld [vmem:[#allocation11] ss:$0 sm:$0xff]  ;;  %v10134_v43 = vpop.f32.mrb[78].mxu0 }
 0x225   :  { %6203 = vst [vmem:[#allocation15 + $0xf0] sm:$0xff] %v6040_v63   ;;  %vm4202_vm8 = vcmp.lt.s32.totalorder %v4010_v52, 17  ;;  %v3226_v59 = vmul.u32 24, %v3225_v13  ;;  %v5815_v12 = vpack.c.bf16 %v10005_v28, %v9991_v23  ;;  %v5810_v7 = vpack.c.bf16 %v10012_v38, %v10001_v14  ;;  %v10137_v28 = vpop.f32.mrb[79].mxu0  ;;  %v10155_v52 = vld [vmem:[#allocation13] ss:$0 sm:$0xff] }
 0x226   :  { %v4008_v56 = vsel %vm3816_vm11, %v3912_v58, %v3216_v55  ;;  %vm3627_vm14 = vcmp.ne.s32.totalorder %v3249_v40, 0  ;;  %vm3723_vm12 = vcmp.lt.s32.totalorder %v3249_v40, 0  ;;  %v2084_v24 = vmul.f32 %v10130_v6, %v10023_v16  ;;  %vm10141_vm5 = vmand %vm4106_vm7, %vm4202_vm8  ;;  %v10179_v38 = vpop.f32.mrb[80].mxu0 }
 0x227   :  { %vm4104_vm4 = vcmp.ge.s32.totalorder %v4008_v56, 1  ;;  %vm4200_vm2 = vcmp.lt.s32.totalorder %v4008_v56, 17  ;;  %vm3819_vm13 = vmand %vm3723_vm12, %vm3627_vm14  ;;  %v3915_v23 = vadd.s32 24, %v3249_v40  ;;  %v3227_v14 = vsub.s32 %v9496_v61, %v3226_v59  ;;  %6159 = vst [vmem:[#allocation14 + $0x108] sm:$0xff] %v5815_v12  }
 0x228   :  { %6158 = vst [vmem:[#allocation14 + $0x100] sm:$0xff] %v5810_v7   ;;  %v2277_v16 = vmax.f32 %v10074_v27, 0.0  ;;  %v2280_v11 = vmax.f32 %v2184_v37, 0.0  ;;  %v10147_v55 = vmul.u32.u64.low 2863311531, %v9499_v22  ;;  %v10148_v17 = vmul.u32.u64.high 2863311531, %v9499_v22, %v10147_v55  ;;  %vm10150_vm15 = vmand %vm4104_vm4, %vm4200_vm2  ;;  %v10160_v37 = vpop.f32.mrb[80].mxu1 }
 0x229   :  { %v4011_v61 = vsel %vm3819_vm13, %v3915_v23, %v3249_v40  ;;  %v2278_v13 = vmax.f32 %v10116_v25, 0.0  ;;  %vm3625_vm1 = vcmp.ne.s32.totalorder %v3227_v14, 0  ;;  %vm3721_vm6 = vcmp.lt.s32.totalorder %v3227_v14, 0  ;;  %v10172_v7 = vpop.f32.mrb[81].mxu1 }
 0x22a   :  { %vm4107_vm10 = vcmp.ge.s32.totalorder %v4011_v61, 1  ;;  %vm4203_vm0 = vcmp.lt.s32.totalorder %v4011_v61, 17  ;;  %vm3817_vm3 = vmand %vm3721_vm6, %vm3625_vm1  ;;  %v3913_v63 = vadd.s32 24, %v3227_v14  ;;  %v10158_v27 = vadd.f32 %v10155_v52, %v2084_v24  ;;  %v10177_v55 = vpop.f32.mrb[82].mxu1 }
 0x22b   :  { %v10987_v58 = vmax.f32 %v10036_v5, 0.0  ;;  %vm4299_vm9 = vmand %vm4107_vm10, %vm4203_vm0  ;;  %v2082_v25 = vmul.f32 %v10130_v6, %v10025_v34  ;;  %v10169_v59 = vmul.u32.u64.low 2863311531, %v9652_v57  ;;  %v10170_v12 = vmul.u32.u64.high 2863311531, %v9652_v57, %v10169_v59 }
 0x22c   :  { %v4584_v56 = vsel %vm10150_vm15, %v2277_v16, 0.0  ;;  %v4587_v24 = vsel %vm4299_vm9, %v2280_v11, 0.0  ;;  %v4009_v23 = vsel %vm3817_vm3, %v3913_v63, %v3227_v14  ;;  %v3280_v5 = vshrl.u32 %v10148_v17, 4  ;;  %v10185_v59 = vpop.f32.mrb[81].mxu0 }
 0x22d   :  { %v4586_v40 = vsel %vm10141_vm5, %v10987_v58, 0.0  ;;  %vm4105_vm7 = vcmp.ge.s32.totalorder %v4009_v23, 1  ;;  %vm4201_vm11 = vcmp.lt.s32.totalorder %v4009_v23, 17  ;;  %v2085_v34 = vmul.f32 %v10130_v6, %v10027_v18  ;;  %v10183_v58 = vpop.f32.mrb[83].mxu1  ;;  %10988 = vst [vmem:[#allocation24_spill] sm:$0xff] %v10185_v59  ;;  %v10192_v15 = vpop.f32.mrb[82].mxu0 }
 0x22e   :  { %v6055_v61 = vpack.c.bf16 %v4587_v24, %v4586_v40  ;;  %vm4297_vm8 = vmand %vm4105_vm7, %vm4201_vm11  ;;  %v2283_v16 = vmax.f32 %v10158_v27, 0.0  ;;  %v3281_v14 = vmul.u32 24, %v3280_v5  ;;  %v10195_v40 = vadd.f32 %v10155_v52, %v2082_v25  ;;  %v10200_v23 = vpop.f32.mrb[83].mxu0 }
 0x22f   :  { %v10189_v11 = vmul.u32.u64.low 2863311531, %v9688_v32  ;;  %v10190_v17 = vmul.u32.u64.high 2863311531, %v9688_v32, %v10189_v11  ;;  %v4585_v63 = vsel %vm4297_vm8, %v2278_v13, 0.0  ;;  %v3258_v18 = vshrl.u32 %v10170_v12, 4 }
 0x230   :  { %6206 = vst [vmem:[#allocation15 + $0x108] sm:$0xff] %v6055_v61   ;;  %v5825_v24 = vpack.c.bf16 %v10048_v19, %v10029_v9  ;;  %v6050_v27 = vpack.c.bf16 %v4585_v63, %v4584_v56  ;;  %v3282_v5 = vsub.s32 %v9499_v22, %v3281_v14  ;;  %v2083_v11 = vmul.f32 %v10130_v6, %v10038_v8  ;;  %v10215_v8 = vpop.f32.mrb[84].mxu1 }
 0x231   :  { %v5820_v61 = vpack.c.bf16 %v10053_v50, %v10040_v35  ;;  %v3259_v13 = vmul.u32 24, %v3258_v18  ;;  %v10208_v25 = vadd.f32 %v10155_v52, %v2085_v34  ;;  %v3291_v22 = vshrl.u32 %v10190_v17, 4  ;;  %v10224_v34 = vpop.f32.mrb[85].mxu1 }
 0x232   :  { %v10211_v12 = vmul.u32.u64.low 2863311531, %v9693_v30  ;;  %v10212_v59 = vmul.u32.u64.high 2863311531, %v9693_v30, %v10211_v12  ;;  %6161 = vst [vmem:[#allocation14 + $0x118] sm:$0xff] %v5825_v24   ;;  %6205 = vst [vmem:[#allocation15 + $0x100] sm:$0xff] %v6050_v27   ;;  %vm3630_vm14 = vcmp.ne.s32.totalorder %v3282_v5, 0  ;;  %vm3726_vm12 = vcmp.lt.s32.totalorder %v3282_v5, 0 }
 0x233   :  { %v3918_v9 = vadd.s32 24, %v3282_v5  ;;  %6160 = vst [vmem:[#allocation14 + $0x110] sm:$0xff] %v5820_v61   ;;  %vm3822_vm4 = vmand %vm3726_vm12, %vm3630_vm14  ;;  %v3260_v35 = vsub.s32 %v9652_v57, %v3259_v13  ;;  %v2088_v19 = vmul.f32 %v10130_v6, %v10071_v46  ;;  %v3292_v63 = vmul.u32 24, %v3291_v22  ;;  %v10231_v24 = vpop.f32.mrb[86].mxu1  ;;  %v10233_v57 = vpop.f32.mrb[84].mxu0 }
 0x234   :  { %v10221_v50 = vmul.u32.u64.low 2863311531, %v9723_v20  ;;  %v10222_v56 = vmul.u32.u64.high 2863311531, %v9723_v20, %v10221_v50  ;;  %v10227_v18 = vadd.f32 %v10155_v52, %v2083_v11  ;;  %v2086_v17 = vmul.f32 %v10130_v6, %v10080_v0  ;;  %v10235_v46 = vpop.f32.mrb[87].mxu1  ;;  %v10237_v27 = vpop.f32.mrb[85].mxu0 }
 0x235   :  { %v4014_v14 = vsel %vm3822_vm4, %v3918_v9, %v3282_v5  ;;  %vm3628_vm5 = vcmp.ne.s32.totalorder %v3260_v35, 0  ;;  %vm3724_vm15 = vcmp.lt.s32.totalorder %v3260_v35, 0  ;;  %10989 = vst [vmem:[#allocation25_spill] sm:$0xff] %v10237_v27  ;;  %v2281_v11 = vmax.f32 %v10195_v40, 0.0  ;;  %v10246_v12 = vpop.f32.mrb[86].mxu0 }
 0x236   :  { %vm4110_vm2 = vcmp.ge.s32.totalorder %v4014_v14, 1  ;;  %vm4206_vm13 = vcmp.lt.s32.totalorder %v4014_v14, 17  ;;  %v3916_v61 = vadd.s32 24, %v3260_v35  ;;  %v3293_v0 = vsub.s32 %v9688_v32, %v3292_v63  ;;  %10992 = vst [vmem:[#allocation26_spill] sm:$0xff] %v10246_v12  ;;  %vm3820_vm6 = vmand %vm3724_vm15, %vm3628_vm5  ;;  %v10255_v27 = vpop.f32.mrb[87].mxu0  ;;  %v10263_v12 = vpop.f32.mrb[88].mxu1 }
 0x237   :  { %vm10239_vm1 = vmand %vm4110_vm2, %vm4206_vm13  ;;  %v3269_v13 = vshrl.u32 %v10212_v59, 4  ;;  %v2284_v9 = vmax.f32 %v10208_v25, 0.0  ;;  %v10250_v22 = vadd.f32 %v10155_v52, %v2088_v19  ;;  %v3324_v50 = vshrl.u32 %v10222_v56, 4 }
 0x238   :  { %v2089_v14 = vmul.f32 %v10130_v6, %v10082_v51  ;;  %v4012_v40 = vsel %vm3820_vm6, %v3916_v61, %v3260_v35  ;;  %vm3631_vm10 = vcmp.ne.s32.totalorder %v3293_v0, 0  ;;  %vm3727_vm0 = vcmp.lt.s32.totalorder %v3293_v0, 0 }
 0x239   :  { %v3919_v32 = vadd.s32 24, %v3293_v0  ;;  %v4590_v59 = vsel %vm10239_vm1, %v2283_v16, 0.0  ;;  %vm3823_vm3 = vmand %vm3727_vm0, %vm3631_vm10  ;;  %v2282_v25 = vmax.f32 %v10227_v18, 0.0  ;;  %v3270_v63 = vmul.u32 24, %v3269_v13  ;;  %v10269_v16 = vpop.f32.mrb[89].mxu1 }
 0x23a   :  { %v10261_v19 = vadd.f32 %v10155_v52, %v2086_v17  ;;  %vm4108_vm9 = vcmp.ge.s32.totalorder %v4012_v40, 1  ;;  %vm4204_vm7 = vcmp.lt.s32.totalorder %v4012_v40, 17  ;;  %v3325_v51 = vmul.u32 24, %v3324_v50  ;;  %v10277_v13 = vpop.f32.mrb[90].mxu1  ;;  %v10279_v50 = vpop.f32.mrb[88].mxu0 }
 0x23b   :  { %v4015_v56 = vsel %vm3823_vm3, %v3919_v32, %v3293_v0  ;;  %v3271_v35 = vsub.s32 %v9693_v30, %v3270_v63  ;;  %v10267_v5 = vadd.f32 %v10155_v52, %v2089_v14  ;;  %10993 = vst [vmem:[#allocation27_spill] sm:$0xff] %v10277_v13  ;;  %10994 = vst [vmem:[#allocation28_spill] sm:$0xff] %v10279_v50  ;;  %v10287_v63 = vpop.f32.mrb[91].mxu1 }
 0x23c   :  { %vm4111_vm11 = vcmp.ge.s32.totalorder %v4015_v56, 1  ;;  %vm4207_vm8 = vcmp.lt.s32.totalorder %v4015_v56, 17  ;;  %v3326_v17 = vsub.s32 %v9723_v20, %v3325_v51  ;;  %vm10283_vm12 = vmand %vm4108_vm9, %vm4204_vm7  ;;  %10997 = vst [vmem:[#allocation29_spill] sm:$0xff] %v10287_v63  ;;  %v10289_v20 = vpop.f32.mrb[89].mxu0 }
 0x23d   :  { %vm4303_vm14 = vmand %vm4111_vm11, %vm4207_vm8  ;;  %v10274_v61 = vmul.u32.u64.low 2863311531, %v9744_v21  ;;  %v10275_v0 = vmul.u32.u64.high 2863311531, %v9744_v21, %v10274_v61  ;;  %vm3629_vm4 = vcmp.ne.s32.totalorder %v3271_v35, 0  ;;  %vm3725_vm2 = vcmp.lt.s32.totalorder %v3271_v35, 0 }
 0x23e   :  { %v4591_v14 = vsel %vm4303_vm14, %v2284_v9, 0.0  ;;  %v3917_v32 = vadd.s32 24, %v3271_v35  ;;  %vm3821_vm13 = vmand %vm3725_vm2, %vm3629_vm4  ;;  %vm3634_vm5 = vcmp.ne.s32.totalorder %v3326_v17, 0  ;;  %vm3730_vm15 = vcmp.lt.s32.totalorder %v3326_v17, 0  ;;  %v10291_v61 = vpop.f32.mrb[90].mxu0 }
 0x23f   :  { %v6065_v56 = vpack.c.bf16 %v4591_v14, %v4590_v59  ;;  %v3922_v51 = vadd.s32 24, %v3326_v17  ;;  %vm3826_vm1 = vmand %vm3730_vm15, %vm3634_vm5  ;;  %v10294_v18 = vmul.u32.u64.low 2863311531, %v9769_v26  ;;  %v10295_v50 = vmul.u32.u64.high 2863311531, %v9769_v26, %v10294_v18  ;;  %v10299_v13 = vpop.f32.mrb[91].mxu0 }
 0x240   :  { %v4013_v40 = vsel %vm3821_vm13, %v3917_v32, %v3271_v35  ;;  %v2087_v9 = vmul.f32 %v10130_v6, %v10089_v39  ;;  %10998 = vst [vmem:[#allocation30_spill] sm:$0xff] %v10299_v13  ;;  %v3302_v14 = vshrl.u32 %v10275_v0, 4  ;;  %v4588_v63 = vsel %vm10283_vm12, %v2281_v11, 0.0 }
 0x241   :  { %6208 = vst [vmem:[#allocation15 + $0x118] sm:$0xff] %v6065_v56   ;;  %vm4109_vm6 = vcmp.ge.s32.totalorder %v4013_v40, 1  ;;  %vm4205_vm10 = vcmp.lt.s32.totalorder %v4013_v40, 17  ;;  %v4018_v59 = vsel %vm3826_vm1, %v3922_v51, %v3326_v17  ;;  %v5835_v35 = vpack.c.bf16 %v10099_v36, %v10084_v54  ;;  %v10310_v56 = vpop.f32.mrb[92].mxu1 }
 0x242   :  { %vm4301_vm0 = vmand %vm4109_vm6, %vm4205_vm10  ;;  %vm4114_vm3 = vcmp.ge.s32.totalorder %v4018_v59, 1  ;;  %vm4210_vm9 = vcmp.lt.s32.totalorder %v4018_v59, 17  ;;  %v3303_v32 = vmul.u32 24, %v3302_v14  ;;  %v3335_v0 = vshrl.u32 %v10295_v50, 4  ;;  %v10318_v51 = vpop.f32.mrb[93].mxu1  ;;  %v10328_v50 = vpop.f32.mrb[92].mxu0 }
 0x243   :  { %v4589_v18 = vsel %vm4301_vm0, %v2282_v25, 0.0  ;;  %v10307_v39 = vmul.u32.u64.low 2863311531, %v9793_v41  ;;  %v10308_v13 = vmul.u32.u64.high 2863311531, %v9793_v41, %v10307_v39  ;;  %v10314_v30 = vadd.f32 %v10155_v52, %v2087_v9  ;;  %6163 = vst [vmem:[#allocation14 + $0x128] sm:$0xff] %v5835_v35   ;;  %10999 = vst [vmem:[#allocation31_spill] sm:$0xff] %v10318_v51 }
 0x244   :  { %v6060_v17 = vpack.c.bf16 %v4589_v18, %v4588_v63  ;;  %v5830_v11 = vpack.c.bf16 %v10102_v4, %v10091_v10  ;;  %v3304_v36 = vsub.s32 %v9744_v21, %v3303_v32  ;;  %v10326_v63 = vpop.f32.mrb[94].mxu1  ;;  %vm10332_vm7 = vmand %vm4114_vm3, %vm4210_vm9  ;;  %v3336_v4 = vmul.u32 24, %v3335_v0  ;;  %v10344_v18 = vpop.f32.mrb[93].mxu0 }
 0x245   :  { %v10323_v25 = vmul.u32.u64.low 2863311531, %v9829_v62  ;;  %v10324_v40 = vmul.u32.u64.high 2863311531, %v9829_v62, %v10323_v25  ;;  %v2092_v21 = vmul.f32 %v10130_v6, %v10110_v1  ;;  %v10342_v35 = vpop.f32.mrb[95].mxu1  ;;  %v3313_v32 = vshrl.u32 %v10308_v13, 4  ;;  %v10347_v39 = vpop.f32.mrb[94].mxu0 }
 0x246   :  { %6207 = vst [vmem:[#allocation15 + $0x110] sm:$0xff] %v6060_v17   ;;  %6162 = vst [vmem:[#allocation14 + $0x120] sm:$0xff] %v5830_v11   ;;  %v10339_v10 = vmul.u32.u64.low 2863311531, %v9840_v29  ;;  %v10340_v14 = vmul.u32.u64.high 2863311531, %v9840_v29, %v10339_v10  ;;  %vm3632_vm11 = vcmp.ne.s32.totalorder %v3304_v36, 0  ;;  %vm3728_vm8 = vcmp.lt.s32.totalorder %v3304_v36, 0 }
 0x247   :  { %11002 = vst [vmem:[#allocation32_spill] sm:$0xff] %v10342_v35  ;;  %v3920_v59 = vadd.s32 24, %v3304_v36  ;;  %vm3824_vm14 = vmand %vm3728_vm8, %vm3632_vm11  ;;  %v2288_v17 = vmax.f32 %v10267_v5, 0.0  ;;  %v3337_v1 = vsub.s32 %v9769_v26, %v3336_v4  ;;  %v2286_v0 = vmax.f32 %v10314_v30, 0.0  ;;  %v10354_v25 = vpop.f32.mrb[95].mxu0 }
 0x248   :  { %v2090_v11 = vmul.f32 %v10130_v6, %v10112_v45  ;;  %v11003_v10 = vmax.f32 %v10250_v22, 0.0  ;;  %v3314_v35 = vmul.u32 24, %v3313_v32  ;;  %v3368_v51 = vshrl.u32 %v10324_v40, 4 }
 0x249   :  { %v4016_v13 = vsel %vm3824_vm14, %v3920_v59, %v3304_v36  ;;  %vm3635_vm2 = vcmp.ne.s32.totalorder %v3337_v1, 0  ;;  %vm3731_vm13 = vcmp.lt.s32.totalorder %v3337_v1, 0  ;;  %v3923_v26 = vadd.s32 24, %v3337_v1 }
 0x24a   :  { %v4594_v54 = vsel %vm10332_vm7, %v11003_v10, 0.0  ;;  %vm4112_vm12 = vcmp.ge.s32.totalorder %v4016_v13, 1  ;;  %vm4208_vm4 = vcmp.lt.s32.totalorder %v4016_v13, 17  ;;  %v3315_v5 = vsub.s32 %v9793_v41, %v3314_v35  ;;  %vm3827_vm5 = vmand %vm3731_vm13, %vm3635_vm2 }
 0x24b   :  { %v10363_v45 = vadd.f32 %v10155_v52, %v2092_v21  ;;  %v3369_v30 = vmul.u32 24, %v3368_v51  ;;  %v10366_v22 = vadd.f32 %v10155_v52, %v2090_v11  ;;  %v3346_v36 = vshrl.u32 %v10340_v14, 4  ;;  %vm10373_vm15 = vmand %vm4112_vm12, %vm4208_vm4 }
 0x24c   :  { %v2093_v40 = vmul.f32 %v10130_v6, %v10118_v33  ;;  %v2091_v9 = vmul.f32 %v10130_v6, %v10126_v44  ;;  %v4019_v41 = vsel %vm3827_vm5, %v3923_v26, %v3337_v1  ;;  %vm3633_vm1 = vcmp.ne.s32.totalorder %v3315_v5, 0 }
 0x24d   :  { %vm3729_vm6 = vcmp.lt.s32.totalorder %v3315_v5, 0  ;;  %v3921_v51 = vadd.s32 24, %v3315_v5  ;;  %vm4115_vm10 = vcmp.ge.s32.totalorder %v4019_v41, 1  ;;  %vm4211_vm0 = vcmp.lt.s32.totalorder %v4019_v41, 17 }
 0x24e   :  { %vm3825_vm3 = vmand %vm3729_vm6, %vm3633_vm1  ;;  %v3370_v21 = vsub.s32 %v9829_v62, %v3369_v30  ;;  %v3347_v14 = vmul.u32 24, %v3346_v36  ;;  %v2291_v33 = vmax.f32 %v10363_v45, 0.0  ;;  %v11006_v62 = vmax.f32 %v10261_v19, 0.0 }
 0x24f   :  { %vm4307_vm9 = vmand %vm4115_vm10, %vm4211_vm0  ;;  %v4017_v35 = vsel %vm3825_vm3, %v3921_v51, %v3315_v5  ;;  %v10380_v44 = vmul.u32.u64.low 2863311531, %v9887_v42  ;;  %v10381_v59 = vmul.u32.u64.high 2863311531, %v9887_v42, %v10380_v44  ;;  %v5845_v36 = vpack.c.bf16 %v10134_v43, %v10120_v47 }
 0x250   :  { %v4595_v32 = vsel %vm4307_vm9, %v2288_v17, 0.0  ;;  %vm4113_vm7 = vcmp.ge.s32.totalorder %v4017_v35, 1  ;;  %vm4209_vm11 = vcmp.lt.s32.totalorder %v4017_v35, 17  ;;  %vm3638_vm8 = vcmp.ne.s32.totalorder %v3370_v21, 0 }
 0x251   :  { %v6075_v1 = vpack.c.bf16 %v4595_v32, %v4594_v54  ;;  %vm4305_vm14 = vmand %vm4113_vm7, %vm4209_vm11  ;;  %vm3734_vm12 = vcmp.lt.s32.totalorder %v3370_v21, 0  ;;  %v3926_v11 = vadd.s32 24, %v3370_v21  ;;  %v3348_v10 = vsub.s32 %v9840_v29, %v3347_v14  ;;  %6165 = vst [vmem:[#allocation14 + $0x138] sm:$0xff] %v5845_v36  }
 0x252   :  { %v4592_v13 = vsel %vm10373_vm15, %v11006_v62, 0.0  ;;  %v4593_v26 = vsel %vm4305_vm14, %v2286_v0, 0.0  ;;  %vm3830_vm4 = vmand %vm3734_vm12, %vm3638_vm8  ;;  %v10389_v5 = vmul.u32.u64.low 2863311531, %v9892_v60  ;;  %v10390_v45 = vmul.u32.u64.high 2863311531, %v9892_v60, %v10389_v5 }
 0x253   :  { %6210 = vst [vmem:[#allocation15 + $0x128] sm:$0xff] %v6075_v1   ;;  %v6070_v17 = vpack.c.bf16 %v4593_v26, %v4592_v13  ;;  %v4022_v30 = vsel %vm3830_vm4, %v3926_v11, %v3370_v21  ;;  %vm3636_vm2 = vcmp.ne.s32.totalorder %v3348_v10, 0  ;;  %vm3732_vm13 = vcmp.lt.s32.totalorder %v3348_v10, 0 }
 0x254   :  { %vm4118_vm5 = vcmp.ge.s32.totalorder %v4022_v30, 1  ;;  %vm4214_vm1 = vcmp.lt.s32.totalorder %v4022_v30, 17  ;;  %vm3828_vm6 = vmand %vm3732_vm13, %vm3636_vm2  ;;  %v3924_v29 = vadd.s32 24, %v3348_v10  ;;  %v3379_v19 = vshrl.u32 %v10381_v59, 4 }
 0x255   :  { %6209 = vst [vmem:[#allocation15 + $0x120] sm:$0xff] %v6070_v17   ;;  %v2196_v54 = vadd.f32 %v10155_v52, %v2093_v40  ;;  %v2194_v0 = vadd.f32 %v10155_v52, %v2091_v9  ;;  %v5840_v4 = vpack.c.bf16 %v10137_v28, %v10128_v48  ;;  %vm4310_vm15 = vmand %vm4118_vm5, %vm4214_vm1  ;;  %v3357_v21 = vshrl.u32 %v10390_v45, 4 }
 0x256   :  { %v4020_v41 = vsel %vm3828_vm6, %v3924_v29, %v3348_v10  ;;  %v3380_v51 = vmul.u32 24, %v3379_v19  ;;  %v10401_v14 = vadd.s32 688, %v7804_v3  ;;  %v2096_v40 = vmul.f32 %v10130_v6, %v10160_v37 }
 0x257   :  { %vm4116_vm10 = vcmp.ge.s32.totalorder %v4020_v41, 1  ;;  %vm4212_vm0 = vcmp.lt.s32.totalorder %v4020_v41, 17  ;;  %6164 = vst [vmem:[#allocation14 + $0x130] sm:$0xff] %v5840_v4   ;;  %v10406_v47 = vadd.s32 672, %v7804_v3  ;;  %v3358_v43 = vmul.u32 24, %v3357_v21 }
 0x258   :  { %v3381_v48 = vsub.s32 %v9887_v42, %v3380_v51  ;;  %v10410_v28 = vmul.u32.u64.low 2863311531, %v9907_v53  ;;  %v10411_v9 = vmul.u32.u64.high 2863311531, %v9907_v53, %v10410_v28  ;;  %v4598_v35 = vsel %vm4310_vm15, %v2291_v33, 0.0  ;;  %vm10414_vm3 = vmand %vm4116_vm10, %vm4212_vm0 }
 0x259   :  { %v2289_v44 = vmax.f32 %v10366_v22, 0.0  ;;  %v2292_v59 = vmax.f32 %v2196_v54, 0.0  ;;  %v2290_v32 = vmax.f32 %v2194_v0, 0.0  ;;  %v3359_v11 = vsub.s32 %v9892_v60, %v3358_v43 }
 0x25a   :  { %vm3639_vm9 = vcmp.ne.s32.totalorder %v3381_v48, 0  ;;  %vm3735_vm7 = vcmp.lt.s32.totalorder %v3381_v48, 0  ;;  %v3927_v37 = vadd.s32 24, %v3381_v48  ;;  %v10420_v42 = vadd.f32 %v10155_v52, %v2096_v40 }
 0x25b   :  { %vm3831_vm11 = vmand %vm3735_vm7, %vm3639_vm9  ;;  %v10423_v10 = vmul.u32.u64.low 2863311531, %v9910_v31  ;;  %v10424_v33 = vmul.u32.u64.high 2863311531, %v9910_v31, %v10423_v10  ;;  %v2097_v22 = vmul.f32 %v10130_v6, %v10177_v55  ;;  %vm3637_vm8 = vcmp.ne.s32.totalorder %v3359_v11, 0 }
 0x25c   :  { %v4023_v62 = vsel %vm3831_vm11, %v3927_v37, %v3381_v48  ;;  %vm3733_vm14 = vcmp.lt.s32.totalorder %v3359_v11, 0  ;;  %v3925_v13 = vadd.s32 24, %v3359_v11  ;;  %v3412_v60 = vshrl.u32 %v10411_v9, 4 }
 0x25d   :  { %vm4119_vm12 = vcmp.ge.s32.totalorder %v4023_v62, 1  ;;  %vm4215_vm4 = vcmp.lt.s32.totalorder %v4023_v62, 17  ;;  %vm3829_vm2 = vmand %vm3733_vm14, %vm3637_vm8  ;;  %v2094_v26 = vmul.f32 %v10130_v6, %v10172_v7  ;;  %v4596_v5 = vsel %vm10414_vm3, %v2289_v44, 0.0 }
 0x25e   :  { %vm4311_vm13 = vmand %vm4119_vm12, %vm4215_vm4  ;;  %v4021_v45 = vsel %vm3829_vm2, %v3925_v13, %v3359_v11  ;;  %v10434_v17 = vmul.u32.u64.low 2863311531, %v9915_v49  ;;  %v10435_v55 = vmul.u32.u64.high 2863311531, %v9915_v49, %v10434_v17  ;;  %v3413_v29 = vmul.u32 24, %v3412_v60 }
 0x25f   :  { %v4599_v30 = vsel %vm4311_vm13, %v2292_v59, 0.0  ;;  %vm4117_vm5 = vcmp.ge.s32.totalorder %v4021_v45, 1  ;;  %vm4213_vm1 = vcmp.lt.s32.totalorder %v4021_v45, 17  ;;  %v3390_v54 = vshrl.u32 %v10424_v33, 4 }
 0x260   :  { %v6085_v19 = vpack.c.bf16 %v4599_v30, %v4598_v35  ;;  %vm4309_vm6 = vmand %vm4117_vm5, %vm4213_vm1  ;;  %v10439_v0 = vadd.f32 %v10155_v52, %v2097_v22  ;;  %v5855_v7 = vpack.c.bf16 %v10192_v15, %v10179_v38  ;;  %v3414_v4 = vsub.s32 %v9907_v53, %v3413_v29  ;;  %v11009_v38 = vld [vmem:[#allocation24_spill] sm:$0xff] }
 0x261   :  { %v4597_v36 = vsel %vm4309_vm6, %v2290_v32, 0.0  ;;  %v10445_v41 = vmul.u32.u64.low 2863311531, %v9918_v2  ;;  %v10446_v51 = vmul.u32.u64.high 2863311531, %v9918_v2, %v10445_v41  ;;  %v3391_v40 = vmul.u32 24, %v3390_v54 }
 0x262   :  { %6212 = vst [vmem:[#allocation15 + $0x138] sm:$0xff] %v6085_v19   ;;  %v6080_v21 = vpack.c.bf16 %v4597_v36, %v4596_v5  ;;  %v3423_v48 = vshrl.u32 %v10435_v55, 4  ;;  %v2095_v43 = vmul.f32 %v10130_v6, %v10183_v58  ;;  %6167 = vst [vmem:[#allocation14 + $0x148] sm:$0xff] %v5855_v7   ;;  %vm3642_vm15 = vcmp.ne.s32.totalorder %v3414_v4, 0 }
 0x263   :  { %vm3738_vm10 = vcmp.lt.s32.totalorder %v3414_v4, 0  ;;  %v3930_v28 = vadd.s32 24, %v3414_v4  ;;  %v5850_v15 = vpack.c.bf16 %v10200_v23, %v11009_v38  ;;  %v2295_v53 = vmax.f32 %v10420_v42, 0.0 }
 0x264   :  { %6211 = vst [vmem:[#allocation15 + $0x130] sm:$0xff] %v6080_v21   ;;  %vm3834_vm0 = vmand %vm3738_vm10, %vm3642_vm15  ;;  %v2197_v9 = vadd.f32 %v10155_v52, %v2094_v26  ;;  %v3392_v35 = vsub.s32 %v9910_v31, %v3391_v40  ;;  %v3424_v44 = vmul.u32 24, %v3423_v48  ;;  %v3401_v32 = vshrl.u32 %v10446_v51, 4 }
 0x265   :  { %v4026_v59 = vsel %vm3834_vm0, %v3930_v28, %v3414_v4  ;;  %6166 = vst [vmem:[#allocation14 + $0x140] sm:$0xff] %v5850_v15   ;;  %v10458_v58 = vmul.u32.u64.low 2863311531, %v10401_v14  ;;  %v10459_v1 = vmul.u32.u64.high 2863311531, %v10401_v14, %v10458_v58  ;;  %v2296_v23 = vmax.f32 %v10439_v0, 0.0 }
 0x266   :  { %vm3640_vm3 = vcmp.ne.s32.totalorder %v3392_v35, 0  ;;  %vm3736_vm9 = vcmp.lt.s32.totalorder %v3392_v35, 0  ;;  %v2198_v37 = vadd.f32 %v10155_v52, %v2095_v43  ;;  %v3928_v11 = vadd.s32 24, %v3392_v35 }
 0x267   :  { %v3425_v42 = vsub.s32 %v9915_v49, %v3424_v44  ;;  %v3402_v10 = vmul.u32 24, %v3401_v32  ;;  %v2100_v31 = vmul.f32 %v10130_v6, %v10215_v8  ;;  %vm4122_vm7 = vcmp.ge.s32.totalorder %v4026_v59, 1  ;;  %vm3832_vm8 = vmand %vm3736_vm9, %vm3640_vm3 }
 0x268   :  { %vm4218_vm11 = vcmp.lt.s32.totalorder %v4026_v59, 17  ;;  %v10467_v33 = vmul.u32.u64.low 2863311531, %v10406_v47  ;;  %v10468_v22 = vmul.u32.u64.high 2863311531, %v10406_v47, %v10467_v33  ;;  %v4024_v62 = vsel %vm3832_vm8, %v3928_v11, %v3392_v35  ;;  %v11013_v59 = vld [vmem:[#allocation25_spill] sm:$0xff] }
 0x269   :  { %vm3643_vm14 = vcmp.ne.s32.totalorder %v3425_v42, 0  ;;  %vm3739_vm12 = vcmp.lt.s32.totalorder %v3425_v42, 0  ;;  %v3931_v13 = vadd.s32 24, %v3425_v42  ;;  %vm4120_vm4 = vcmp.ge.s32.totalorder %v4024_v62, 1  ;;  %vm4314_vm5 = vmand %vm4122_vm7, %vm4218_vm11 }
 0x26a   :  { %vm4216_vm2 = vcmp.lt.s32.totalorder %v4024_v62, 17  ;;  %vm3835_vm13 = vmand %vm3739_vm12, %vm3643_vm14  ;;  %v3403_v49 = vsub.s32 %v9918_v2, %v3402_v10  ;;  %v2098_v60 = vmul.f32 %v10130_v6, %v10224_v34  ;;  %v2293_v8 = vmax.f32 %v2197_v9, 0.0 }
 0x26b   :  { %v4027_v26 = vsel %vm3835_vm13, %v3931_v13, %v3425_v42  ;;  %v2294_v5 = vmax.f32 %v2198_v37, 0.0  ;;  %v3456_v45 = vshrl.u32 %v10459_v1, 4  ;;  %vm10474_vm1 = vmand %vm4120_vm4, %vm4216_vm2  ;;  %v10479_v55 = vadd.f32 %v10155_v52, %v2100_v31 }
 0x26c   :  { %vm4123_vm6 = vcmp.ge.s32.totalorder %v4027_v26, 1  ;;  %vm4219_vm15 = vcmp.lt.s32.totalorder %v4027_v26, 17  ;;  %vm3641_vm10 = vcmp.ne.s32.totalorder %v3403_v49, 0  ;;  %vm3737_vm3 = vcmp.lt.s32.totalorder %v3403_v49, 0 }
 0x26d   :  { %vm4315_vm0 = vmand %vm4123_vm6, %vm4219_vm15  ;;  %v3929_v2 = vadd.s32 24, %v3403_v49  ;;  %v3457_v34 = vmul.u32 24, %v3456_v45  ;;  %v3434_v30 = vshrl.u32 %v10468_v22, 4  ;;  %v4602_v29 = vsel %vm4314_vm5, %v2295_v53, 0.0 }
 0x26e   :  { %v4603_v19 = vsel %vm4315_vm0, %v2296_v23, 0.0  ;;  %vm3833_vm9 = vmand %vm3737_vm3, %vm3641_vm10  ;;  %v10483_v54 = vadd.f32 %v10155_v52, %v2098_v60  ;;  %v2397_v0 = vadd.s32 696, %v7804_v3  ;;  %v4600_v51 = vsel %vm10474_vm1, %v2293_v8, 0.0 }
 0x26f   :  { %v6095_v7 = vpack.c.bf16 %v4603_v19, %v4602_v29  ;;  %v4025_v36 = vsel %vm3833_vm9, %v3929_v2, %v3403_v49  ;;  %v3458_v4 = vsub.s32 %v10401_v14, %v3457_v34  ;;  %v3435_v41 = vmul.u32 24, %v3434_v30 }
 0x270   :  { %vm4121_vm7 = vcmp.ge.s32.totalorder %v4025_v36, 1  ;;  %vm4217_vm11 = vcmp.lt.s32.totalorder %v4025_v36, 17  ;;  %v2101_v21 = vmul.f32 %v10130_v6, %v10231_v24  ;;  %v2099_v38 = vmul.f32 %v10130_v6, %v10235_v46 }
 0x271   :  { %6214 = vst [vmem:[#allocation15 + $0x148] sm:$0xff] %v6095_v7   ;;  %vm4313_vm8 = vmand %vm4121_vm7, %vm4217_vm11  ;;  %vm3646_vm14 = vcmp.ne.s32.totalorder %v3458_v4, 0  ;;  %vm3742_vm12 = vcmp.lt.s32.totalorder %v3458_v4, 0  ;;  %v3934_v40 = vadd.s32 24, %v3458_v4  ;;  %v3436_v48 = vsub.s32 %v10406_v47, %v3435_v41  ;;  %v11012_v47 = vld [vmem:[#allocation26_spill] sm:$0xff]  ;;  %v11014_v41 = vld [vmem:[#allocation27_spill] sm:$0xff] }
 0x272   :  { %v4601_v43 = vsel %vm4313_vm8, %v2294_v5, 0.0  ;;  %vm3838_vm4 = vmand %vm3742_vm12, %vm3646_vm14  ;;  %v10492_v28 = vmul.u32.u64.low 2863311531, %v2397_v0  ;;  %v10493_v14 = vmul.u32.u64.high 2863311531, %v2397_v0, %v10492_v28  ;;  %v2204_v9 = vadd.f32 %v10155_v52, %v2101_v21  ;;  %v11015_v21 = vld [vmem:[#allocation28_spill] sm:$0xff] }
 0x273   :  { %v6090_v15 = vpack.c.bf16 %v4601_v43, %v4600_v51  ;;  %v4030_v53 = vsel %vm3838_vm4, %v3934_v40, %v3458_v4  ;;  %vm3644_vm2 = vcmp.ne.s32.totalorder %v3436_v48, 0  ;;  %vm3740_vm13 = vcmp.lt.s32.totalorder %v3436_v48, 0 }
 0x274   :  { %vm4126_vm5 = vcmp.ge.s32.totalorder %v4030_v53, 1  ;;  %vm3836_vm1 = vmand %vm3740_vm13, %vm3644_vm2  ;;  %v3932_v24 = vadd.s32 24, %v3436_v48  ;;  %v2395_v35 = vadd.s32 680, %v7804_v3  ;;  %vm4222_vm6 = vcmp.lt.s32.totalorder %v4030_v53, 17 }
 0x275   :  { %6213 = vst [vmem:[#allocation15 + $0x140] sm:$0xff] %v6090_v15   ;;  %v5865_v44 = vpack.c.bf16 %v11012_v47, %v10233_v57  ;;  %v5860_v32 = vpack.c.bf16 %v10255_v27, %v11013_v59  ;;  %v2400_v46 = vadd.s32 720, %v7804_v3  ;;  %v3467_v1 = vshrl.u32 %v10493_v14, 4  ;;  %vm4318_vm10 = vmand %vm4126_vm5, %vm4222_vm6 }
 0x276   :  { %v4028_v58 = vsel %vm3836_vm1, %v3932_v24, %v3436_v48  ;;  %v10506_v23 = vadd.f32 %v10155_v52, %v2099_v38  ;;  %v2299_v37 = vmax.f32 %v10479_v55, 0.0  ;;  %v2297_v31 = vmax.f32 %v10483_v54, 0.0  ;;  %v11016_v24 = vld [vmem:[#allocation30_spill] sm:$0xff] }
 0x277   :  { %vm4124_vm15 = vcmp.ge.s32.totalorder %v4028_v58, 1  ;;  %v10509_v11 = vmul.u32.u64.low 2863311531, %v2395_v35  ;;  %v10510_v42 = vmul.u32.u64.high 2863311531, %v2395_v35, %v10509_v11  ;;  %6169 = vst [vmem:[#allocation14 + $0x158] sm:$0xff] %v5865_v44   ;;  %6168 = vst [vmem:[#allocation14 + $0x150] sm:$0xff] %v5860_v32   ;;  %vm4220_vm0 = vcmp.lt.s32.totalorder %v4028_v58, 17 }
 0x278   :  { %v3468_v57 = vmul.u32 24, %v3467_v1  ;;  %v10513_v27 = vmul.u32.u64.low 2863311531, %v2400_v46  ;;  %v10514_v10 = vmul.u32.u64.high 2863311531, %v2400_v46, %v10513_v27  ;;  %v2300_v33 = vmax.f32 %v2204_v9, 0.0  ;;  %vm4316_vm3 = vmand %vm4124_vm15, %vm4220_vm0 }
 0x279   :  { %v2398_v22 = vadd.s32 704, %v7804_v3  ;;  %v2298_v13 = vmax.f32 %v10506_v23, 0.0  ;;  %v2104_v49 = vmul.f32 %v10130_v6, %v10263_v12  ;;  %v10522_v60 = vadd.s32 728, %v7804_v3 }
 0x27a   :  { %v3469_v62 = vsub.s32 %v2397_v0, %v3468_v57  ;;  %v4606_v8 = vsel %vm4318_vm10, %v2299_v37, 0.0  ;;  %v3445_v26 = vshrl.u32 %v10510_v42, 4  ;;  %v3500_v55 = vshrl.u32 %v10514_v10, 4 }
 0x27b   :  { %v10526_v5 = vmul.u32.u64.low 2863311531, %v2398_v22  ;;  %v10527_v45 = vmul.u32.u64.high 2863311531, %v2398_v22, %v10526_v5  ;;  %v2102_v12 = vmul.f32 %v10130_v6, %v10269_v16  ;;  %v4604_v29 = vsel %vm4316_vm3, %v2297_v31, 0.0 }
 0x27c   :  { %vm3647_vm9 = vcmp.ne.s32.totalorder %v3469_v62, 0  ;;  %vm3743_vm7 = vcmp.lt.s32.totalorder %v3469_v62, 0  ;;  %v3935_v17 = vadd.s32 24, %v3469_v62  ;;  %v3446_v2 = vmul.u32 24, %v3445_v26 }
 0x27d   :  { %vm3839_vm11 = vmand %vm3743_vm7, %vm3647_vm9  ;;  %v10533_v34 = vmul.u32.u64.low 2863311531, %v10522_v60  ;;  %v10534_v30 = vmul.u32.u64.high 2863311531, %v10522_v60, %v10533_v34  ;;  %v10537_v54 = vadd.f32 %v10155_v52, %v2104_v49  ;;  %v3501_v0 = vmul.u32 24, %v3500_v55 }
 0x27e   :  { %v4031_v19 = vsel %vm3839_vm11, %v3935_v17, %v3469_v62  ;;  %v3447_v7 = vsub.s32 %v2395_v35, %v3446_v2  ;;  %v3478_v36 = vshrl.u32 %v10527_v45, 4  ;;  %v2105_v16 = vmul.f32 %v10130_v6, %v11014_v41  ;;  %v11017_v35 = vld [vmem:[#allocation29_spill] sm:$0xff] }
 0x27f   :  { %vm4127_vm8 = vcmp.ge.s32.totalorder %v4031_v19, 1  ;;  %vm4223_vm14 = vcmp.lt.s32.totalorder %v4031_v19, 17  ;;  %v3502_v4 = vsub.s32 %v2400_v46, %v3501_v0  ;;  %v10543_v51 = vadd.s32 712, %v7804_v3 }
 0x280   :  { %vm4319_vm12 = vmand %vm4127_vm8, %vm4223_vm14  ;;  %v5875_v40 = vpack.c.bf16 %v10291_v61, %v11015_v21  ;;  %vm3645_vm4 = vcmp.ne.s32.totalorder %v3447_v7, 0  ;;  %vm3741_vm2 = vcmp.lt.s32.totalorder %v3447_v7, 0  ;;  %v3933_v43 = vadd.s32 24, %v3447_v7 }
 0x281   :  { %v4607_v48 = vsel %vm4319_vm12, %v2300_v33, 0.0  ;;  %vm3837_vm13 = vmand %vm3741_vm2, %vm3645_vm4  ;;  %vm3650_vm5 = vcmp.ne.s32.totalorder %v3502_v4, 0  ;;  %vm3746_vm1 = vcmp.lt.s32.totalorder %v3502_v4, 0  ;;  %v3938_v14 = vadd.s32 24, %v3502_v4 }
 0x282   :  { %v6105_v28 = vpack.c.bf16 %v4607_v48, %v4606_v8  ;;  %6171 = vst [vmem:[#allocation14 + $0x168] sm:$0xff] %v5875_v40   ;;  %v4029_v38 = vsel %vm3837_vm13, %v3933_v43, %v3447_v7  ;;  %vm3842_vm6 = vmand %vm3746_vm1, %vm3650_vm5  ;;  %v3479_v15 = vmul.u32 24, %v3478_v36  ;;  %v3511_v53 = vshrl.u32 %v10534_v30, 4  ;;  %v6786_v48 = vld [vmem:[#allocation13] ss:$0 sm:$0xff] }
 0x283   :  { %v5870_v9 = vpack.c.bf16 %v11016_v24, %v10289_v20  ;;  %vm4125_vm15 = vcmp.ge.s32.totalorder %v4029_v38, 1  ;;  %vm4221_vm10 = vcmp.lt.s32.totalorder %v4029_v38, 17  ;;  %v4034_v61 = vsel %vm3842_vm6, %v3938_v14, %v3502_v4 }
 0x284   :  { %6216 = vst [vmem:[#allocation15 + $0x158] sm:$0xff] %v6105_v28   ;;  %v2103_v47 = vmul.f32 %v10130_v6, %v11017_v35  ;;  %vm4317_vm0 = vmand %vm4125_vm15, %vm4221_vm10  ;;  %v10553_v44 = vadd.f32 %v10155_v52, %v2102_v12  ;;  %v3480_v59 = vsub.s32 %v2398_v22, %v3479_v15  ;;  %v2208_v32 = vadd.f32 %v10155_v52, %v2105_v16 }
 0x285   :  { %v3512_v46 = vmul.u32 24, %v3511_v53  ;;  %6170 = vst [vmem:[#allocation14 + $0x160] sm:$0xff] %v5870_v9   ;;  %v4605_v58 = vsel %vm4317_vm0, %v2298_v13, 0.0  ;;  %vm4130_vm3 = vcmp.ge.s32.totalorder %v4034_v61, 1  ;;  %vm4226_vm9 = vcmp.lt.s32.totalorder %v4034_v61, 17 }
 0x286   :  { %v10557_v20 = vmul.u32.u64.low 2863311531, %v10543_v51  ;;  %v10558_v1 = vmul.u32.u64.high 2863311531, %v10543_v51, %v10557_v20  ;;  %v6100_v23 = vpack.c.bf16 %v4605_v58, %v4604_v29  ;;  %vm3648_vm7 = vcmp.ne.s32.totalorder %v3480_v59, 0  ;;  %vm4322_vm14 = vmand %vm4130_vm3, %vm4226_vm9  ;;  %v6785_v29 = vld [vmem:[#allocation11] ss:$0 sm:$0xff] }
 0x287   :  { %vm3744_vm11 = vcmp.lt.s32.totalorder %v3480_v59, 0  ;;  %v3936_v6 = vadd.s32 24, %v3480_v59  ;;  %v3513_v37 = vsub.s32 %v10522_v60, %v3512_v46  ;;  %v10562_v11 = vadd.f32 %v10155_v52, %v2103_v47 }
 0x288   :  { %vm3840_vm8 = vmand %vm3744_vm11, %vm3648_vm7  ;;  %v2404_v42 = vadd.s32 752, %v7804_v3  ;;  %6215 = vst [vmem:[#allocation15 + $0x150] sm:$0xff] %v6100_v23   ;;  %v2303_v57 = vmax.f32 %v10537_v54, 0.0  ;;  %v2301_v27 = vmax.f32 %v10553_v44, 0.0  ;;  %v10569_v31 = vadd.s32 736, %v7804_v3 }
 0x289   :  { %vm3651_vm12 = vcmp.ne.s32.totalorder %v3513_v37, 0  ;;  %vm3747_vm4 = vcmp.lt.s32.totalorder %v3513_v37, 0  ;;  %v3939_v10 = vadd.s32 24, %v3513_v37  ;;  %v4032_v33 = vsel %vm3840_vm8, %v3936_v6, %v3480_v59 }
 0x28a   :  { %v2304_v22 = vmax.f32 %v2208_v32, 0.0  ;;  %vm3843_vm2 = vmand %vm3747_vm4, %vm3651_vm12  ;;  %v3489_v52 = vshrl.u32 %v10558_v1, 4  ;;  %v10573_v62 = vadd.s32 760, %v7804_v3  ;;  %v2302_v49 = vmax.f32 %v10562_v11, 0.0 }
 0x28b   :  { %v4035_v13 = vsel %vm3843_vm2, %v3939_v10, %v3513_v37  ;;  %v10576_v60 = vmul.u32.u64.low 2863311531, %v2404_v42  ;;  %v10577_v8 = vmul.u32.u64.high 2863311531, %v2404_v42, %v10576_v60  ;;  %v4610_v26 = vsel %vm4322_vm14, %v2303_v57, 0.0 }
 0x28c   :  { %vm4131_vm13 = vcmp.ge.s32.totalorder %v4035_v13, 1  ;;  %vm4227_vm5 = vcmp.lt.s32.totalorder %v4035_v13, 17  ;;  %v3490_v5 = vmul.u32 24, %v3489_v52  ;;  %vm4128_vm1 = vcmp.ge.s32.totalorder %v4032_v33, 1 }
 0x28d   :  { %vm4224_vm6 = vcmp.lt.s32.totalorder %v4032_v33, 17  ;;  %vm4323_vm15 = vmand %vm4131_vm13, %vm4227_vm5  ;;  %v10580_v45 = vmul.u32.u64.low 2863311531, %v10569_v31  ;;  %v10581_v17 = vmul.u32.u64.high 2863311531, %v10569_v31, %v10580_v45  ;;  %v2108_v19 = vmul.f32 %v6785_v29, %v10310_v56 }
 0x28e   :  { %v4611_v55 = vsel %vm4323_vm15, %v2304_v22, 0.0  ;;  %v3491_v2 = vsub.s32 %v10543_v51, %v3490_v5  ;;  %v10585_v12 = vmul.u32.u64.low 2863311531, %v10573_v62  ;;  %v10586_v34 = vmul.u32.u64.high 2863311531, %v10573_v62, %v10585_v12  ;;  %vm10595_vm10 = vmand %vm4128_vm1, %vm4224_vm6 }
 0x28f   :  { %v6115_v30 = vpack.c.bf16 %v4611_v55, %v4610_v26  ;;  %v3544_v54 = vshrl.u32 %v10577_v8, 4  ;;  %v10591_v0 = vadd.s32 744, %v7804_v3  ;;  %v5885_v4 = vpack.c.bf16 %v10347_v39, %v10328_v50 }
 0x290   :  { %vm3649_vm0 = vcmp.ne.s32.totalorder %v3491_v2, 0  ;;  %vm3745_vm3 = vcmp.lt.s32.totalorder %v3491_v2, 0  ;;  %v3937_v36 = vadd.s32 24, %v3491_v2  ;;  %v3522_v41 = vshrl.u32 %v10581_v17, 4 }
 0x291   :  { %6218 = vst [vmem:[#allocation15 + $0x168] sm:$0xff] %v6115_v30   ;;  %vm3841_vm9 = vmand %vm3745_vm3, %vm3649_vm0  ;;  %v3545_v56 = vmul.u32 24, %v3544_v54  ;;  %v2109_v3 = vmul.f32 %v6785_v29, %v10326_v63  ;;  %v5880_v16 = vpack.c.bf16 %v10354_v25, %v10344_v18  ;;  %v3555_v21 = vshrl.u32 %v10586_v34, 4 }
 0x292   :  { %v4033_v51 = vsel %vm3841_vm9, %v3937_v36, %v3491_v2  ;;  %v10609_v50 = vmul.u32.u64.low 2863311531, %v10591_v0  ;;  %v10610_v39 = vmul.u32.u64.high 2863311531, %v10591_v0, %v10609_v50  ;;  %6173 = vst [vmem:[#allocation14 + $0x178] sm:$0xff] %v5885_v4   ;;  %v3523_v63 = vmul.u32 24, %v3522_v41 }
 0x293   :  { %vm4129_vm7 = vcmp.ge.s32.totalorder %v4033_v51, 1  ;;  %vm4225_vm11 = vcmp.lt.s32.totalorder %v4033_v51, 17  ;;  %v3546_v40 = vsub.s32 %v2404_v42, %v3545_v56  ;;  %6172 = vst [vmem:[#allocation14 + $0x170] sm:$0xff] %v5880_v16   ;;  %v4608_v18 = vsel %vm10595_vm10, %v2301_v27, 0.0 }
 0x294   :  { %vm10614_vm8 = vmand %vm4129_vm7, %vm4225_vm11  ;;  %v2211_v43 = vadd.f32 %v6786_v48, %v2108_v19  ;;  %v3556_v28 = vmul.u32 24, %v3555_v21 }
 0x295   :  { %6952 = shalt.err (!%p6949_p4)
}
 0x296   :  { %s6953_s19 = scalar_lea.hbm %s10694_s7, 6144 }
 0x297   :  { %p6954_p5 = scmp.ne.s32.totalorder %s10694_s7, %s6953_s19  ;;  %p6957_p6 = scmp.lt.u32.totalorder %s6953_s19, %s10694_s7 }
 0x299   :  { %p6959_p7 = pnand %p6957_p6, %p6954_p5 }
 0x29b   :  { %6962 = shalt.err (!%p6959_p7)
}
 0x29c   :  { %5203 = dma.vmem_to_hbm [thread:$0]  %s10605_s13, 6144, %s10694_s7, [#allocation4], %s7021_s1, %s7021_s1, %s7022_s10   ;;  %v4609_v14 = vsel %vm10614_vm8, %v2302_v49, 0.0  ;;  %vm3654_vm14 = vcmp.ne.s32.totalorder %v3546_v40, 0  ;;  %vm3750_vm12 = vcmp.lt.s32.totalorder %v3546_v40, 0  ;;  %v3942_v38 = vadd.s32 24, %v3546_v40 }
 0x29d   :  { %v6110_v15 = vpack.c.bf16 %v4609_v14, %v4608_v18  ;;  %vm3846_vm4 = vmand %vm3750_vm12, %vm3654_vm14  ;;  %v3524_v53 = vsub.s32 %v10569_v31, %v3523_v63  ;;  %v3557_v24 = vsub.s32 %v10573_v62, %v3556_v28  ;;  %v3533_v9 = vshrl.u32 %v10610_v39, 4  ;;  %v11022_v35 = vld [vmem:[#allocation31_spill] sm:$0xff]  ;;  %v11023_v59 = vld [vmem:[#allocation32_spill] sm:$0xff]  ;;  %s7031_s7 = smov [#allocation15]   ;;  %s7032_s12 = smov [#allocation17]  }
 0x29e   :  { %v4038_v61 = vsel %vm3846_vm4, %v3942_v38, %v3546_v40  ;;  %v2106_v47 = vmul.f32 %v6785_v29, %v11022_v35  ;;  %v2212_v44 = vadd.f32 %v6786_v48, %v2109_v3  ;;  %v2107_v32 = vmul.f32 %v6785_v29, %v11023_v59  ;;  %s5209_s3 = sshll.u32 %s7031_s7, 4  ;;  %s5221_s26 = sshll.u32 %s7032_s12, 4  ;;  %s5210_s3 = int_to_ptr.vmem [resolvable:$true] %s5209_s3  ;;  %s10650_s26 = int_to_ptr.vmem [resolvable:$true] %s5221_s26 }
 0x29f   :  { %6217 = vst [vmem:[#allocation15 + $0x160] sm:$0xff] %v6110_v15   ;;  %vm4134_vm2 = vcmp.ge.s32.totalorder %v4038_v61, 1  ;;  %vm4230_vm13 = vcmp.lt.s32.totalorder %v4038_v61, 17  ;;  %vm3652_vm5 = vcmp.ne.s32.totalorder %v3524_v53, 0  ;;  %vm3748_vm1 = vcmp.lt.s32.totalorder %v3524_v53, 0  ;;  %s6963_s27 = scalar_lea.vmem %s5210_s3, 6144  ;;  %p6968_p9 = scmp.lt.s32.totalorder %s5210_s3, %s5210_s3 }
 0x2a0   :  { %v3940_v46 = vadd.s32 24, %v3524_v53  ;;  %vm3655_vm6 = vcmp.ne.s32.totalorder %v3557_v24, 0  ;;  %vm3751_vm15 = vcmp.lt.s32.totalorder %v3557_v24, 0  ;;  %v3943_v58 = vadd.s32 24, %v3557_v24  ;;  %vm3844_vm10 = vmand %vm3748_vm1, %vm3652_vm5  ;;  %p6964_p8 = scmp.ne.s32.totalorder %s5210_s3, %s6963_s27  ;;  %p6969_p10 = scmp.lt.s32.totalorder %s6963_s27, %s6963_s27 }
 0x2a1   :  { %v2307_v20 = vmax.f32 %v2211_v43, 0.0  ;;  %v3534_v1 = vmul.u32 24, %v3533_v9  ;;  %v2209_v23 = vadd.f32 %v6786_v48, %v2106_v47  ;;  %v2308_v37 = vmax.f32 %v2212_v44, 0.0  ;;  %vm3847_vm0 = vmand %vm3751_vm15, %vm3655_vm6 }
 0x2a2   :  { %v4036_v6 = vsel %vm3844_vm10, %v3940_v46, %v3524_v53  ;;  %v2210_v11 = vadd.f32 %v6786_v48, %v2107_v32  ;;  %vm4326_vm3 = vmand %vm4134_vm2, %vm4230_vm13  ;;  %v4039_v42 = vsel %vm3847_vm0, %v3943_v58, %v3557_v24  ;;  %p6970_p11 = por %p6969_p10, %p6968_p9 }
 0x2a3   :  { %v3535_v57 = vsub.s32 %v10591_v0, %v3534_v1  ;;  %vm4132_vm9 = vcmp.ge.s32.totalorder %v4036_v6, 1  ;;  %vm4228_vm7 = vcmp.lt.s32.totalorder %v4036_v6, 17  ;;  %vm4135_vm11 = vcmp.ge.s32.totalorder %v4039_v42, 1 }
 0x2a4   :  { %vm4231_vm8 = vcmp.lt.s32.totalorder %v4039_v42, 17  ;;  %v4614_v10 = vsel %vm4326_vm3, %v2307_v20, 0.0  ;;  %v2305_v31 = vmax.f32 %v2209_v23, 0.0  ;;  %v2306_v22 = vmax.f32 %v2210_v11, 0.0  ;;  %vm4324_vm1 = vmand %vm4132_vm9, %vm4228_vm7  ;;  %p6971_p12 = pnand %p6970_p11, %p6964_p8 }
 0x2a5   :  { %vm4327_vm14 = vmand %vm4135_vm11, %vm4231_vm8  ;;  %vm3653_vm12 = vcmp.ne.s32.totalorder %v3535_v57, 0  ;;  %vm3749_vm4 = vcmp.lt.s32.totalorder %v3535_v57, 0  ;;  %v3941_v27 = vadd.s32 24, %v3535_v57 }
 0x2a6   :  { %v4615_v33 = vsel %vm4327_vm14, %v2308_v37, 0.0  ;;  %vm3845_vm5 = vmand %vm3749_vm4, %vm3653_vm12  ;;  %v4612_v13 = vsel %vm4324_vm1, %v2305_v31, 0.0 }
 0x2a7   :  { %v6125_v52 = vpack.c.bf16 %v4615_v33, %v4614_v10  ;;  %v4037_v62 = vsel %vm3845_vm5, %v3941_v27, %v3535_v57 }
 0x2a8   :  { %vm4133_vm2 = vcmp.ge.s32.totalorder %v4037_v62, 1  ;;  %vm4229_vm13 = vcmp.lt.s32.totalorder %v4037_v62, 17 }
 0x2a9   :  { %6220 = vst [vmem:[#allocation15 + $0x178] sm:$0xff] %v6125_v52   ;;  %vm4325_vm6 = vmand %vm4133_vm2, %vm4229_vm13 }
 0x2aa   :  { %v4613_v49 = vsel %vm4325_vm6, %v2306_v22, 0.0 }
 0x2ab   :  { %v6120_v60 = vpack.c.bf16 %v4613_v49, %v4612_v13 }
 0x2ad   :  { %6219 = vst [vmem:[#allocation15 + $0x170] sm:$0xff] %v6120_v60  }
 0x2ae   :  { %6974 = shalt.err (!%p6971_p12)
}
 0x2af   :  { %s6975_s0 = scalar_lea.hbm %s10695_s8, 6144 }
 0x2b0   :  { %p6976_p13 = scmp.ne.s32.totalorder %s10695_s8, %s6975_s0  ;;  %p6979_p0 = scmp.lt.u32.totalorder %s6975_s0, %s10695_s8 }
 0x2b2   :  { %p6981_p1 = pnand %p6979_p0, %p6976_p13 }
 0x2b4   :  { %6984 = shalt.err (!%p6981_p1)
}
 0x2b5   :  { %5215 = dma.vmem_to_hbm [thread:$0]  %s5210_s3, 6144, %s10695_s8, [#allocation16], %s7021_s1, %s7021_s1, %s7022_s10  }
 0x2b6   :  { %s6985_s13 = scalar_lea.vmem %s10650_s26, 12288  ;;  %p6990_p3 = scmp.lt.s32.totalorder %s10650_s26, %s10650_s26 }
 0x2b7   :  { %p6986_p2 = scmp.ne.s32.totalorder %s10650_s26, %s6985_s13  ;;  %p6991_p4 = scmp.lt.s32.totalorder %s6985_s13, %s6985_s13 }
 0x2b9   :  { %p6992_p5 = por %p6991_p4, %p6990_p3 }
 0x2bb   :  { %p6993_p6 = pnand %p6992_p5, %p6986_p2 }
 0x2bd   :  { %6996 = shalt.err (!%p6993_p6)
}
 0x2be   :  { %s6997_s17 = scalar_lea.hbm %s10696_s9, 12288 }
 0x2bf   :  { %p6998_p7 = scmp.ne.s32.totalorder %s10696_s9, %s6997_s17  ;;  %p7001_p8 = scmp.lt.u32.totalorder %s6997_s17, %s10696_s9 }
 0x2c1   :  { %p7003_p9 = pnand %p7001_p8, %p6998_p7 }
 0x2c3   :  { %7006 = shalt.err (!%p7003_p9)
}
 0x2c4   :  { %5227 = dma.vmem_to_hbm [thread:$0]  %s10650_s26, 12288, %s10696_s9, [#allocation16], %s7025_s5, %s7025_s5, %s7026_s16  }
 0x2c5   :  { %7015 = dma.done.wait [#allocation4], 6144  }
 0x2c6   :  { %7016 = vsyncadd [#allocation4], 4294961152 }
 0x2c7   :  { %7017 = dma.done.wait [#allocation16], 18432  }
 0x2c8   :  { %7018 = vsyncadd [#allocation16], 4294948864 }
 0x2c9   :  { %5237 = vsyncpa [#allocation3], 1 }
 0x2ca   :  { %5238 = vsyncpa [#allocation6], 1 }
 0x2cb   :  { %5239 = vsyncpa [#allocation9], 1 }
 0x2cc   :  { %5240 = vsyncpa [#allocation12], 1 }
 0x2cd   :  { %5241 = vsyncpa [#allocation4], 1 }
 0x2ce   :  { %5242 = vsyncpa [#allocation16], 1 }

</bundles_post_ra>
